<compile_context>
chip_gen: v6e
topology: v6e:2x2x1
jax: 0.10.0
libtpu: 0.0.40
codegen_flags: <defaults>
</compile_context>

<pallas_src>
import jax
import jax.numpy as jnp
from jax.experimental import pallas as pl
from jax.experimental.pallas import tpu as pltpu
import numpy as np


# ----------------------------- Pallas kernel --------------------------------

def _decoder_kernel(x2d_ref, f_ref,
                    wx0_ref, wf0_ref, b0_ref,        # layer-0 input proj (split)
                    whh0_ref, wih1_ref, whh1_ref,    # recurrent / layer-1 weights
                    b1_ref,
                    wfc_ref, bfc_ref,                # final Linear
                    out_ref,                         # (T*Bp, O)
                    g0_ref, h_ref):                  # scratch: (T,Bp,4H), (T*Bp,H)
    TBp = x2d_ref.shape[0]
    Bp = f_ref.shape[0]
    T = TBp // Bp
    H = whh0_ref.shape[0]

    # ---- hoisted layer-0 input projection (time-parallel, one MXU call) ----
    # f is constant over time; its gate contribution + fused b0 is folded into
    # G0 with one bulk broadcast-add so the loop body never touches it.
    gf0 = (jnp.dot(f_ref[...], wf0_ref[...],
                   preferred_element_type=jnp.float32) + b0_ref[...])   # (Bp, 4H)
    g0 = jnp.dot(x2d_ref[...], wx0_ref[...],
                 preferred_element_type=jnp.float32)                    # (T*Bp, 4H)
    g0_ref[...] = g0.reshape(T, Bp, 4 * H) + gf0[None, :, :]

    # Weights / biases held live across the (fully unrolled) recurrence.
    whh0 = whh0_ref[...]                                                # (H, 4H)
    wih1 = wih1_ref[...]                                                # (H, 4H)
    whh1 = whh1_ref[...]                                                # (H, 4H)
    b1b = jnp.broadcast_to(b1_ref[...], (Bp, 4 * H))                    # hoisted

    def cell_update(gates, c):
        # PyTorch gate order [i, f, g, o]; one sigmoid over the full gate vreg
        # (single EUP sequence), tanh only on the g slice.
        sig = jax.nn.sigmoid(gates)
        i_g = sig[:, 0 * H:1 * H]
        f_g = sig[:, 1 * H:2 * H]
        o_g = sig[:, 3 * H:4 * H]
        g_g = jnp.tanh(gates[:, 2 * H:3 * H])
        c_new = f_g * c + i_g * g_g
        h_new = o_g * jnp.tanh(c_new)
        return h_new, c_new

    h0 = jnp.zeros((Bp, H), jnp.float32)
    c0 = jnp.zeros((Bp, H), jnp.float32)
    h1 = jnp.zeros((Bp, H), jnp.float32)
    c1 = jnp.zeros((Bp, H), jnp.float32)
    rec0 = jnp.zeros((Bp, 4 * H), jnp.float32)       # h0_{t-1} @ w_hh0
    rec1 = jnp.zeros((Bp, 4 * H), jnp.float32)       # h1_{t-1} @ w_hh1

    # T is small and static: fully unrolled so every slice offset is static
    # and a multiple of the 8-sublane tile (Bp = 8k).
    for t in range(T):
        gates0 = g0_ref[t] + rec0
        h0, c0 = cell_update(gates0, c0)
        if t + 1 < T:
            # issued as soon as h0_t exists; overlaps with layer-1 work below
            rec0 = jnp.dot(h0, whh0, preferred_element_type=jnp.float32)
        gates1 = (jnp.dot(h0, wih1, preferred_element_type=jnp.float32)
                  + rec1 + b1b)
        h1, c1 = cell_update(gates1, c1)
        if t + 1 < T:
            rec1 = jnp.dot(h1, whh1, preferred_element_type=jnp.float32)
        h_ref[t * Bp:(t + 1) * Bp, :] = h1

    # ---- deferred output projection: one batched matmul + one bulk store ----
    out = (jnp.dot(h_ref[...], wfc_ref[...],
                   preferred_element_type=jnp.float32) + bfc_ref[...])
    out_ref[...] = out.astype(out_ref.dtype)


# ------------------------------- Wrapper -------------------------------------

def prepare_decoder_params(params, x_feat_size):
    """One-time weight preprocessing (kept out of the per-call path):
    split the layer-0 input weight into x-rows and f-rows so the (B,T,Dx+Df)
    concatenation is never materialized."""
    p = dict(params)
    w_ih0 = p.pop("w_ih0")                       # (Dx+Df, 4H)
    p["w_x0"] = w_ih0[:x_feat_size]              # (Dx, 4H)
    p["w_f0"] = w_ih0[x_feat_size:]              # (Df, 4H)
    return p


def decoder_forward(x, f, prep, hidden_size, output_size):
    """x: (B, T, Dx) float32, f: (B, Df) float32.  Returns (B, T, output_size)."""
    B, T, Dx = x.shape
    H = hidden_size
    O = output_size
    Bp = max(8, ((B + 7) // 8) * 8)              # pad batch to a full sublane tile

    # Time-major + batch padding (layout plumbing only; padded rows discarded).
    x_tm = jnp.transpose(x, (1, 0, 2))                       # (T, B, Dx)
    x_tm = jnp.pad(x_tm, ((0, 0), (0, Bp - B), (0, 0)))      # (T, Bp, Dx)
    x2d = x_tm.reshape(T * Bp, Dx)
    f_p = jnp.pad(f, ((0, Bp - B), (0, 0)))                  # (Bp, Df)

    args = (x2d, f_p, prep["w_x0"], prep["w_f0"], prep["b0"],
            prep["w_hh0"], prep["w_ih1"], prep["w_hh1"], prep["b1"],
            prep["w_fc"], prep["b_fc"])

    full = lambda a: pl.BlockSpec(a.shape, lambda: (0,) * a.ndim,
                                  memory_space=pltpu.MemorySpace.VMEM)

    out2d = pl.pallas_call(
        _decoder_kernel,
        out_shape=jax.ShapeDtypeStruct((T * Bp, O), jnp.float32),
        in_specs=[full(a) for a in args],
        out_specs=pl.BlockSpec((T * Bp, O), lambda: (0, 0),
                               memory_space=pltpu.MemorySpace.VMEM),
        scratch_shapes=[pltpu.VMEM((T, Bp, 4 * H), jnp.float32),   # G0 (+f proj +b0)
                        pltpu.VMEM((T * Bp, H), jnp.float32)],     # h1 history
    )(*args)

    # Drop padded batch rows, back to batch_first (B, T, O).
    return jnp.transpose(out2d.reshape(T, Bp, O)[:, :B, :], (1, 0, 2))


# --------------------------- Pure-JAX reference -------------------------------

def decoder_reference(x, f, params, hidden_size, output_size):
    B, T, _ = x.shape
    H = hidden_size
    f_exp = jnp.broadcast_to(f[:, None, :], (B, T, f.shape[-1]))
    xf = jnp.concatenate([x, f_exp], axis=-1)

    def cell(x_t, h, c, w_ih, w_hh, b):
        g = x_t @ w_ih + h @ w_hh + b
        i = jax.nn.sigmoid(g[:, :H])
        fg = jax.nn.sigmoid(g[:, H:2 * H])
        gg = jnp.tanh(g[:, 2 * H:3 * H])
        o = jax.nn.sigmoid(g[:, 3 * H:])
        c = fg * c + i * gg
        return o * jnp.tanh(c), c

    h0 = c0 = h1 = c1 = jnp.zeros((B, H), jnp.float32)
    outs = []
    for t in range(T):
        h0, c0 = cell(xf[:, t, :], h0, c0, params["w_ih0"], params["w_hh0"], params["b0"])
        h1, c1 = cell(h0, h1, c1, params["w_ih1"], params["w_hh1"], params["b1"])
        outs.append(h1 @ params["w_fc"] + params["b_fc"])
    return jnp.stack(outs, axis=1)


# --------------------------------- Main ---------------------------------------

if __name__ == "__main__":
    # Small shapes consistent with the module: T is fixed at 24 by the forward.
    B, T = 2, 24
    Dx, Df = 24, 8
    input_size = Dx + Df        # 32
    hidden_size = 32
    output_size = 16

    key = jax.random.PRNGKey(0)
    ks = jax.random.split(key, 12)
    u = 1.0 / np.sqrt(hidden_size)

    def uinit(k, shape):
        return jax.random.uniform(k, shape, jnp.float32, minval=-u, maxval=u)

    # PyTorch LSTM stacks gates as [i, f, g, o]; we store transposed weights
    # (in_dim, 4H) for right-multiplication, and fold b_ih + b_hh into one bias.
    params = {
        "w_ih0": uinit(ks[0], (input_size, 4 * hidden_size)),
        "w_hh0": uinit(ks[1], (hidden_size, 4 * hidden_size)),
        "b0":    uinit(ks[2], (1, 4 * hidden_size)) + uinit(ks[3], (1, 4 * hidden_size)),
        "w_ih1": uinit(ks[4], (hidden_size, 4 * hidden_size)),
        "w_hh1": uinit(ks[5], (hidden_size, 4 * hidden_size)),
        "b1":    uinit(ks[6], (1, 4 * hidden_size)) + uinit(ks[7], (1, 4 * hidden_size)),
        "w_fc":  uinit(ks[8], (hidden_size, output_size)),
        "b_fc":  uinit(ks[9], (1, output_size)),
    }

    x = jax.random.normal(ks[10], (B, T, Dx), jnp.float32)
    f = jax.random.normal(ks[11], (B, Df), jnp.float32)

    # One-time weight prep (out of the per-call path); jit fuses wrapper ops.
    prep = prepare_decoder_params(params, Dx)
    fwd = jax.jit(lambda x_, f_, p_: decoder_forward(x_, f_, p_, hidden_size, output_size))

    out = fwd(x, f, prep)
    out = jax.block_until_ready(out)

    ref = decoder_reference(x, f, params, hidden_size, output_size)
    np.testing.assert_allclose(np.asarray(out), np.asarray(ref), rtol=2e-5, atol=2e-5)

    assert out.shape == (B, T, output_size)
    print("KERNEL_OK")
</pallas_src>

<mosaic_0001>
module attributes {stable_mosaic.version = 11 : i64} {
  func.func @_decoder_kernel(%arg0: memref<192x24xf32, #tpu.memory_space<vmem>>, %arg1: memref<8x8xf32, #tpu.memory_space<vmem>>, %arg2: memref<24x128xf32, #tpu.memory_space<vmem>>, %arg3: memref<8x128xf32, #tpu.memory_space<vmem>>, %arg4: memref<1x128xf32, #tpu.memory_space<vmem>>, %arg5: memref<32x128xf32, #tpu.memory_space<vmem>>, %arg6: memref<32x128xf32, #tpu.memory_space<vmem>>, %arg7: memref<32x128xf32, #tpu.memory_space<vmem>>, %arg8: memref<1x128xf32, #tpu.memory_space<vmem>>, %arg9: memref<32x16xf32, #tpu.memory_space<vmem>>, %arg10: memref<1x16xf32, #tpu.memory_space<vmem>>, %arg11: memref<192x16xf32, #tpu.memory_space<vmem>>, %arg12: memref<24x8x128xf32, #tpu.memory_space<vmem>>, %arg13: memref<192x32xf32, #tpu.memory_space<vmem>>) attributes {dimension_semantics = [], scalar_prefetch = 0 : i64, scratch_operands = 2 : i64, tpu.core_type = #tpu.core_type<tc>} {
    %c0 = arith.constant 0 : index
    %c0_0 = arith.constant 0 : index
    %0 = vector.load %arg1[%c0, %c0_0] : memref<8x8xf32, #tpu.memory_space<vmem>>, vector<8x8xf32>
    %c0_1 = arith.constant 0 : index
    %c0_2 = arith.constant 0 : index
    %1 = vector.load %arg3[%c0_1, %c0_2] : memref<8x128xf32, #tpu.memory_space<vmem>>, vector<8x128xf32>
    %cst = arith.constant dense<0.000000e+00> : vector<8x128xf32>
    %2 = tpu.matmul %0, %1, %cst {dimension_numbers = #tpu.dot_dimension_numbers<[1], [0], [0], [1], [0, 0, 1, 1], [], []>} : vector<8x8xf32>, vector<8x128xf32>, vector<8x128xf32> -> vector<8x128xf32>
    %c0_3 = arith.constant 0 : index
    %c0_4 = arith.constant 0 : index
    %3 = vector.load %arg4[%c0_3, %c0_4] : memref<1x128xf32, #tpu.memory_space<vmem>>, vector<1x128xf32>
    %4 = vector.broadcast %3 : vector<1x128xf32> to vector<8x128xf32>
    %5 = arith.addf %2, %4 : vector<8x128xf32>
    %c0_5 = arith.constant 0 : index
    %c0_6 = arith.constant 0 : index
    %6 = vector.load %arg0[%c0_5, %c0_6] : memref<192x24xf32, #tpu.memory_space<vmem>>, vector<192x24xf32>
    %c0_7 = arith.constant 0 : index
    %c0_8 = arith.constant 0 : index
    %7 = vector.load %arg2[%c0_7, %c0_8] : memref<24x128xf32, #tpu.memory_space<vmem>>, vector<24x128xf32>
    %cst_9 = arith.constant dense<0.000000e+00> : vector<192x128xf32>
    %8 = tpu.matmul %6, %7, %cst_9 {dimension_numbers = #tpu.dot_dimension_numbers<[1], [0], [0], [1], [0, 0, 1, 1], [], []>} : vector<192x24xf32>, vector<24x128xf32>, vector<192x128xf32> -> vector<192x128xf32>
    %9 = vector.shape_cast %8 : vector<192x128xf32> to vector<24x8x128xf32>
    %10 = vector.shape_cast %5 : vector<8x128xf32> to vector<1x8x128xf32>
    %11 = vector.broadcast %10 : vector<1x8x128xf32> to vector<24x8x128xf32>
    %12 = arith.addf %9, %11 : vector<24x8x128xf32>
    %c0_10 = arith.constant 0 : index
    %c0_11 = arith.constant 0 : index
    %c0_12 = arith.constant 0 : index
    %13 = vector.load %arg12[%c0_10, %c0_11, %c0_12] : memref<24x8x128xf32, #tpu.memory_space<vmem>>, vector<24x8x128xf32>
    tpu.vector_store %arg12[%c0_10, %c0_11, %c0_12], %12 {strides = array<i32>} : memref<24x8x128xf32, #tpu.memory_space<vmem>>, vector<24x8x128xf32>,
    %c0_13 = arith.constant 0 : index
    %c0_14 = arith.constant 0 : index
    %14 = vector.load %arg5[%c0_13, %c0_14] : memref<32x128xf32, #tpu.memory_space<vmem>>, vector<32x128xf32>
    %c0_15 = arith.constant 0 : index
    %c0_16 = arith.constant 0 : index
    %15 = vector.load %arg6[%c0_15, %c0_16] : memref<32x128xf32, #tpu.memory_space<vmem>>, vector<32x128xf32>
    %c0_17 = arith.constant 0 : index
    %c0_18 = arith.constant 0 : index
    %16 = vector.load %arg7[%c0_17, %c0_18] : memref<32x128xf32, #tpu.memory_space<vmem>>, vector<32x128xf32>
    %c0_19 = arith.constant 0 : index
    %c0_20 = arith.constant 0 : index
    %17 = vector.load %arg8[%c0_19, %c0_20] : memref<1x128xf32, #tpu.memory_space<vmem>>, vector<1x128xf32>
    %18 = vector.shape_cast %17 : vector<1x128xf32> to vector<1x128xf32>
    %19 = vector.broadcast %18 : vector<1x128xf32> to vector<8x128xf32>
    %cst_21 = arith.constant 0.000000e+00 : f32
    %20 = vector.broadcast %cst_21 : f32 to vector<8x32xf32>
    %cst_22 = arith.constant 0.000000e+00 : f32
    %21 = vector.broadcast %cst_22 : f32 to vector<8x32xf32>
    %cst_23 = arith.constant 0.000000e+00 : f32
    %22 = vector.broadcast %cst_23 : f32 to vector<8x128xf32>
    %cst_24 = arith.constant 0.000000e+00 : f32
    %23 = vector.broadcast %cst_24 : f32 to vector<8x128xf32>
    %c0_25 = arith.constant 0 : index
    %c0_26 = arith.constant 0 : index
    %c0_27 = arith.constant 0 : index
    %24 = vector.load %arg12[%c0_25, %c0_26, %c0_27] : memref<24x8x128xf32, #tpu.memory_space<vmem>>, vector<1x8x128xf32>
    %25 = vector.shape_cast %24 : vector<1x8x128xf32> to vector<8x128xf32>
    %26 = arith.addf %25, %22 : vector<8x128xf32>
    %27 = arith.negf %26 : vector<8x128xf32>
    %28 = math.exp %27 : vector<8x128xf32>
    %cst_28 = arith.constant 1.000000e+00 : f32
    %29 = vector.broadcast %cst_28 : f32 to vector<8x128xf32>
    %30 = arith.addf %29, %28 : vector<8x128xf32>
    %31 = arith.divf %29, %30 : vector<8x128xf32>
    %32 = vector.extract_strided_slice %31 {offsets = [0, 0], sizes = [8, 32], strides = [1, 1]} : vector<8x128xf32> to vector<8x32xf32>
    %33 = vector.extract_strided_slice %31 {offsets = [0, 32], sizes = [8, 32], strides = [1, 1]} : vector<8x128xf32> to vector<8x32xf32>
    %34 = vector.extract_strided_slice %31 {offsets = [0, 96], sizes = [8, 32], strides = [1, 1]} : vector<8x128xf32> to vector<8x32xf32>
    %35 = vector.extract_strided_slice %26 {offsets = [0, 64], sizes = [8, 32], strides = [1, 1]} : vector<8x128xf32> to vector<8x32xf32>
    %36 = math.tanh %35 : vector<8x32xf32>
    %37 = arith.mulf %33, %20 : vector<8x32xf32>
    %38 = arith.mulf %32, %36 : vector<8x32xf32>
    %39 = arith.addf %37, %38 : vector<8x32xf32>
    %40 = math.tanh %39 : vector<8x32xf32>
    %41 = arith.mulf %34, %40 : vector<8x32xf32>
    %cst_29 = arith.constant dense<0.000000e+00> : vector<8x128xf32>
    %42 = tpu.matmul %41, %14, %cst_29 {dimension_numbers = #tpu.dot_dimension_numbers<[1], [0], [0], [1], [0, 0, 1, 1], [], []>} : vector<8x32xf32>, vector<32x128xf32>, vector<8x128xf32> -> vector<8x128xf32>
    %cst_30 = arith.constant dense<0.000000e+00> : vector<8x128xf32>
    %43 = tpu.matmul %41, %15, %cst_30 {dimension_numbers = #tpu.dot_dimension_numbers<[1], [0], [0], [1], [0, 0, 1, 1], [], []>} : vector<8x32xf32>, vector<32x128xf32>, vector<8x128xf32> -> vector<8x128xf32>
    %44 = arith.addf %43, %23 : vector<8x128xf32>
    %45 = arith.addf %44, %19 : vector<8x128xf32>
    %46 = arith.negf %45 : vector<8x128xf32>
    %47 = math.exp %46 : vector<8x128xf32>
    %cst_31 = arith.constant 1.000000e+00 : f32
    %48 = vector.broadcast %cst_31 : f32 to vector<8x128xf32>
    %49 = arith.addf %48, %47 : vector<8x128xf32>
    %50 = arith.divf %48, %49 : vector<8x128xf32>
    %51 = vector.extract_strided_slice %50 {offsets = [0, 0], sizes = [8, 32], strides = [1, 1]} : vector<8x128xf32> to vector<8x32xf32>
    %52 = vector.extract_strided_slice %50 {offsets = [0, 32], sizes = [8, 32], strides = [1, 1]} : vector<8x128xf32> to vector<8x32xf32>
    %53 = vector.extract_strided_slice %50 {offsets = [0, 96], sizes = [8, 32], strides = [1, 1]} : vector<8x128xf32> to vector<8x32xf32>
    %54 = vector.extract_strided_slice %45 {offsets = [0, 64], sizes = [8, 32], strides = [1, 1]} : vector<8x128xf32> to vector<8x32xf32>
    %55 = math.tanh %54 : vector<8x32xf32>
    %56 = arith.mulf %52, %21 : vector<8x32xf32>
    %57 = arith.mulf %51, %55 : vector<8x32xf32>
    %58 = arith.addf %56, %57 : vector<8x32xf32>
    %59 = math.tanh %58 : vector<8x32xf32>
    %60 = arith.mulf %53, %59 : vector<8x32xf32>
    %cst_32 = arith.constant dense<0.000000e+00> : vector<8x128xf32>
    %61 = tpu.matmul %60, %16, %cst_32 {dimension_numbers = #tpu.dot_dimension_numbers<[1], [0], [0], [1], [0, 0, 1, 1], [], []>} : vector<8x32xf32>, vector<32x128xf32>, vector<8x128xf32> -> vector<8x128xf32>
    %c0_33 = arith.constant 0 : index
    %c0_34 = arith.constant 0 : index
    %62 = vector.load %arg13[%c0_33, %c0_34] : memref<192x32xf32, #tpu.memory_space<vmem>>, vector<8x32xf32>
    tpu.vector_store %arg13[%c0_33, %c0_34], %60 {strides = array<i32>} : memref<192x32xf32, #tpu.memory_space<vmem>>, vector<8x32xf32>,
    %c1 = arith.constant 1 : index
    %c0_35 = arith.constant 0 : index
    %c0_36 = arith.constant 0 : index
    %63 = vector.load %arg12[%c1, %c0_35, %c0_36] : memref<24x8x128xf32, #tpu.memory_space<vmem>>, vector<1x8x128xf32>
    %64 = vector.shape_cast %63 : vector<1x8x128xf32> to vector<8x128xf32>
    %65 = arith.addf %64, %42 : vector<8x128xf32>
    %66 = arith.negf %65 : vector<8x128xf32>
    %67 = math.exp %66 : vector<8x128xf32>
    %cst_37 = arith.constant 1.000000e+00 : f32
    %68 = vector.broadcast %cst_37 : f32 to vector<8x128xf32>
    %69 = arith.addf %68, %67 : vector<8x128xf32>
    %70 = arith.divf %68, %69 : vector<8x128xf32>
    %71 = vector.extract_strided_slice %70 {offsets = [0, 0], sizes = [8, 32], strides = [1, 1]} : vector<8x128xf32> to vector<8x32xf32>
    %72 = vector.extract_strided_slice %70 {offsets = [0, 32], sizes = [8, 32], strides = [1, 1]} : vector<8x128xf32> to vector<8x32xf32>
    %73 = vector.extract_strided_slice %70 {offsets = [0, 96], sizes = [8, 32], strides = [1, 1]} : vector<8x128xf32> to vector<8x32xf32>
    %74 = vector.extract_strided_slice %65 {offsets = [0, 64], sizes = [8, 32], strides = [1, 1]} : vector<8x128xf32> to vector<8x32xf32>
    %75 = math.tanh %74 : vector<8x32xf32>
    %76 = arith.mulf %72, %39 : vector<8x32xf32>
    %77 = arith.mulf %71, %75 : vector<8x32xf32>
    %78 = arith.addf %76, %77 : vector<8x32xf32>
    %79 = math.tanh %78 : vector<8x32xf32>
    %80 = arith.mulf %73, %79 : vector<8x32xf32>
    %cst_38 = arith.constant dense<0.000000e+00> : vector<8x128xf32>
    %81 = tpu.matmul %80, %14, %cst_38 {dimension_numbers = #tpu.dot_dimension_numbers<[1], [0], [0], [1], [0, 0, 1, 1], [], []>} : vector<8x32xf32>, vector<32x128xf32>, vector<8x128xf32> -> vector<8x128xf32>
    %cst_39 = arith.constant dense<0.000000e+00> : vector<8x128xf32>
    %82 = tpu.matmul %80, %15, %cst_39 {dimension_numbers = #tpu.dot_dimension_numbers<[1], [0], [0], [1], [0, 0, 1, 1], [], []>} : vector<8x32xf32>, vector<32x128xf32>, vector<8x128xf32> -> vector<8x128xf32>
    %83 = arith.addf %82, %61 : vector<8x128xf32>
    %84 = arith.addf %83, %19 : vector<8x128xf32>
    %85 = arith.negf %84 : vector<8x128xf32>
    %86 = math.exp %85 : vector<8x128xf32>
    %cst_40 = arith.constant 1.000000e+00 : f32
    %87 = vector.broadcast %cst_40 : f32 to vector<8x128xf32>
    %88 = arith.addf %87, %86 : vector<8x128xf32>
    %89 = arith.divf %87, %88 : vector<8x128xf32>
    %90 = vector.extract_strided_slice %89 {offsets = [0, 0], sizes = [8, 32], strides = [1, 1]} : vector<8x128xf32> to vector<8x32xf32>
    %91 = vector.extract_strided_slice %89 {offsets = [0, 32], sizes = [8, 32], strides = [1, 1]} : vector<8x128xf32> to vector<8x32xf32>
    %92 = vector.extract_strided_slice %89 {offsets = [0, 96], sizes = [8, 32], strides = [1, 1]} : vector<8x128xf32> to vector<8x32xf32>
    %93 = vector.extract_strided_slice %84 {offsets = [0, 64], sizes = [8, 32], strides = [1, 1]} : vector<8x128xf32> to vector<8x32xf32>
    %94 = math.tanh %93 : vector<8x32xf32>
    %95 = arith.mulf %91, %58 : vector<8x32xf32>
    %96 = arith.mulf %90, %94 : vector<8x32xf32>
    %97 = arith.addf %95, %96 : vector<8x32xf32>
    %98 = math.tanh %97 : vector<8x32xf32>
    %99 = arith.mulf %92, %98 : vector<8x32xf32>
    %cst_41 = arith.constant dense<0.000000e+00> : vector<8x128xf32>
    %100 = tpu.matmul %99, %16, %cst_41 {dimension_numbers = #tpu.dot_dimension_numbers<[1], [0], [0], [1], [0, 0, 1, 1], [], []>} : vector<8x32xf32>, vector<32x128xf32>, vector<8x128xf32> -> vector<8x128xf32>
    %c8 = arith.constant 8 : index
    %c0_42 = arith.constant 0 : index
    %101 = vector.load %arg13[%c8, %c0_42] : memref<192x32xf32, #tpu.memory_space<vmem>>, vector<8x32xf32>
    tpu.vector_store %arg13[%c8, %c0_42], %99 {strides = array<i32>} : memref<192x32xf32, #tpu.memory_space<vmem>>, vector<8x32xf32>,
    %c2 = arith.constant 2 : index
    %c0_43 = arith.constant 0 : index
    %c0_44 = arith.constant 0 : index
    %102 = vector.load %arg12[%c2, %c0_43, %c0_44] : memref<24x8x128xf32, #tpu.memory_space<vmem>>, vector<1x8x128xf32>
    %103 = vector.shape_cast %102 : vector<1x8x128xf32> to vector<8x128xf32>
    %104 = arith.addf %103, %81 : vector<8x128xf32>
    %105 = arith.negf %104 : vector<8x128xf32>
    %106 = math.exp %105 : vector<8x128xf32>
    %cst_45 = arith.constant 1.000000e+00 : f32
    %107 = vector.broadcast %cst_45 : f32 to vector<8x128xf32>
    %108 = arith.addf %107, %106 : vector<8x128xf32>
    %109 = arith.divf %107, %108 : vector<8x128xf32>
    %110 = vector.extract_strided_slice %109 {offsets = [0, 0], sizes = [8, 32], strides = [1, 1]} : vector<8x128xf32> to vector<8x32xf32>
    %111 = vector.extract_strided_slice %109 {offsets = [0, 32], sizes = [8, 32], strides = [1, 1]} : vector<8x128xf32> to vector<8x32xf32>
    %112 = vector.extract_strided_slice %109 {offsets = [0, 96], sizes = [8, 32], strides = [1, 1]} : vector<8x128xf32> to vector<8x32xf32>
    %113 = vector.extract_strided_slice %104 {offsets = [0, 64], sizes = [8, 32], strides = [1, 1]} : vector<8x128xf32> to vector<8x32xf32>
    %114 = math.tanh %113 : vector<8x32xf32>
    %115 = arith.mulf %111, %78 : vector<8x32xf32>
    %116 = arith.mulf %110, %114 : vector<8x32xf32>
    %117 = arith.addf %115, %116 : vector<8x32xf32>
    %118 = math.tanh %117 : vector<8x32xf32>
    %119 = arith.mulf %112, %118 : vector<8x32xf32>
    %cst_46 = arith.constant dense<0.000000e+00> : vector<8x128xf32>
    %120 = tpu.matmul %119, %14, %cst_46 {dimension_numbers = #tpu.dot_dimension_numbers<[1], [0], [0], [1], [0, 0, 1, 1], [], []>} : vector<8x32xf32>, vector<32x128xf32>, vector<8x128xf32> -> vector<8x128xf32>
    %cst_47 = arith.constant dense<0.000000e+00> : vector<8x128xf32>
    %121 = tpu.matmul %119, %15, %cst_47 {dimension_numbers = #tpu.dot_dimension_numbers<[1], [0], [0], [1], [0, 0, 1, 1], [], []>} : vector<8x32xf32>, vector<32x128xf32>, vector<8x128xf32> -> vector<8x128xf32>
    %122 = arith.addf %121, %100 : vector<8x128xf32>
    %123 = arith.addf %122, %19 : vector<8x128xf32>
    %124 = arith.negf %123 : vector<8x128xf32>
    %125 = math.exp %124 : vector<8x128xf32>
    %cst_48 = arith.constant 1.000000e+00 : f32
    %126 = vector.broadcast %cst_48 : f32 to vector<8x128xf32>
    %127 = arith.addf %126, %125 : vector<8x128xf32>
    %128 = arith.divf %126, %127 : vector<8x128xf32>
    %129 = vector.extract_strided_slice %128 {offsets = [0, 0], sizes = [8, 32], strides = [1, 1]} : vector<8x128xf32> to vector<8x32xf32>
    %130 = vector.extract_strided_slice %128 {offsets = [0, 32], sizes = [8, 32], strides = [1, 1]} : vector<8x128xf32> to vector<8x32xf32>
    %131 = vector.extract_strided_slice %128 {offsets = [0, 96], sizes = [8, 32], strides = [1, 1]} : vector<8x128xf32> to vector<8x32xf32>
    %132 = vector.extract_strided_slice %123 {offsets = [0, 64], sizes = [8, 32], strides = [1, 1]} : vector<8x128xf32> to vector<8x32xf32>
    %133 = math.tanh %132 : vector<8x32xf32>
    %134 = arith.mulf %130, %97 : vector<8x32xf32>
    %135 = arith.mulf %129, %133 : vector<8x32xf32>
    %136 = arith.addf %134, %135 : vector<8x32xf32>
    %137 = math.tanh %136 : vector<8x32xf32>
    %138 = arith.mulf %131, %137 : vector<8x32xf32>
    %cst_49 = arith.constant dense<0.000000e+00> : vector<8x128xf32>
    %139 = tpu.matmul %138, %16, %cst_49 {dimension_numbers = #tpu.dot_dimension_numbers<[1], [0], [0], [1], [0, 0, 1, 1], [], []>} : vector<8x32xf32>, vector<32x128xf32>, vector<8x128xf32> -> vector<8x128xf32>
    %c16 = arith.constant 16 : index
    %c0_50 = arith.constant 0 : index
    %140 = vector.load %arg13[%c16, %c0_50] : memref<192x32xf32, #tpu.memory_space<vmem>>, vector<8x32xf32>
    tpu.vector_store %arg13[%c16, %c0_50], %138 {strides = array<i32>} : memref<192x32xf32, #tpu.memory_space<vmem>>, vector<8x32xf32>,
    %c3 = arith.constant 3 : index
    %c0_51 = arith.constant 0 : index
    %c0_52 = arith.constant 0 : index
    %141 = vector.load %arg12[%c3, %c0_51, %c0_52] : memref<24x8x128xf32, #tpu.memory_space<vmem>>, vector<1x8x128xf32>
    %142 = vector.shape_cast %141 : vector<1x8x128xf32> to vector<8x128xf32>
    %143 = arith.addf %142, %120 : vector<8x128xf32>
    %144 = arith.negf %143 : vector<8x128xf32>
    %145 = math.exp %144 : vector<8x128xf32>
    %cst_53 = arith.constant 1.000000e+00 : f32
    %146 = vector.broadcast %cst_53 : f32 to vector<8x128xf32>
    %147 = arith.addf %146, %145 : vector<8x128xf32>
    %148 = arith.divf %146, %147 : vector<8x128xf32>
    %149 = vector.extract_strided_slice %148 {offsets = [0, 0], sizes = [8, 32], strides = [1, 1]} : vector<8x128xf32> to vector<8x32xf32>
    %150 = vector.extract_strided_slice %148 {offsets = [0, 32], sizes = [8, 32], strides = [1, 1]} : vector<8x128xf32> to vector<8x32xf32>
    %151 = vector.extract_strided_slice %148 {offsets = [0, 96], sizes = [8, 32], strides = [1, 1]} : vector<8x128xf32> to vector<8x32xf32>
    %152 = vector.extract_strided_slice %143 {offsets = [0, 64], sizes = [8, 32], strides = [1, 1]} : vector<8x128xf32> to vector<8x32xf32>
    %153 = math.tanh %152 : vector<8x32xf32>
    %154 = arith.mulf %150, %117 : vector<8x32xf32>
    %155 = arith.mulf %149, %153 : vector<8x32xf32>
    %156 = arith.addf %154, %155 : vector<8x32xf32>
    %157 = math.tanh %156 : vector<8x32xf32>
    %158 = arith.mulf %151, %157 : vector<8x32xf32>
    %cst_54 = arith.constant dense<0.000000e+00> : vector<8x128xf32>
    %159 = tpu.matmul %158, %14, %cst_54 {dimension_numbers = #tpu.dot_dimension_numbers<[1], [0], [0], [1], [0, 0, 1, 1], [], []>} : vector<8x32xf32>, vector<32x128xf32>, vector<8x128xf32> -> vector<8x128xf32>
    %cst_55 = arith.constant dense<0.000000e+00> : vector<8x128xf32>
    %160 = tpu.matmul %158, %15, %cst_55 {dimension_numbers = #tpu.dot_dimension_numbers<[1], [0], [0], [1], [0, 0, 1, 1], [], []>} : vector<8x32xf32>, vector<32x128xf32>, vector<8x128xf32> -> vector<8x128xf32>
    %161 = arith.addf %160, %139 : vector<8x128xf32>
    %162 = arith.addf %161, %19 : vector<8x128xf32>
    %163 = arith.negf %162 : vector<8x128xf32>
    %164 = math.exp %163 : vector<8x128xf32>
    %cst_56 = arith.constant 1.000000e+00 : f32
    %165 = vector.broadcast %cst_56 : f32 to vector<8x128xf32>
    %166 = arith.addf %165, %164 : vector<8x128xf32>
    %167 = arith.divf %165, %166 : vector<8x128xf32>
    %168 = vector.extract_strided_slice %167 {offsets = [0, 0], sizes = [8, 32], strides = [1, 1]} : vector<8x128xf32> to vector<8x32xf32>
    %169 = vector.extract_strided_slice %167 {offsets = [0, 32], sizes = [8, 32], strides = [1, 1]} : vector<8x128xf32> to vector<8x32xf32>
    %170 = vector.extract_strided_slice %167 {offsets = [0, 96], sizes = [8, 32], strides = [1, 1]} : vector<8x128xf32> to vector<8x32xf32>
    %171 = vector.extract_strided_slice %162 {offsets = [0, 64], sizes = [8, 32], strides = [1, 1]} : vector<8x128xf32> to vector<8x32xf32>
    %172 = math.tanh %171 : vector<8x32xf32>
    %173 = arith.mulf %169, %136 : vector<8x32xf32>
    %174 = arith.mulf %168, %172 : vector<8x32xf32>
    %175 = arith.addf %173, %174 : vector<8x32xf32>
    %176 = math.tanh %175 : vector<8x32xf32>
    %177 = arith.mulf %170, %176 : vector<8x32xf32>
    %cst_57 = arith.constant dense<0.000000e+00> : vector<8x128xf32>
    %178 = tpu.matmul %177, %16, %cst_57 {dimension_numbers = #tpu.dot_dimension_numbers<[1], [0], [0], [1], [0, 0, 1, 1], [], []>} : vector<8x32xf32>, vector<32x128xf32>, vector<8x128xf32> -> vector<8x128xf32>
    %c24 = arith.constant 24 : index
    %c0_58 = arith.constant 0 : index
    %179 = vector.load %arg13[%c24, %c0_58] : memref<192x32xf32, #tpu.memory_space<vmem>>, vector<8x32xf32>
    tpu.vector_store %arg13[%c24, %c0_58], %177 {strides = array<i32>} : memref<192x32xf32, #tpu.memory_space<vmem>>, vector<8x32xf32>,
    %c4 = arith.constant 4 : index
    %c0_59 = arith.constant 0 : index
    %c0_60 = arith.constant 0 : index
    %180 = vector.load %arg12[%c4, %c0_59, %c0_60] : memref<24x8x128xf32, #tpu.memory_space<vmem>>, vector<1x8x128xf32>
    %181 = vector.shape_cast %180 : vector<1x8x128xf32> to vector<8x128xf32>
    %182 = arith.addf %181, %159 : vector<8x128xf32>
    %183 = arith.negf %182 : vector<8x128xf32>
    %184 = math.exp %183 : vector<8x128xf32>
    %cst_61 = arith.constant 1.000000e+00 : f32
    %185 = vector.broadcast %cst_61 : f32 to vector<8x128xf32>
    %186 = arith.addf %185, %184 : vector<8x128xf32>
    %187 = arith.divf %185, %186 : vector<8x128xf32>
    %188 = vector.extract_strided_slice %187 {offsets = [0, 0], sizes = [8, 32], strides = [1, 1]} : vector<8x128xf32> to vector<8x32xf32>
    %189 = vector.extract_strided_slice %187 {offsets = [0, 32], sizes = [8, 32], strides = [1, 1]} : vector<8x128xf32> to vector<8x32xf32>
    %190 = vector.extract_strided_slice %187 {offsets = [0, 96], sizes = [8, 32], strides = [1, 1]} : vector<8x128xf32> to vector<8x32xf32>
    %191 = vector.extract_strided_slice %182 {offsets = [0, 64], sizes = [8, 32], strides = [1, 1]} : vector<8x128xf32> to vector<8x32xf32>
    %192 = math.tanh %191 : vector<8x32xf32>
    %193 = arith.mulf %189, %156 : vector<8x32xf32>
    %194 = arith.mulf %188, %192 : vector<8x32xf32>
    %195 = arith.addf %193, %194 : vector<8x32xf32>
    %196 = math.tanh %195 : vector<8x32xf32>
    %197 = arith.mulf %190, %196 : vector<8x32xf32>
    %cst_62 = arith.constant dense<0.000000e+00> : vector<8x128xf32>
    %198 = tpu.matmul %197, %14, %cst_62 {dimension_numbers = #tpu.dot_dimension_numbers<[1], [0], [0], [1], [0, 0, 1, 1], [], []>} : vector<8x32xf32>, vector<32x128xf32>, vector<8x128xf32> -> vector<8x128xf32>
    %cst_63 = arith.constant dense<0.000000e+00> : vector<8x128xf32>
    %199 = tpu.matmul %197, %15, %cst_63 {dimension_numbers = #tpu.dot_dimension_numbers<[1], [0], [0], [1], [0, 0, 1, 1], [], []>} : vector<8x32xf32>, vector<32x128xf32>, vector<8x128xf32> -> vector<8x128xf32>
    %200 = arith.addf %199, %178 : vector<8x128xf32>
    %201 = arith.addf %200, %19 : vector<8x128xf32>
    %202 = arith.negf %201 : vector<8x128xf32>
    %203 = math.exp %202 : vector<8x128xf32>
    %cst_64 = arith.constant 1.000000e+00 : f32
    %204 = vector.broadcast %cst_64 : f32 to vector<8x128xf32>
    %205 = arith.addf %204, %203 : vector<8x128xf32>
    %206 = arith.divf %204, %205 : vector<8x128xf32>
    %207 = vector.extract_strided_slice %206 {offsets = [0, 0], sizes = [8, 32], strides = [1, 1]} : vector<8x128xf32> to vector<8x32xf32>
    %208 = vector.extract_strided_slice %206 {offsets = [0, 32], sizes = [8, 32], strides = [1, 1]} : vector<8x128xf32> to vector<8x32xf32>
    %209 = vector.extract_strided_slice %206 {offsets = [0, 96], sizes = [8, 32], strides = [1, 1]} : vector<8x128xf32> to vector<8x32xf32>
    %210 = vector.extract_strided_slice %201 {offsets = [0, 64], sizes = [8, 32], strides = [1, 1]} : vector<8x128xf32> to vector<8x32xf32>
    %211 = math.tanh %210 : vector<8x32xf32>
    %212 = arith.mulf %208, %175 : vector<8x32xf32>
    %213 = arith.mulf %207, %211 : vector<8x32xf32>
    %214 = arith.addf %212, %213 : vector<8x32xf32>
    %215 = math.tanh %214 : vector<8x32xf32>
    %216 = arith.mulf %209, %215 : vector<8x32xf32>
    %cst_65 = arith.constant dense<0.000000e+00> : vector<8x128xf32>
    %217 = tpu.matmul %216, %16, %cst_65 {dimension_numbers = #tpu.dot_dimension_numbers<[1], [0], [0], [1], [0, 0, 1, 1], [], []>} : vector<8x32xf32>, vector<32x128xf32>, vector<8x128xf32> -> vector<8x128xf32>
    %c32 = arith.constant 32 : index
    %c0_66 = arith.constant 0 : index
    %218 = vector.load %arg13[%c32, %c0_66] : memref<192x32xf32, #tpu.memory_space<vmem>>, vector<8x32xf32>
    tpu.vector_store %arg13[%c32, %c0_66], %216 {strides = array<i32>} : memref<192x32xf32, #tpu.memory_space<vmem>>, vector<8x32xf32>,
    %c5 = arith.constant 5 : index
    %c0_67 = arith.constant 0 : index
    %c0_68 = arith.constant 0 : index
    %219 = vector.load %arg12[%c5, %c0_67, %c0_68] : memref<24x8x128xf32, #tpu.memory_space<vmem>>, vector<1x8x128xf32>
    %220 = vector.shape_cast %219 : vector<1x8x128xf32> to vector<8x128xf32>
    %221 = arith.addf %220, %198 : vector<8x128xf32>
    %222 = arith.negf %221 : vector<8x128xf32>
    %223 = math.exp %222 : vector<8x128xf32>
    %cst_69 = arith.constant 1.000000e+00 : f32
    %224 = vector.broadcast %cst_69 : f32 to vector<8x128xf32>
    %225 = arith.addf %224, %223 : vector<8x128xf32>
    %226 = arith.divf %224, %225 : vector<8x128xf32>
    %227 = vector.extract_strided_slice %226 {offsets = [0, 0], sizes = [8, 32], strides = [1, 1]} : vector<8x128xf32> to vector<8x32xf32>
    %228 = vector.extract_strided_slice %226 {offsets = [0, 32], sizes = [8, 32], strides = [1, 1]} : vector<8x128xf32> to vector<8x32xf32>
    %229 = vector.extract_strided_slice %226 {offsets = [0, 96], sizes = [8, 32], strides = [1, 1]} : vector<8x128xf32> to vector<8x32xf32>
    %230 = vector.extract_strided_slice %221 {offsets = [0, 64], sizes = [8, 32], strides = [1, 1]} : vector<8x128xf32> to vector<8x32xf32>
    %231 = math.tanh %230 : vector<8x32xf32>
    %232 = arith.mulf %228, %195 : vector<8x32xf32>
    %233 = arith.mulf %227, %231 : vector<8x32xf32>
    %234 = arith.addf %232, %233 : vector<8x32xf32>
    %235 = math.tanh %234 : vector<8x32xf32>
    %236 = arith.mulf %229, %235 : vector<8x32xf32>
    %cst_70 = arith.constant dense<0.000000e+00> : vector<8x128xf32>
    %237 = tpu.matmul %236, %14, %cst_70 {dimension_numbers = #tpu.dot_dimension_numbers<[1], [0], [0], [1], [0, 0, 1, 1], [], []>} : vector<8x32xf32>, vector<32x128xf32>, vector<8x128xf32> -> vector<8x128xf32>
    %cst_71 = arith.constant dense<0.000000e+00> : vector<8x128xf32>
    %238 = tpu.matmul %236, %15, %cst_71 {dimension_numbers = #tpu.dot_dimension_numbers<[1], [0], [0], [1], [0, 0, 1, 1], [], []>} : vector<8x32xf32>, vector<32x128xf32>, vector<8x128xf32> -> vector<8x128xf32>
    %239 = arith.addf %238, %217 : vector<8x128xf32>
    %240 = arith.addf %239, %19 : vector<8x128xf32>
    %241 = arith.negf %240 : vector<8x128xf32>
    %242 = math.exp %241 : vector<8x128xf32>
    %cst_72 = arith.constant 1.000000e+00 : f32
    %243 = vector.broadcast %cst_72 : f32 to vector<8x128xf32>
    %244 = arith.addf %243, %242 : vector<8x128xf32>
    %245 = arith.divf %243, %244 : vector<8x128xf32>
    %246 = vector.extract_strided_slice %245 {offsets = [0, 0], sizes = [8, 32], strides = [1, 1]} : vector<8x128xf32> to vector<8x32xf32>
    %247 = vector.extract_strided_slice %245 {offsets = [0, 32], sizes = [8, 32], strides = [1, 1]} : vector<8x128xf32> to vector<8x32xf32>
    %248 = vector.extract_strided_slice %245 {offsets = [0, 96], sizes = [8, 32], strides = [1, 1]} : vector<8x128xf32> to vector<8x32xf32>
    %249 = vector.extract_strided_slice %240 {offsets = [0, 64], sizes = [8, 32], strides = [1, 1]} : vector<8x128xf32> to vector<8x32xf32>
    %250 = math.tanh %249 : vector<8x32xf32>
    %251 = arith.mulf %247, %214 : vector<8x32xf32>
    %252 = arith.mulf %246, %250 : vector<8x32xf32>
    %253 = arith.addf %251, %252 : vector<8x32xf32>
    %254 = math.tanh %253 : vector<8x32xf32>
    %255 = arith.mulf %248, %254 : vector<8x32xf32>
    %cst_73 = arith.constant dense<0.000000e+00> : vector<8x128xf32>
    %256 = tpu.matmul %255, %16, %cst_73 {dimension_numbers = #tpu.dot_dimension_numbers<[1], [0], [0], [1], [0, 0, 1, 1], [], []>} : vector<8x32xf32>, vector<32x128xf32>, vector<8x128xf32> -> vector<8x128xf32>
    %c40 = arith.constant 40 : index
    %c0_74 = arith.constant 0 : index
    %257 = vector.load %arg13[%c40, %c0_74] : memref<192x32xf32, #tpu.memory_space<vmem>>, vector<8x32xf32>
    tpu.vector_store %arg13[%c40, %c0_74], %255 {strides = array<i32>} : memref<192x32xf32, #tpu.memory_space<vmem>>, vector<8x32xf32>,
    %c6 = arith.constant 6 : index
    %c0_75 = arith.constant 0 : index
    %c0_76 = arith.constant 0 : index
    %258 = vector.load %arg12[%c6, %c0_75, %c0_76] : memref<24x8x128xf32, #tpu.memory_space<vmem>>, vector<1x8x128xf32>
    %259 = vector.shape_cast %258 : vector<1x8x128xf32> to vector<8x128xf32>
    %260 = arith.addf %259, %237 : vector<8x128xf32>
    %261 = arith.negf %260 : vector<8x128xf32>
    %262 = math.exp %261 : vector<8x128xf32>
    %cst_77 = arith.constant 1.000000e+00 : f32
    %263 = vector.broadcast %cst_77 : f32 to vector<8x128xf32>
    %264 = arith.addf %263, %262 : vector<8x128xf32>
    %265 = arith.divf %263, %264 : vector<8x128xf32>
    %266 = vector.extract_strided_slice %265 {offsets = [0, 0], sizes = [8, 32], strides = [1, 1]} : vector<8x128xf32> to vector<8x32xf32>
    %267 = vector.extract_strided_slice %265 {offsets = [0, 32], sizes = [8, 32], strides = [1, 1]} : vector<8x128xf32> to vector<8x32xf32>
    %268 = vector.extract_strided_slice %265 {offsets = [0, 96], sizes = [8, 32], strides = [1, 1]} : vector<8x128xf32> to vector<8x32xf32>
    %269 = vector.extract_strided_slice %260 {offsets = [0, 64], sizes = [8, 32], strides = [1, 1]} : vector<8x128xf32> to vector<8x32xf32>
    %270 = math.tanh %269 : vector<8x32xf32>
    %271 = arith.mulf %267, %234 : vector<8x32xf32>
    %272 = arith.mulf %266, %270 : vector<8x32xf32>
    %273 = arith.addf %271, %272 : vector<8x32xf32>
    %274 = math.tanh %273 : vector<8x32xf32>
    %275 = arith.mulf %268, %274 : vector<8x32xf32>
    %cst_78 = arith.constant dense<0.000000e+00> : vector<8x128xf32>
    %276 = tpu.matmul %275, %14, %cst_78 {dimension_numbers = #tpu.dot_dimension_numbers<[1], [0], [0], [1], [0, 0, 1, 1], [], []>} : vector<8x32xf32>, vector<32x128xf32>, vector<8x128xf32> -> vector<8x128xf32>
    %cst_79 = arith.constant dense<0.000000e+00> : vector<8x128xf32>
    %277 = tpu.matmul %275, %15, %cst_79 {dimension_numbers = #tpu.dot_dimension_numbers<[1], [0], [0], [1], [0, 0, 1, 1], [], []>} : vector<8x32xf32>, vector<32x128xf32>, vector<8x128xf32> -> vector<8x128xf32>
    %278 = arith.addf %277, %256 : vector<8x128xf32>
    %279 = arith.addf %278, %19 : vector<8x128xf32>
    %280 = arith.negf %279 : vector<8x128xf32>
    %281 = math.exp %280 : vector<8x128xf32>
    %cst_80 = arith.constant 1.000000e+00 : f32
    %282 = vector.broadcast %cst_80 : f32 to vector<8x128xf32>
    %283 = arith.addf %282, %281 : vector<8x128xf32>
    %284 = arith.divf %282, %283 : vector<8x128xf32>
    %285 = vector.extract_strided_slice %284 {offsets = [0, 0], sizes = [8, 32], strides = [1, 1]} : vector<8x128xf32> to vector<8x32xf32>
    %286 = vector.extract_strided_slice %284 {offsets = [0, 32], sizes = [8, 32], strides = [1, 1]} : vector<8x128xf32> to vector<8x32xf32>
    %287 = vector.extract_strided_slice %284 {offsets = [0, 96], sizes = [8, 32], strides = [1, 1]} : vector<8x128xf32> to vector<8x32xf32>
    %288 = vector.extract_strided_slice %279 {offsets = [0, 64], sizes = [8, 32], strides = [1, 1]} : vector<8x128xf32> to vector<8x32xf32>
    %289 = math.tanh %288 : vector<8x32xf32>
    %290 = arith.mulf %286, %253 : vector<8x32xf32>
    %291 = arith.mulf %285, %289 : vector<8x32xf32>
    %292 = arith.addf %290, %291 : vector<8x32xf32>
    %293 = math.tanh %292 : vector<8x32xf32>
    %294 = arith.mulf %287, %293 : vector<8x32xf32>
    %cst_81 = arith.constant dense<0.000000e+00> : vector<8x128xf32>
    %295 = tpu.matmul %294, %16, %cst_81 {dimension_numbers = #tpu.dot_dimension_numbers<[1], [0], [0], [1], [0, 0, 1, 1], [], []>} : vector<8x32xf32>, vector<32x128xf32>, vector<8x128xf32> -> vector<8x128xf32>
    %c48 = arith.constant 48 : index
    %c0_82 = arith.constant 0 : index
    %296 = vector.load %arg13[%c48, %c0_82] : memref<192x32xf32, #tpu.memory_space<vmem>>, vector<8x32xf32>
    tpu.vector_store %arg13[%c48, %c0_82], %294 {strides = array<i32>} : memref<192x32xf32, #tpu.memory_space<vmem>>, vector<8x32xf32>,
    %c7 = arith.constant 7 : index
    %c0_83 = arith.constant 0 : index
    %c0_84 = arith.constant 0 : index
    %297 = vector.load %arg12[%c7, %c0_83, %c0_84] : memref<24x8x128xf32, #tpu.memory_space<vmem>>, vector<1x8x128xf32>
    %298 = vector.shape_cast %297 : vector<1x8x128xf32> to vector<8x128xf32>
    %299 = arith.addf %298, %276 : vector<8x128xf32>
    %300 = arith.negf %299 : vector<8x128xf32>
    %301 = math.exp %300 : vector<8x128xf32>
    %cst_85 = arith.constant 1.000000e+00 : f32
    %302 = vector.broadcast %cst_85 : f32 to vector<8x128xf32>
    %303 = arith.addf %302, %301 : vector<8x128xf32>
    %304 = arith.divf %302, %303 : vector<8x128xf32>
    %305 = vector.extract_strided_slice %304 {offsets = [0, 0], sizes = [8, 32], strides = [1, 1]} : vector<8x128xf32> to vector<8x32xf32>
    %306 = vector.extract_strided_slice %304 {offsets = [0, 32], sizes = [8, 32], strides = [1, 1]} : vector<8x128xf32> to vector<8x32xf32>
    %307 = vector.extract_strided_slice %304 {offsets = [0, 96], sizes = [8, 32], strides = [1, 1]} : vector<8x128xf32> to vector<8x32xf32>
    %308 = vector.extract_strided_slice %299 {offsets = [0, 64], sizes = [8, 32], strides = [1, 1]} : vector<8x128xf32> to vector<8x32xf32>
    %309 = math.tanh %308 : vector<8x32xf32>
    %310 = arith.mulf %306, %273 : vector<8x32xf32>
    %311 = arith.mulf %305, %309 : vector<8x32xf32>
    %312 = arith.addf %310, %311 : vector<8x32xf32>
    %313 = math.tanh %312 : vector<8x32xf32>
    %314 = arith.mulf %307, %313 : vector<8x32xf32>
    %cst_86 = arith.constant dense<0.000000e+00> : vector<8x128xf32>
    %315 = tpu.matmul %314, %14, %cst_86 {dimension_numbers = #tpu.dot_dimension_numbers<[1], [0], [0], [1], [0, 0, 1, 1], [], []>} : vector<8x32xf32>, vector<32x128xf32>, vector<8x128xf32> -> vector<8x128xf32>
    %cst_87 = arith.constant dense<0.000000e+00> : vector<8x128xf32>
    %316 = tpu.matmul %314, %15, %cst_87 {dimension_numbers = #tpu.dot_dimension_numbers<[1], [0], [0], [1], [0, 0, 1, 1], [], []>} : vector<8x32xf32>, vector<32x128xf32>, vector<8x128xf32> -> vector<8x128xf32>
    %317 = arith.addf %316, %295 : vector<8x128xf32>
    %318 = arith.addf %317, %19 : vector<8x128xf32>
    %319 = arith.negf %318 : vector<8x128xf32>
    %320 = math.exp %319 : vector<8x128xf32>
    %cst_88 = arith.constant 1.000000e+00 : f32
    %321 = vector.broadcast %cst_88 : f32 to vector<8x128xf32>
    %322 = arith.addf %321, %320 : vector<8x128xf32>
    %323 = arith.divf %321, %322 : vector<8x128xf32>
    %324 = vector.extract_strided_slice %323 {offsets = [0, 0], sizes = [8, 32], strides = [1, 1]} : vector<8x128xf32> to vector<8x32xf32>
    %325 = vector.extract_strided_slice %323 {offsets = [0, 32], sizes = [8, 32], strides = [1, 1]} : vector<8x128xf32> to vector<8x32xf32>
    %326 = vector.extract_strided_slice %323 {offsets = [0, 96], sizes = [8, 32], strides = [1, 1]} : vector<8x128xf32> to vector<8x32xf32>
    %327 = vector.extract_strided_slice %318 {offsets = [0, 64], sizes = [8, 32], strides = [1, 1]} : vector<8x128xf32> to vector<8x32xf32>
    %328 = math.tanh %327 : vector<8x32xf32>
    %329 = arith.mulf %325, %292 : vector<8x32xf32>
    %330 = arith.mulf %324, %328 : vector<8x32xf32>
    %331 = arith.addf %329, %330 : vector<8x32xf32>
    %332 = math.tanh %331 : vector<8x32xf32>
    %333 = arith.mulf %326, %332 : vector<8x32xf32>
    %cst_89 = arith.constant dense<0.000000e+00> : vector<8x128xf32>
    %334 = tpu.matmul %333, %16, %cst_89 {dimension_numbers = #tpu.dot_dimension_numbers<[1], [0], [0], [1], [0, 0, 1, 1], [], []>} : vector<8x32xf32>, vector<32x128xf32>, vector<8x128xf32> -> vector<8x128xf32>
    %c56 = arith.constant 56 : index
    %c0_90 = arith.constant 0 : index
    %335 = vector.load %arg13[%c56, %c0_90] : memref<192x32xf32, #tpu.memory_space<vmem>>, vector<8x32xf32>
    tpu.vector_store %arg13[%c56, %c0_90], %333 {strides = array<i32>} : memref<192x32xf32, #tpu.memory_space<vmem>>, vector<8x32xf32>,
    %c8_91 = arith.constant 8 : index
    %c0_92 = arith.constant 0 : index
    %c0_93 = arith.constant 0 : index
    %336 = vector.load %arg12[%c8_91, %c0_92, %c0_93] : memref<24x8x128xf32, #tpu.memory_space<vmem>>, vector<1x8x128xf32>
    %337 = vector.shape_cast %336 : vector<1x8x128xf32> to vector<8x128xf32>
    %338 = arith.addf %337, %315 : vector<8x128xf32>
    %339 = arith.negf %338 : vector<8x128xf32>
    %340 = math.exp %339 : vector<8x128xf32>
    %cst_94 = arith.constant 1.000000e+00 : f32
    %341 = vector.broadcast %cst_94 : f32 to vector<8x128xf32>
    %342 = arith.addf %341, %340 : vector<8x128xf32>
    %343 = arith.divf %341, %342 : vector<8x128xf32>
    %344 = vector.extract_strided_slice %343 {offsets = [0, 0], sizes = [8, 32], strides = [1, 1]} : vector<8x128xf32> to vector<8x32xf32>
    %345 = vector.extract_strided_slice %343 {offsets = [0, 32], sizes = [8, 32], strides = [1, 1]} : vector<8x128xf32> to vector<8x32xf32>
    %346 = vector.extract_strided_slice %343 {offsets = [0, 96], sizes = [8, 32], strides = [1, 1]} : vector<8x128xf32> to vector<8x32xf32>
    %347 = vector.extract_strided_slice %338 {offsets = [0, 64], sizes = [8, 32], strides = [1, 1]} : vector<8x128xf32> to vector<8x32xf32>
    %348 = math.tanh %347 : vector<8x32xf32>
    %349 = arith.mulf %345, %312 : vector<8x32xf32>
    %350 = arith.mulf %344, %348 : vector<8x32xf32>
    %351 = arith.addf %349, %350 : vector<8x32xf32>
    %352 = math.tanh %351 : vector<8x32xf32>
    %353 = arith.mulf %346, %352 : vector<8x32xf32>
    %cst_95 = arith.constant dense<0.000000e+00> : vector<8x128xf32>
    %354 = tpu.matmul %353, %14, %cst_95 {dimension_numbers = #tpu.dot_dimension_numbers<[1], [0], [0], [1], [0, 0, 1, 1], [], []>} : vector<8x32xf32>, vector<32x128xf32>, vector<8x128xf32> -> vector<8x128xf32>
    %cst_96 = arith.constant dense<0.000000e+00> : vector<8x128xf32>
    %355 = tpu.matmul %353, %15, %cst_96 {dimension_numbers = #tpu.dot_dimension_numbers<[1], [0], [0], [1], [0, 0, 1, 1], [], []>} : vector<8x32xf32>, vector<32x128xf32>, vector<8x128xf32> -> vector<8x128xf32>
    %356 = arith.addf %355, %334 : vector<8x128xf32>
    %357 = arith.addf %356, %19 : vector<8x128xf32>
    %358 = arith.negf %357 : vector<8x128xf32>
    %359 = math.exp %358 : vector<8x128xf32>
    %cst_97 = arith.constant 1.000000e+00 : f32
    %360 = vector.broadcast %cst_97 : f32 to vector<8x128xf32>
    %361 = arith.addf %360, %359 : vector<8x128xf32>
    %362 = arith.divf %360, %361 : vector<8x128xf32>
    %363 = vector.extract_strided_slice %362 {offsets = [0, 0], sizes = [8, 32], strides = [1, 1]} : vector<8x128xf32> to vector<8x32xf32>
    %364 = vector.extract_strided_slice %362 {offsets = [0, 32], sizes = [8, 32], strides = [1, 1]} : vector<8x128xf32> to vector<8x32xf32>
    %365 = vector.extract_strided_slice %362 {offsets = [0, 96], sizes = [8, 32], strides = [1, 1]} : vector<8x128xf32> to vector<8x32xf32>
    %366 = vector.extract_strided_slice %357 {offsets = [0, 64], sizes = [8, 32], strides = [1, 1]} : vector<8x128xf32> to vector<8x32xf32>
    %367 = math.tanh %366 : vector<8x32xf32>
    %368 = arith.mulf %364, %331 : vector<8x32xf32>
    %369 = arith.mulf %363, %367 : vector<8x32xf32>
    %370 = arith.addf %368, %369 : vector<8x32xf32>
    %371 = math.tanh %370 : vector<8x32xf32>
    %372 = arith.mulf %365, %371 : vector<8x32xf32>
    %cst_98 = arith.constant dense<0.000000e+00> : vector<8x128xf32>
    %373 = tpu.matmul %372, %16, %cst_98 {dimension_numbers = #tpu.dot_dimension_numbers<[1], [0], [0], [1], [0, 0, 1, 1], [], []>} : vector<8x32xf32>, vector<32x128xf32>, vector<8x128xf32> -> vector<8x128xf32>
    %c64 = arith.constant 64 : index
    %c0_99 = arith.constant 0 : index
    %374 = vector.load %arg13[%c64, %c0_99] : memref<192x32xf32, #tpu.memory_space<vmem>>, vector<8x32xf32>
    tpu.vector_store %arg13[%c64, %c0_99], %372 {strides = array<i32>} : memref<192x32xf32, #tpu.memory_space<vmem>>, vector<8x32xf32>,
    %c9 = arith.constant 9 : index
    %c0_100 = arith.constant 0 : index
    %c0_101 = arith.constant 0 : index
    %375 = vector.load %arg12[%c9, %c0_100, %c0_101] : memref<24x8x128xf32, #tpu.memory_space<vmem>>, vector<1x8x128xf32>
    %376 = vector.shape_cast %375 : vector<1x8x128xf32> to vector<8x128xf32>
    %377 = arith.addf %376, %354 : vector<8x128xf32>
    %378 = arith.negf %377 : vector<8x128xf32>
    %379 = math.exp %378 : vector<8x128xf32>
    %cst_102 = arith.constant 1.000000e+00 : f32
    %380 = vector.broadcast %cst_102 : f32 to vector<8x128xf32>
    %381 = arith.addf %380, %379 : vector<8x128xf32>
    %382 = arith.divf %380, %381 : vector<8x128xf32>
    %383 = vector.extract_strided_slice %382 {offsets = [0, 0], sizes = [8, 32], strides = [1, 1]} : vector<8x128xf32> to vector<8x32xf32>
    %384 = vector.extract_strided_slice %382 {offsets = [0, 32], sizes = [8, 32], strides = [1, 1]} : vector<8x128xf32> to vector<8x32xf32>
    %385 = vector.extract_strided_slice %382 {offsets = [0, 96], sizes = [8, 32], strides = [1, 1]} : vector<8x128xf32> to vector<8x32xf32>
    %386 = vector.extract_strided_slice %377 {offsets = [0, 64], sizes = [8, 32], strides = [1, 1]} : vector<8x128xf32> to vector<8x32xf32>
    %387 = math.tanh %386 : vector<8x32xf32>
    %388 = arith.mulf %384, %351 : vector<8x32xf32>
    %389 = arith.mulf %383, %387 : vector<8x32xf32>
    %390 = arith.addf %388, %389 : vector<8x32xf32>
    %391 = math.tanh %390 : vector<8x32xf32>
    %392 = arith.mulf %385, %391 : vector<8x32xf32>
    %cst_103 = arith.constant dense<0.000000e+00> : vector<8x128xf32>
    %393 = tpu.matmul %392, %14, %cst_103 {dimension_numbers = #tpu.dot_dimension_numbers<[1], [0], [0], [1], [0, 0, 1, 1], [], []>} : vector<8x32xf32>, vector<32x128xf32>, vector<8x128xf32> -> vector<8x128xf32>
    %cst_104 = arith.constant dense<0.000000e+00> : vector<8x128xf32>
    %394 = tpu.matmul %392, %15, %cst_104 {dimension_numbers = #tpu.dot_dimension_numbers<[1], [0], [0], [1], [0, 0, 1, 1], [], []>} : vector<8x32xf32>, vector<32x128xf32>, vector<8x128xf32> -> vector<8x128xf32>
    %395 = arith.addf %394, %373 : vector<8x128xf32>
    %396 = arith.addf %395, %19 : vector<8x128xf32>
    %397 = arith.negf %396 : vector<8x128xf32>
    %398 = math.exp %397 : vector<8x128xf32>
    %cst_105 = arith.constant 1.000000e+00 : f32
    %399 = vector.broadcast %cst_105 : f32 to vector<8x128xf32>
    %400 = arith.addf %399, %398 : vector<8x128xf32>
    %401 = arith.divf %399, %400 : vector<8x128xf32>
    %402 = vector.extract_strided_slice %401 {offsets = [0, 0], sizes = [8, 32], strides = [1, 1]} : vector<8x128xf32> to vector<8x32xf32>
    %403 = vector.extract_strided_slice %401 {offsets = [0, 32], sizes = [8, 32], strides = [1, 1]} : vector<8x128xf32> to vector<8x32xf32>
    %404 = vector.extract_strided_slice %401 {offsets = [0, 96], sizes = [8, 32], strides = [1, 1]} : vector<8x128xf32> to vector<8x32xf32>
    %405 = vector.extract_strided_slice %396 {offsets = [0, 64], sizes = [8, 32], strides = [1, 1]} : vector<8x128xf32> to vector<8x32xf32>
    %406 = math.tanh %405 : vector<8x32xf32>
    %407 = arith.mulf %403, %370 : vector<8x32xf32>
    %408 = arith.mulf %402, %406 : vector<8x32xf32>
    %409 = arith.addf %407, %408 : vector<8x32xf32>
    %410 = math.tanh %409 : vector<8x32xf32>
    %411 = arith.mulf %404, %410 : vector<8x32xf32>
    %cst_106 = arith.constant dense<0.000000e+00> : vector<8x128xf32>
    %412 = tpu.matmul %411, %16, %cst_106 {dimension_numbers = #tpu.dot_dimension_numbers<[1], [0], [0], [1], [0, 0, 1, 1], [], []>} : vector<8x32xf32>, vector<32x128xf32>, vector<8x128xf32> -> vector<8x128xf32>
    %c72 = arith.constant 72 : index
    %c0_107 = arith.constant 0 : index
    %413 = vector.load %arg13[%c72, %c0_107] : memref<192x32xf32, #tpu.memory_space<vmem>>, vector<8x32xf32>
    tpu.vector_store %arg13[%c72, %c0_107], %411 {strides = array<i32>} : memref<192x32xf32, #tpu.memory_space<vmem>>, vector<8x32xf32>,
    %c10 = arith.constant 10 : index
    %c0_108 = arith.constant 0 : index
    %c0_109 = arith.constant 0 : index
    %414 = vector.load %arg12[%c10, %c0_108, %c0_109] : memref<24x8x128xf32, #tpu.memory_space<vmem>>, vector<1x8x128xf32>
    %415 = vector.shape_cast %414 : vector<1x8x128xf32> to vector<8x128xf32>
    %416 = arith.addf %415, %393 : vector<8x128xf32>
    %417 = arith.negf %416 : vector<8x128xf32>
    %418 = math.exp %417 : vector<8x128xf32>
    %cst_110 = arith.constant 1.000000e+00 : f32
    %419 = vector.broadcast %cst_110 : f32 to vector<8x128xf32>
    %420 = arith.addf %419, %418 : vector<8x128xf32>
    %421 = arith.divf %419, %420 : vector<8x128xf32>
    %422 = vector.extract_strided_slice %421 {offsets = [0, 0], sizes = [8, 32], strides = [1, 1]} : vector<8x128xf32> to vector<8x32xf32>
    %423 = vector.extract_strided_slice %421 {offsets = [0, 32], sizes = [8, 32], strides = [1, 1]} : vector<8x128xf32> to vector<8x32xf32>
    %424 = vector.extract_strided_slice %421 {offsets = [0, 96], sizes = [8, 32], strides = [1, 1]} : vector<8x128xf32> to vector<8x32xf32>
    %425 = vector.extract_strided_slice %416 {offsets = [0, 64], sizes = [8, 32], strides = [1, 1]} : vector<8x128xf32> to vector<8x32xf32>
    %426 = math.tanh %425 : vector<8x32xf32>
    %427 = arith.mulf %423, %390 : vector<8x32xf32>
    %428 = arith.mulf %422, %426 : vector<8x32xf32>
    %429 = arith.addf %427, %428 : vector<8x32xf32>
    %430 = math.tanh %429 : vector<8x32xf32>
    %431 = arith.mulf %424, %430 : vector<8x32xf32>
    %cst_111 = arith.constant dense<0.000000e+00> : vector<8x128xf32>
    %432 = tpu.matmul %431, %14, %cst_111 {dimension_numbers = #tpu.dot_dimension_numbers<[1], [0], [0], [1], [0, 0, 1, 1], [], []>} : vector<8x32xf32>, vector<32x128xf32>, vector<8x128xf32> -> vector<8x128xf32>
    %cst_112 = arith.constant dense<0.000000e+00> : vector<8x128xf32>
    %433 = tpu.matmul %431, %15, %cst_112 {dimension_numbers = #tpu.dot_dimension_numbers<[1], [0], [0], [1], [0, 0, 1, 1], [], []>} : vector<8x32xf32>, vector<32x128xf32>, vector<8x128xf32> -> vector<8x128xf32>
    %434 = arith.addf %433, %412 : vector<8x128xf32>
    %435 = arith.addf %434, %19 : vector<8x128xf32>
    %436 = arith.negf %435 : vector<8x128xf32>
    %437 = math.exp %436 : vector<8x128xf32>
    %cst_113 = arith.constant 1.000000e+00 : f32
    %438 = vector.broadcast %cst_113 : f32 to vector<8x128xf32>
    %439 = arith.addf %438, %437 : vector<8x128xf32>
    %440 = arith.divf %438, %439 : vector<8x128xf32>
    %441 = vector.extract_strided_slice %440 {offsets = [0, 0], sizes = [8, 32], strides = [1, 1]} : vector<8x128xf32> to vector<8x32xf32>
    %442 = vector.extract_strided_slice %440 {offsets = [0, 32], sizes = [8, 32], strides = [1, 1]} : vector<8x128xf32> to vector<8x32xf32>
    %443 = vector.extract_strided_slice %440 {offsets = [0, 96], sizes = [8, 32], strides = [1, 1]} : vector<8x128xf32> to vector<8x32xf32>
    %444 = vector.extract_strided_slice %435 {offsets = [0, 64], sizes = [8, 32], strides = [1, 1]} : vector<8x128xf32> to vector<8x32xf32>
    %445 = math.tanh %444 : vector<8x32xf32>
    %446 = arith.mulf %442, %409 : vector<8x32xf32>
    %447 = arith.mulf %441, %445 : vector<8x32xf32>
    %448 = arith.addf %446, %447 : vector<8x32xf32>
    %449 = math.tanh %448 : vector<8x32xf32>
    %450 = arith.mulf %443, %449 : vector<8x32xf32>
    %cst_114 = arith.constant dense<0.000000e+00> : vector<8x128xf32>
    %451 = tpu.matmul %450, %16, %cst_114 {dimension_numbers = #tpu.dot_dimension_numbers<[1], [0], [0], [1], [0, 0, 1, 1], [], []>} : vector<8x32xf32>, vector<32x128xf32>, vector<8x128xf32> -> vector<8x128xf32>
    %c80 = arith.constant 80 : index
    %c0_115 = arith.constant 0 : index
    %452 = vector.load %arg13[%c80, %c0_115] : memref<192x32xf32, #tpu.memory_space<vmem>>, vector<8x32xf32>
    tpu.vector_store %arg13[%c80, %c0_115], %450 {strides = array<i32>} : memref<192x32xf32, #tpu.memory_space<vmem>>, vector<8x32xf32>,
    %c11 = arith.constant 11 : index
    %c0_116 = arith.constant 0 : index
    %c0_117 = arith.constant 0 : index
    %453 = vector.load %arg12[%c11, %c0_116, %c0_117] : memref<24x8x128xf32, #tpu.memory_space<vmem>>, vector<1x8x128xf32>
    %454 = vector.shape_cast %453 : vector<1x8x128xf32> to vector<8x128xf32>
    %455 = arith.addf %454, %432 : vector<8x128xf32>
    %456 = arith.negf %455 : vector<8x128xf32>
    %457 = math.exp %456 : vector<8x128xf32>
    %cst_118 = arith.constant 1.000000e+00 : f32
    %458 = vector.broadcast %cst_118 : f32 to vector<8x128xf32>
    %459 = arith.addf %458, %457 : vector<8x128xf32>
    %460 = arith.divf %458, %459 : vector<8x128xf32>
    %461 = vector.extract_strided_slice %460 {offsets = [0, 0], sizes = [8, 32], strides = [1, 1]} : vector<8x128xf32> to vector<8x32xf32>
    %462 = vector.extract_strided_slice %460 {offsets = [0, 32], sizes = [8, 32], strides = [1, 1]} : vector<8x128xf32> to vector<8x32xf32>
    %463 = vector.extract_strided_slice %460 {offsets = [0, 96], sizes = [8, 32], strides = [1, 1]} : vector<8x128xf32> to vector<8x32xf32>
    %464 = vector.extract_strided_slice %455 {offsets = [0, 64], sizes = [8, 32], strides = [1, 1]} : vector<8x128xf32> to vector<8x32xf32>
    %465 = math.tanh %464 : vector<8x32xf32>
    %466 = arith.mulf %462, %429 : vector<8x32xf32>
    %467 = arith.mulf %461, %465 : vector<8x32xf32>
    %468 = arith.addf %466, %467 : vector<8x32xf32>
    %469 = math.tanh %468 : vector<8x32xf32>
    %470 = arith.mulf %463, %469 : vector<8x32xf32>
    %cst_119 = arith.constant dense<0.000000e+00> : vector<8x128xf32>
    %471 = tpu.matmul %470, %14, %cst_119 {dimension_numbers = #tpu.dot_dimension_numbers<[1], [0], [0], [1], [0, 0, 1, 1], [], []>} : vector<8x32xf32>, vector<32x128xf32>, vector<8x128xf32> -> vector<8x128xf32>
    %cst_120 = arith.constant dense<0.000000e+00> : vector<8x128xf32>
    %472 = tpu.matmul %470, %15, %cst_120 {dimension_numbers = #tpu.dot_dimension_numbers<[1], [0], [0], [1], [0, 0, 1, 1], [], []>} : vector<8x32xf32>, vector<32x128xf32>, vector<8x128xf32> -> vector<8x128xf32>
    %473 = arith.addf %472, %451 : vector<8x128xf32>
    %474 = arith.addf %473, %19 : vector<8x128xf32>
    %475 = arith.negf %474 : vector<8x128xf32>
    %476 = math.exp %475 : vector<8x128xf32>
    %cst_121 = arith.constant 1.000000e+00 : f32
    %477 = vector.broadcast %cst_121 : f32 to vector<8x128xf32>
    %478 = arith.addf %477, %476 : vector<8x128xf32>
    %479 = arith.divf %477, %478 : vector<8x128xf32>
    %480 = vector.extract_strided_slice %479 {offsets = [0, 0], sizes = [8, 32], strides = [1, 1]} : vector<8x128xf32> to vector<8x32xf32>
    %481 = vector.extract_strided_slice %479 {offsets = [0, 32], sizes = [8, 32], strides = [1, 1]} : vector<8x128xf32> to vector<8x32xf32>
    %482 = vector.extract_strided_slice %479 {offsets = [0, 96], sizes = [8, 32], strides = [1, 1]} : vector<8x128xf32> to vector<8x32xf32>
    %483 = vector.extract_strided_slice %474 {offsets = [0, 64], sizes = [8, 32], strides = [1, 1]} : vector<8x128xf32> to vector<8x32xf32>
    %484 = math.tanh %483 : vector<8x32xf32>
    %485 = arith.mulf %481, %448 : vector<8x32xf32>
    %486 = arith.mulf %480, %484 : vector<8x32xf32>
    %487 = arith.addf %485, %486 : vector<8x32xf32>
    %488 = math.tanh %487 : vector<8x32xf32>
    %489 = arith.mulf %482, %488 : vector<8x32xf32>
    %cst_122 = arith.constant dense<0.000000e+00> : vector<8x128xf32>
    %490 = tpu.matmul %489, %16, %cst_122 {dimension_numbers = #tpu.dot_dimension_numbers<[1], [0], [0], [1], [0, 0, 1, 1], [], []>} : vector<8x32xf32>, vector<32x128xf32>, vector<8x128xf32> -> vector<8x128xf32>
    %c88 = arith.constant 88 : index
    %c0_123 = arith.constant 0 : index
    %491 = vector.load %arg13[%c88, %c0_123] : memref<192x32xf32, #tpu.memory_space<vmem>>, vector<8x32xf32>
    tpu.vector_store %arg13[%c88, %c0_123], %489 {strides = array<i32>} : memref<192x32xf32, #tpu.memory_space<vmem>>, vector<8x32xf32>,
    %c12 = arith.constant 12 : index
    %c0_124 = arith.constant 0 : index
    %c0_125 = arith.constant 0 : index
    %492 = vector.load %arg12[%c12, %c0_124, %c0_125] : memref<24x8x128xf32, #tpu.memory_space<vmem>>, vector<1x8x128xf32>
    %493 = vector.shape_cast %492 : vector<1x8x128xf32> to vector<8x128xf32>
    %494 = arith.addf %493, %471 : vector<8x128xf32>
    %495 = arith.negf %494 : vector<8x128xf32>
    %496 = math.exp %495 : vector<8x128xf32>
    %cst_126 = arith.constant 1.000000e+00 : f32
    %497 = vector.broadcast %cst_126 : f32 to vector<8x128xf32>
    %498 = arith.addf %497, %496 : vector<8x128xf32>
    %499 = arith.divf %497, %498 : vector<8x128xf32>
    %500 = vector.extract_strided_slice %499 {offsets = [0, 0], sizes = [8, 32], strides = [1, 1]} : vector<8x128xf32> to vector<8x32xf32>
    %501 = vector.extract_strided_slice %499 {offsets = [0, 32], sizes = [8, 32], strides = [1, 1]} : vector<8x128xf32> to vector<8x32xf32>
    %502 = vector.extract_strided_slice %499 {offsets = [0, 96], sizes = [8, 32], strides = [1, 1]} : vector<8x128xf32> to vector<8x32xf32>
    %503 = vector.extract_strided_slice %494 {offsets = [0, 64], sizes = [8, 32], strides = [1, 1]} : vector<8x128xf32> to vector<8x32xf32>
    %504 = math.tanh %503 : vector<8x32xf32>
    %505 = arith.mulf %501, %468 : vector<8x32xf32>
    %506 = arith.mulf %500, %504 : vector<8x32xf32>
    %507 = arith.addf %505, %506 : vector<8x32xf32>
    %508 = math.tanh %507 : vector<8x32xf32>
    %509 = arith.mulf %502, %508 : vector<8x32xf32>
    %cst_127 = arith.constant dense<0.000000e+00> : vector<8x128xf32>
    %510 = tpu.matmul %509, %14, %cst_127 {dimension_numbers = #tpu.dot_dimension_numbers<[1], [0], [0], [1], [0, 0, 1, 1], [], []>} : vector<8x32xf32>, vector<32x128xf32>, vector<8x128xf32> -> vector<8x128xf32>
    %cst_128 = arith.constant dense<0.000000e+00> : vector<8x128xf32>
    %511 = tpu.matmul %509, %15, %cst_128 {dimension_numbers = #tpu.dot_dimension_numbers<[1], [0], [0], [1], [0, 0, 1, 1], [], []>} : vector<8x32xf32>, vector<32x128xf32>, vector<8x128xf32> -> vector<8x128xf32>
    %512 = arith.addf %511, %490 : vector<8x128xf32>
    %513 = arith.addf %512, %19 : vector<8x128xf32>
    %514 = arith.negf %513 : vector<8x128xf32>
    %515 = math.exp %514 : vector<8x128xf32>
    %cst_129 = arith.constant 1.000000e+00 : f32
    %516 = vector.broadcast %cst_129 : f32 to vector<8x128xf32>
    %517 = arith.addf %516, %515 : vector<8x128xf32>
    %518 = arith.divf %516, %517 : vector<8x128xf32>
    %519 = vector.extract_strided_slice %518 {offsets = [0, 0], sizes = [8, 32], strides = [1, 1]} : vector<8x128xf32> to vector<8x32xf32>
    %520 = vector.extract_strided_slice %518 {offsets = [0, 32], sizes = [8, 32], strides = [1, 1]} : vector<8x128xf32> to vector<8x32xf32>
    %521 = vector.extract_strided_slice %518 {offsets = [0, 96], sizes = [8, 32], strides = [1, 1]} : vector<8x128xf32> to vector<8x32xf32>
    %522 = vector.extract_strided_slice %513 {offsets = [0, 64], sizes = [8, 32], strides = [1, 1]} : vector<8x128xf32> to vector<8x32xf32>
    %523 = math.tanh %522 : vector<8x32xf32>
    %524 = arith.mulf %520, %487 : vector<8x32xf32>
    %525 = arith.mulf %519, %523 : vector<8x32xf32>
    %526 = arith.addf %524, %525 : vector<8x32xf32>
    %527 = math.tanh %526 : vector<8x32xf32>
    %528 = arith.mulf %521, %527 : vector<8x32xf32>
    %cst_130 = arith.constant dense<0.000000e+00> : vector<8x128xf32>
    %529 = tpu.matmul %528, %16, %cst_130 {dimension_numbers = #tpu.dot_dimension_numbers<[1], [0], [0], [1], [0, 0, 1, 1], [], []>} : vector<8x32xf32>, vector<32x128xf32>, vector<8x128xf32> -> vector<8x128xf32>
    %c96 = arith.constant 96 : index
    %c0_131 = arith.constant 0 : index
    %530 = vector.load %arg13[%c96, %c0_131] : memref<192x32xf32, #tpu.memory_space<vmem>>, vector<8x32xf32>
    tpu.vector_store %arg13[%c96, %c0_131], %528 {strides = array<i32>} : memref<192x32xf32, #tpu.memory_space<vmem>>, vector<8x32xf32>,
    %c13 = arith.constant 13 : index
    %c0_132 = arith.constant 0 : index
    %c0_133 = arith.constant 0 : index
    %531 = vector.load %arg12[%c13, %c0_132, %c0_133] : memref<24x8x128xf32, #tpu.memory_space<vmem>>, vector<1x8x128xf32>
    %532 = vector.shape_cast %531 : vector<1x8x128xf32> to vector<8x128xf32>
    %533 = arith.addf %532, %510 : vector<8x128xf32>
    %534 = arith.negf %533 : vector<8x128xf32>
    %535 = math.exp %534 : vector<8x128xf32>
    %cst_134 = arith.constant 1.000000e+00 : f32
    %536 = vector.broadcast %cst_134 : f32 to vector<8x128xf32>
    %537 = arith.addf %536, %535 : vector<8x128xf32>
    %538 = arith.divf %536, %537 : vector<8x128xf32>
    %539 = vector.extract_strided_slice %538 {offsets = [0, 0], sizes = [8, 32], strides = [1, 1]} : vector<8x128xf32> to vector<8x32xf32>
    %540 = vector.extract_strided_slice %538 {offsets = [0, 32], sizes = [8, 32], strides = [1, 1]} : vector<8x128xf32> to vector<8x32xf32>
    %541 = vector.extract_strided_slice %538 {offsets = [0, 96], sizes = [8, 32], strides = [1, 1]} : vector<8x128xf32> to vector<8x32xf32>
    %542 = vector.extract_strided_slice %533 {offsets = [0, 64], sizes = [8, 32], strides = [1, 1]} : vector<8x128xf32> to vector<8x32xf32>
    %543 = math.tanh %542 : vector<8x32xf32>
    %544 = arith.mulf %540, %507 : vector<8x32xf32>
    %545 = arith.mulf %539, %543 : vector<8x32xf32>
    %546 = arith.addf %544, %545 : vector<8x32xf32>
    %547 = math.tanh %546 : vector<8x32xf32>
    %548 = arith.mulf %541, %547 : vector<8x32xf32>
    %cst_135 = arith.constant dense<0.000000e+00> : vector<8x128xf32>
    %549 = tpu.matmul %548, %14, %cst_135 {dimension_numbers = #tpu.dot_dimension_numbers<[1], [0], [0], [1], [0, 0, 1, 1], [], []>} : vector<8x32xf32>, vector<32x128xf32>, vector<8x128xf32> -> vector<8x128xf32>
    %cst_136 = arith.constant dense<0.000000e+00> : vector<8x128xf32>
    %550 = tpu.matmul %548, %15, %cst_136 {dimension_numbers = #tpu.dot_dimension_numbers<[1], [0], [0], [1], [0, 0, 1, 1], [], []>} : vector<8x32xf32>, vector<32x128xf32>, vector<8x128xf32> -> vector<8x128xf32>
    %551 = arith.addf %550, %529 : vector<8x128xf32>
    %552 = arith.addf %551, %19 : vector<8x128xf32>
    %553 = arith.negf %552 : vector<8x128xf32>
    %554 = math.exp %553 : vector<8x128xf32>
    %cst_137 = arith.constant 1.000000e+00 : f32
    %555 = vector.broadcast %cst_137 : f32 to vector<8x128xf32>
    %556 = arith.addf %555, %554 : vector<8x128xf32>
    %557 = arith.divf %555, %556 : vector<8x128xf32>
    %558 = vector.extract_strided_slice %557 {offsets = [0, 0], sizes = [8, 32], strides = [1, 1]} : vector<8x128xf32> to vector<8x32xf32>
    %559 = vector.extract_strided_slice %557 {offsets = [0, 32], sizes = [8, 32], strides = [1, 1]} : vector<8x128xf32> to vector<8x32xf32>
    %560 = vector.extract_strided_slice %557 {offsets = [0, 96], sizes = [8, 32], strides = [1, 1]} : vector<8x128xf32> to vector<8x32xf32>
    %561 = vector.extract_strided_slice %552 {offsets = [0, 64], sizes = [8, 32], strides = [1, 1]} : vector<8x128xf32> to vector<8x32xf32>
    %562 = math.tanh %561 : vector<8x32xf32>
    %563 = arith.mulf %559, %526 : vector<8x32xf32>
    %564 = arith.mulf %558, %562 : vector<8x32xf32>
    %565 = arith.addf %563, %564 : vector<8x32xf32>
    %566 = math.tanh %565 : vector<8x32xf32>
    %567 = arith.mulf %560, %566 : vector<8x32xf32>
    %cst_138 = arith.constant dense<0.000000e+00> : vector<8x128xf32>
    %568 = tpu.matmul %567, %16, %cst_138 {dimension_numbers = #tpu.dot_dimension_numbers<[1], [0], [0], [1], [0, 0, 1, 1], [], []>} : vector<8x32xf32>, vector<32x128xf32>, vector<8x128xf32> -> vector<8x128xf32>
    %c104 = arith.constant 104 : index
    %c0_139 = arith.constant 0 : index
    %569 = vector.load %arg13[%c104, %c0_139] : memref<192x32xf32, #tpu.memory_space<vmem>>, vector<8x32xf32>
    tpu.vector_store %arg13[%c104, %c0_139], %567 {strides = array<i32>} : memref<192x32xf32, #tpu.memory_space<vmem>>, vector<8x32xf32>,
    %c14 = arith.constant 14 : index
    %c0_140 = arith.constant 0 : index
    %c0_141 = arith.constant 0 : index
    %570 = vector.load %arg12[%c14, %c0_140, %c0_141] : memref<24x8x128xf32, #tpu.memory_space<vmem>>, vector<1x8x128xf32>
    %571 = vector.shape_cast %570 : vector<1x8x128xf32> to vector<8x128xf32>
    %572 = arith.addf %571, %549 : vector<8x128xf32>
    %573 = arith.negf %572 : vector<8x128xf32>
    %574 = math.exp %573 : vector<8x128xf32>
    %cst_142 = arith.constant 1.000000e+00 : f32
    %575 = vector.broadcast %cst_142 : f32 to vector<8x128xf32>
    %576 = arith.addf %575, %574 : vector<8x128xf32>
    %577 = arith.divf %575, %576 : vector<8x128xf32>
    %578 = vector.extract_strided_slice %577 {offsets = [0, 0], sizes = [8, 32], strides = [1, 1]} : vector<8x128xf32> to vector<8x32xf32>
    %579 = vector.extract_strided_slice %577 {offsets = [0, 32], sizes = [8, 32], strides = [1, 1]} : vector<8x128xf32> to vector<8x32xf32>
    %580 = vector.extract_strided_slice %577 {offsets = [0, 96], sizes = [8, 32], strides = [1, 1]} : vector<8x128xf32> to vector<8x32xf32>
    %581 = vector.extract_strided_slice %572 {offsets = [0, 64], sizes = [8, 32], strides = [1, 1]} : vector<8x128xf32> to vector<8x32xf32>
    %582 = math.tanh %581 : vector<8x32xf32>
    %583 = arith.mulf %579, %546 : vector<8x32xf32>
    %584 = arith.mulf %578, %582 : vector<8x32xf32>
    %585 = arith.addf %583, %584 : vector<8x32xf32>
    %586 = math.tanh %585 : vector<8x32xf32>
    %587 = arith.mulf %580, %586 : vector<8x32xf32>
    %cst_143 = arith.constant dense<0.000000e+00> : vector<8x128xf32>
    %588 = tpu.matmul %587, %14, %cst_143 {dimension_numbers = #tpu.dot_dimension_numbers<[1], [0], [0], [1], [0, 0, 1, 1], [], []>} : vector<8x32xf32>, vector<32x128xf32>, vector<8x128xf32> -> vector<8x128xf32>
    %cst_144 = arith.constant dense<0.000000e+00> : vector<8x128xf32>
    %589 = tpu.matmul %587, %15, %cst_144 {dimension_numbers = #tpu.dot_dimension_numbers<[1], [0], [0], [1], [0, 0, 1, 1], [], []>} : vector<8x32xf32>, vector<32x128xf32>, vector<8x128xf32> -> vector<8x128xf32>
    %590 = arith.addf %589, %568 : vector<8x128xf32>
    %591 = arith.addf %590, %19 : vector<8x128xf32>
    %592 = arith.negf %591 : vector<8x128xf32>
    %593 = math.exp %592 : vector<8x128xf32>
    %cst_145 = arith.constant 1.000000e+00 : f32
    %594 = vector.broadcast %cst_145 : f32 to vector<8x128xf32>
    %595 = arith.addf %594, %593 : vector<8x128xf32>
    %596 = arith.divf %594, %595 : vector<8x128xf32>
    %597 = vector.extract_strided_slice %596 {offsets = [0, 0], sizes = [8, 32], strides = [1, 1]} : vector<8x128xf32> to vector<8x32xf32>
    %598 = vector.extract_strided_slice %596 {offsets = [0, 32], sizes = [8, 32], strides = [1, 1]} : vector<8x128xf32> to vector<8x32xf32>
    %599 = vector.extract_strided_slice %596 {offsets = [0, 96], sizes = [8, 32], strides = [1, 1]} : vector<8x128xf32> to vector<8x32xf32>
    %600 = vector.extract_strided_slice %591 {offsets = [0, 64], sizes = [8, 32], strides = [1, 1]} : vector<8x128xf32> to vector<8x32xf32>
    %601 = math.tanh %600 : vector<8x32xf32>
    %602 = arith.mulf %598, %565 : vector<8x32xf32>
    %603 = arith.mulf %597, %601 : vector<8x32xf32>
    %604 = arith.addf %602, %603 : vector<8x32xf32>
    %605 = math.tanh %604 : vector<8x32xf32>
    %606 = arith.mulf %599, %605 : vector<8x32xf32>
    %cst_146 = arith.constant dense<0.000000e+00> : vector<8x128xf32>
    %607 = tpu.matmul %606, %16, %cst_146 {dimension_numbers = #tpu.dot_dimension_numbers<[1], [0], [0], [1], [0, 0, 1, 1], [], []>} : vector<8x32xf32>, vector<32x128xf32>, vector<8x128xf32> -> vector<8x128xf32>
    %c112 = arith.constant 112 : index
    %c0_147 = arith.constant 0 : index
    %608 = vector.load %arg13[%c112, %c0_147] : memref<192x32xf32, #tpu.memory_space<vmem>>, vector<8x32xf32>
    tpu.vector_store %arg13[%c112, %c0_147], %606 {strides = array<i32>} : memref<192x32xf32, #tpu.memory_space<vmem>>, vector<8x32xf32>,
    %c15 = arith.constant 15 : index
    %c0_148 = arith.constant 0 : index
    %c0_149 = arith.constant 0 : index
    %609 = vector.load %arg12[%c15, %c0_148, %c0_149] : memref<24x8x128xf32, #tpu.memory_space<vmem>>, vector<1x8x128xf32>
    %610 = vector.shape_cast %609 : vector<1x8x128xf32> to vector<8x128xf32>
    %611 = arith.addf %610, %588 : vector<8x128xf32>
    %612 = arith.negf %611 : vector<8x128xf32>
    %613 = math.exp %612 : vector<8x128xf32>
    %cst_150 = arith.constant 1.000000e+00 : f32
    %614 = vector.broadcast %cst_150 : f32 to vector<8x128xf32>
    %615 = arith.addf %614, %613 : vector<8x128xf32>
    %616 = arith.divf %614, %615 : vector<8x128xf32>
    %617 = vector.extract_strided_slice %616 {offsets = [0, 0], sizes = [8, 32], strides = [1, 1]} : vector<8x128xf32> to vector<8x32xf32>
    %618 = vector.extract_strided_slice %616 {offsets = [0, 32], sizes = [8, 32], strides = [1, 1]} : vector<8x128xf32> to vector<8x32xf32>
    %619 = vector.extract_strided_slice %616 {offsets = [0, 96], sizes = [8, 32], strides = [1, 1]} : vector<8x128xf32> to vector<8x32xf32>
    %620 = vector.extract_strided_slice %611 {offsets = [0, 64], sizes = [8, 32], strides = [1, 1]} : vector<8x128xf32> to vector<8x32xf32>
    %621 = math.tanh %620 : vector<8x32xf32>
    %622 = arith.mulf %618, %585 : vector<8x32xf32>
    %623 = arith.mulf %617, %621 : vector<8x32xf32>
    %624 = arith.addf %622, %623 : vector<8x32xf32>
    %625 = math.tanh %624 : vector<8x32xf32>
    %626 = arith.mulf %619, %625 : vector<8x32xf32>
    %cst_151 = arith.constant dense<0.000000e+00> : vector<8x128xf32>
    %627 = tpu.matmul %626, %14, %cst_151 {dimension_numbers = #tpu.dot_dimension_numbers<[1], [0], [0], [1], [0, 0, 1, 1], [], []>} : vector<8x32xf32>, vector<32x128xf32>, vector<8x128xf32> -> vector<8x128xf32>
    %cst_152 = arith.constant dense<0.000000e+00> : vector<8x128xf32>
    %628 = tpu.matmul %626, %15, %cst_152 {dimension_numbers = #tpu.dot_dimension_numbers<[1], [0], [0], [1], [0, 0, 1, 1], [], []>} : vector<8x32xf32>, vector<32x128xf32>, vector<8x128xf32> -> vector<8x128xf32>
    %629 = arith.addf %628, %607 : vector<8x128xf32>
    %630 = arith.addf %629, %19 : vector<8x128xf32>
    %631 = arith.negf %630 : vector<8x128xf32>
    %632 = math.exp %631 : vector<8x128xf32>
    %cst_153 = arith.constant 1.000000e+00 : f32
    %633 = vector.broadcast %cst_153 : f32 to vector<8x128xf32>
    %634 = arith.addf %633, %632 : vector<8x128xf32>
    %635 = arith.divf %633, %634 : vector<8x128xf32>
    %636 = vector.extract_strided_slice %635 {offsets = [0, 0], sizes = [8, 32], strides = [1, 1]} : vector<8x128xf32> to vector<8x32xf32>
    %637 = vector.extract_strided_slice %635 {offsets = [0, 32], sizes = [8, 32], strides = [1, 1]} : vector<8x128xf32> to vector<8x32xf32>
    %638 = vector.extract_strided_slice %635 {offsets = [0, 96], sizes = [8, 32], strides = [1, 1]} : vector<8x128xf32> to vector<8x32xf32>
    %639 = vector.extract_strided_slice %630 {offsets = [0, 64], sizes = [8, 32], strides = [1, 1]} : vector<8x128xf32> to vector<8x32xf32>
    %640 = math.tanh %639 : vector<8x32xf32>
    %641 = arith.mulf %637, %604 : vector<8x32xf32>
    %642 = arith.mulf %636, %640 : vector<8x32xf32>
    %643 = arith.addf %641, %642 : vector<8x32xf32>
    %644 = math.tanh %643 : vector<8x32xf32>
    %645 = arith.mulf %638, %644 : vector<8x32xf32>
    %cst_154 = arith.constant dense<0.000000e+00> : vector<8x128xf32>
    %646 = tpu.matmul %645, %16, %cst_154 {dimension_numbers = #tpu.dot_dimension_numbers<[1], [0], [0], [1], [0, 0, 1, 1], [], []>} : vector<8x32xf32>, vector<32x128xf32>, vector<8x128xf32> -> vector<8x128xf32>
    %c120 = arith.constant 120 : index
    %c0_155 = arith.constant 0 : index
    %647 = vector.load %arg13[%c120, %c0_155] : memref<192x32xf32, #tpu.memory_space<vmem>>, vector<8x32xf32>
    tpu.vector_store %arg13[%c120, %c0_155], %645 {strides = array<i32>} : memref<192x32xf32, #tpu.memory_space<vmem>>, vector<8x32xf32>,
    %c16_156 = arith.constant 16 : index
    %c0_157 = arith.constant 0 : index
    %c0_158 = arith.constant 0 : index
    %648 = vector.load %arg12[%c16_156, %c0_157, %c0_158] : memref<24x8x128xf32, #tpu.memory_space<vmem>>, vector<1x8x128xf32>
    %649 = vector.shape_cast %648 : vector<1x8x128xf32> to vector<8x128xf32>
    %650 = arith.addf %649, %627 : vector<8x128xf32>
    %651 = arith.negf %650 : vector<8x128xf32>
    %652 = math.exp %651 : vector<8x128xf32>
    %cst_159 = arith.constant 1.000000e+00 : f32
    %653 = vector.broadcast %cst_159 : f32 to vector<8x128xf32>
    %654 = arith.addf %653, %652 : vector<8x128xf32>
    %655 = arith.divf %653, %654 : vector<8x128xf32>
    %656 = vector.extract_strided_slice %655 {offsets = [0, 0], sizes = [8, 32], strides = [1, 1]} : vector<8x128xf32> to vector<8x32xf32>
    %657 = vector.extract_strided_slice %655 {offsets = [0, 32], sizes = [8, 32], strides = [1, 1]} : vector<8x128xf32> to vector<8x32xf32>
    %658 = vector.extract_strided_slice %655 {offsets = [0, 96], sizes = [8, 32], strides = [1, 1]} : vector<8x128xf32> to vector<8x32xf32>
    %659 = vector.extract_strided_slice %650 {offsets = [0, 64], sizes = [8, 32], strides = [1, 1]} : vector<8x128xf32> to vector<8x32xf32>
    %660 = math.tanh %659 : vector<8x32xf32>
    %661 = arith.mulf %657, %624 : vector<8x32xf32>
    %662 = arith.mulf %656, %660 : vector<8x32xf32>
    %663 = arith.addf %661, %662 : vector<8x32xf32>
    %664 = math.tanh %663 : vector<8x32xf32>
    %665 = arith.mulf %658, %664 : vector<8x32xf32>
    %cst_160 = arith.constant dense<0.000000e+00> : vector<8x128xf32>
    %666 = tpu.matmul %665, %14, %cst_160 {dimension_numbers = #tpu.dot_dimension_numbers<[1], [0], [0], [1], [0, 0, 1, 1], [], []>} : vector<8x32xf32>, vector<32x128xf32>, vector<8x128xf32> -> vector<8x128xf32>
    %cst_161 = arith.constant dense<0.000000e+00> : vector<8x128xf32>
    %667 = tpu.matmul %665, %15, %cst_161 {dimension_numbers = #tpu.dot_dimension_numbers<[1], [0], [0], [1], [0, 0, 1, 1], [], []>} : vector<8x32xf32>, vector<32x128xf32>, vector<8x128xf32> -> vector<8x128xf32>
    %668 = arith.addf %667, %646 : vector<8x128xf32>
    %669 = arith.addf %668, %19 : vector<8x128xf32>
    %670 = arith.negf %669 : vector<8x128xf32>
    %671 = math.exp %670 : vector<8x128xf32>
    %cst_162 = arith.constant 1.000000e+00 : f32
    %672 = vector.broadcast %cst_162 : f32 to vector<8x128xf32>
    %673 = arith.addf %672, %671 : vector<8x128xf32>
    %674 = arith.divf %672, %673 : vector<8x128xf32>
    %675 = vector.extract_strided_slice %674 {offsets = [0, 0], sizes = [8, 32], strides = [1, 1]} : vector<8x128xf32> to vector<8x32xf32>
    %676 = vector.extract_strided_slice %674 {offsets = [0, 32], sizes = [8, 32], strides = [1, 1]} : vector<8x128xf32> to vector<8x32xf32>
    %677 = vector.extract_strided_slice %674 {offsets = [0, 96], sizes = [8, 32], strides = [1, 1]} : vector<8x128xf32> to vector<8x32xf32>
    %678 = vector.extract_strided_slice %669 {offsets = [0, 64], sizes = [8, 32], strides = [1, 1]} : vector<8x128xf32> to vector<8x32xf32>
    %679 = math.tanh %678 : vector<8x32xf32>
    %680 = arith.mulf %676, %643 : vector<8x32xf32>
    %681 = arith.mulf %675, %679 : vector<8x32xf32>
    %682 = arith.addf %680, %681 : vector<8x32xf32>
    %683 = math.tanh %682 : vector<8x32xf32>
    %684 = arith.mulf %677, %683 : vector<8x32xf32>
    %cst_163 = arith.constant dense<0.000000e+00> : vector<8x128xf32>
    %685 = tpu.matmul %684, %16, %cst_163 {dimension_numbers = #tpu.dot_dimension_numbers<[1], [0], [0], [1], [0, 0, 1, 1], [], []>} : vector<8x32xf32>, vector<32x128xf32>, vector<8x128xf32> -> vector<8x128xf32>
    %c128 = arith.constant 128 : index
    %c0_164 = arith.constant 0 : index
    %686 = vector.load %arg13[%c128, %c0_164] : memref<192x32xf32, #tpu.memory_space<vmem>>, vector<8x32xf32>
    tpu.vector_store %arg13[%c128, %c0_164], %684 {strides = array<i32>} : memref<192x32xf32, #tpu.memory_space<vmem>>, vector<8x32xf32>,
    %c17 = arith.constant 17 : index
    %c0_165 = arith.constant 0 : index
    %c0_166 = arith.constant 0 : index
    %687 = vector.load %arg12[%c17, %c0_165, %c0_166] : memref<24x8x128xf32, #tpu.memory_space<vmem>>, vector<1x8x128xf32>
    %688 = vector.shape_cast %687 : vector<1x8x128xf32> to vector<8x128xf32>
    %689 = arith.addf %688, %666 : vector<8x128xf32>
    %690 = arith.negf %689 : vector<8x128xf32>
    %691 = math.exp %690 : vector<8x128xf32>
    %cst_167 = arith.constant 1.000000e+00 : f32
    %692 = vector.broadcast %cst_167 : f32 to vector<8x128xf32>
    %693 = arith.addf %692, %691 : vector<8x128xf32>
    %694 = arith.divf %692, %693 : vector<8x128xf32>
    %695 = vector.extract_strided_slice %694 {offsets = [0, 0], sizes = [8, 32], strides = [1, 1]} : vector<8x128xf32> to vector<8x32xf32>
    %696 = vector.extract_strided_slice %694 {offsets = [0, 32], sizes = [8, 32], strides = [1, 1]} : vector<8x128xf32> to vector<8x32xf32>
    %697 = vector.extract_strided_slice %694 {offsets = [0, 96], sizes = [8, 32], strides = [1, 1]} : vector<8x128xf32> to vector<8x32xf32>
    %698 = vector.extract_strided_slice %689 {offsets = [0, 64], sizes = [8, 32], strides = [1, 1]} : vector<8x128xf32> to vector<8x32xf32>
    %699 = math.tanh %698 : vector<8x32xf32>
    %700 = arith.mulf %696, %663 : vector<8x32xf32>
    %701 = arith.mulf %695, %699 : vector<8x32xf32>
    %702 = arith.addf %700, %701 : vector<8x32xf32>
    %703 = math.tanh %702 : vector<8x32xf32>
    %704 = arith.mulf %697, %703 : vector<8x32xf32>
    %cst_168 = arith.constant dense<0.000000e+00> : vector<8x128xf32>
    %705 = tpu.matmul %704, %14, %cst_168 {dimension_numbers = #tpu.dot_dimension_numbers<[1], [0], [0], [1], [0, 0, 1, 1], [], []>} : vector<8x32xf32>, vector<32x128xf32>, vector<8x128xf32> -> vector<8x128xf32>
    %cst_169 = arith.constant dense<0.000000e+00> : vector<8x128xf32>
    %706 = tpu.matmul %704, %15, %cst_169 {dimension_numbers = #tpu.dot_dimension_numbers<[1], [0], [0], [1], [0, 0, 1, 1], [], []>} : vector<8x32xf32>, vector<32x128xf32>, vector<8x128xf32> -> vector<8x128xf32>
    %707 = arith.addf %706, %685 : vector<8x128xf32>
    %708 = arith.addf %707, %19 : vector<8x128xf32>
    %709 = arith.negf %708 : vector<8x128xf32>
    %710 = math.exp %709 : vector<8x128xf32>
    %cst_170 = arith.constant 1.000000e+00 : f32
    %711 = vector.broadcast %cst_170 : f32 to vector<8x128xf32>
    %712 = arith.addf %711, %710 : vector<8x128xf32>
    %713 = arith.divf %711, %712 : vector<8x128xf32>
    %714 = vector.extract_strided_slice %713 {offsets = [0, 0], sizes = [8, 32], strides = [1, 1]} : vector<8x128xf32> to vector<8x32xf32>
    %715 = vector.extract_strided_slice %713 {offsets = [0, 32], sizes = [8, 32], strides = [1, 1]} : vector<8x128xf32> to vector<8x32xf32>
    %716 = vector.extract_strided_slice %713 {offsets = [0, 96], sizes = [8, 32], strides = [1, 1]} : vector<8x128xf32> to vector<8x32xf32>
    %717 = vector.extract_strided_slice %708 {offsets = [0, 64], sizes = [8, 32], strides = [1, 1]} : vector<8x128xf32> to vector<8x32xf32>
    %718 = math.tanh %717 : vector<8x32xf32>
    %719 = arith.mulf %715, %682 : vector<8x32xf32>
    %720 = arith.mulf %714, %718 : vector<8x32xf32>
    %721 = arith.addf %719, %720 : vector<8x32xf32>
    %722 = math.tanh %721 : vector<8x32xf32>
    %723 = arith.mulf %716, %722 : vector<8x32xf32>
    %cst_171 = arith.constant dense<0.000000e+00> : vector<8x128xf32>
    %724 = tpu.matmul %723, %16, %cst_171 {dimension_numbers = #tpu.dot_dimension_numbers<[1], [0], [0], [1], [0, 0, 1, 1], [], []>} : vector<8x32xf32>, vector<32x128xf32>, vector<8x128xf32> -> vector<8x128xf32>
    %c136 = arith.constant 136 : index
    %c0_172 = arith.constant 0 : index
    %725 = vector.load %arg13[%c136, %c0_172] : memref<192x32xf32, #tpu.memory_space<vmem>>, vector<8x32xf32>
    tpu.vector_store %arg13[%c136, %c0_172], %723 {strides = array<i32>} : memref<192x32xf32, #tpu.memory_space<vmem>>, vector<8x32xf32>,
    %c18 = arith.constant 18 : index
    %c0_173 = arith.constant 0 : index
    %c0_174 = arith.constant 0 : index
    %726 = vector.load %arg12[%c18, %c0_173, %c0_174] : memref<24x8x128xf32, #tpu.memory_space<vmem>>, vector<1x8x128xf32>
    %727 = vector.shape_cast %726 : vector<1x8x128xf32> to vector<8x128xf32>
    %728 = arith.addf %727, %705 : vector<8x128xf32>
    %729 = arith.negf %728 : vector<8x128xf32>
    %730 = math.exp %729 : vector<8x128xf32>
    %cst_175 = arith.constant 1.000000e+00 : f32
    %731 = vector.broadcast %cst_175 : f32 to vector<8x128xf32>
    %732 = arith.addf %731, %730 : vector<8x128xf32>
    %733 = arith.divf %731, %732 : vector<8x128xf32>
    %734 = vector.extract_strided_slice %733 {offsets = [0, 0], sizes = [8, 32], strides = [1, 1]} : vector<8x128xf32> to vector<8x32xf32>
    %735 = vector.extract_strided_slice %733 {offsets = [0, 32], sizes = [8, 32], strides = [1, 1]} : vector<8x128xf32> to vector<8x32xf32>
    %736 = vector.extract_strided_slice %733 {offsets = [0, 96], sizes = [8, 32], strides = [1, 1]} : vector<8x128xf32> to vector<8x32xf32>
    %737 = vector.extract_strided_slice %728 {offsets = [0, 64], sizes = [8, 32], strides = [1, 1]} : vector<8x128xf32> to vector<8x32xf32>
    %738 = math.tanh %737 : vector<8x32xf32>
    %739 = arith.mulf %735, %702 : vector<8x32xf32>
    %740 = arith.mulf %734, %738 : vector<8x32xf32>
    %741 = arith.addf %739, %740 : vector<8x32xf32>
    %742 = math.tanh %741 : vector<8x32xf32>
    %743 = arith.mulf %736, %742 : vector<8x32xf32>
    %cst_176 = arith.constant dense<0.000000e+00> : vector<8x128xf32>
    %744 = tpu.matmul %743, %14, %cst_176 {dimension_numbers = #tpu.dot_dimension_numbers<[1], [0], [0], [1], [0, 0, 1, 1], [], []>} : vector<8x32xf32>, vector<32x128xf32>, vector<8x128xf32> -> vector<8x128xf32>
    %cst_177 = arith.constant dense<0.000000e+00> : vector<8x128xf32>
    %745 = tpu.matmul %743, %15, %cst_177 {dimension_numbers = #tpu.dot_dimension_numbers<[1], [0], [0], [1], [0, 0, 1, 1], [], []>} : vector<8x32xf32>, vector<32x128xf32>, vector<8x128xf32> -> vector<8x128xf32>
    %746 = arith.addf %745, %724 : vector<8x128xf32>
    %747 = arith.addf %746, %19 : vector<8x128xf32>
    %748 = arith.negf %747 : vector<8x128xf32>
    %749 = math.exp %748 : vector<8x128xf32>
    %cst_178 = arith.constant 1.000000e+00 : f32
    %750 = vector.broadcast %cst_178 : f32 to vector<8x128xf32>
    %751 = arith.addf %750, %749 : vector<8x128xf32>
    %752 = arith.divf %750, %751 : vector<8x128xf32>
    %753 = vector.extract_strided_slice %752 {offsets = [0, 0], sizes = [8, 32], strides = [1, 1]} : vector<8x128xf32> to vector<8x32xf32>
    %754 = vector.extract_strided_slice %752 {offsets = [0, 32], sizes = [8, 32], strides = [1, 1]} : vector<8x128xf32> to vector<8x32xf32>
    %755 = vector.extract_strided_slice %752 {offsets = [0, 96], sizes = [8, 32], strides = [1, 1]} : vector<8x128xf32> to vector<8x32xf32>
    %756 = vector.extract_strided_slice %747 {offsets = [0, 64], sizes = [8, 32], strides = [1, 1]} : vector<8x128xf32> to vector<8x32xf32>
    %757 = math.tanh %756 : vector<8x32xf32>
    %758 = arith.mulf %754, %721 : vector<8x32xf32>
    %759 = arith.mulf %753, %757 : vector<8x32xf32>
    %760 = arith.addf %758, %759 : vector<8x32xf32>
    %761 = math.tanh %760 : vector<8x32xf32>
    %762 = arith.mulf %755, %761 : vector<8x32xf32>
    %cst_179 = arith.constant dense<0.000000e+00> : vector<8x128xf32>
    %763 = tpu.matmul %762, %16, %cst_179 {dimension_numbers = #tpu.dot_dimension_numbers<[1], [0], [0], [1], [0, 0, 1, 1], [], []>} : vector<8x32xf32>, vector<32x128xf32>, vector<8x128xf32> -> vector<8x128xf32>
    %c144 = arith.constant 144 : index
    %c0_180 = arith.constant 0 : index
    %764 = vector.load %arg13[%c144, %c0_180] : memref<192x32xf32, #tpu.memory_space<vmem>>, vector<8x32xf32>
    tpu.vector_store %arg13[%c144, %c0_180], %762 {strides = array<i32>} : memref<192x32xf32, #tpu.memory_space<vmem>>, vector<8x32xf32>,
    %c19 = arith.constant 19 : index
    %c0_181 = arith.constant 0 : index
    %c0_182 = arith.constant 0 : index
    %765 = vector.load %arg12[%c19, %c0_181, %c0_182] : memref<24x8x128xf32, #tpu.memory_space<vmem>>, vector<1x8x128xf32>
    %766 = vector.shape_cast %765 : vector<1x8x128xf32> to vector<8x128xf32>
    %767 = arith.addf %766, %744 : vector<8x128xf32>
    %768 = arith.negf %767 : vector<8x128xf32>
    %769 = math.exp %768 : vector<8x128xf32>
    %cst_183 = arith.constant 1.000000e+00 : f32
    %770 = vector.broadcast %cst_183 : f32 to vector<8x128xf32>
    %771 = arith.addf %770, %769 : vector<8x128xf32>
    %772 = arith.divf %770, %771 : vector<8x128xf32>
    %773 = vector.extract_strided_slice %772 {offsets = [0, 0], sizes = [8, 32], strides = [1, 1]} : vector<8x128xf32> to vector<8x32xf32>
    %774 = vector.extract_strided_slice %772 {offsets = [0, 32], sizes = [8, 32], strides = [1, 1]} : vector<8x128xf32> to vector<8x32xf32>
    %775 = vector.extract_strided_slice %772 {offsets = [0, 96], sizes = [8, 32], strides = [1, 1]} : vector<8x128xf32> to vector<8x32xf32>
    %776 = vector.extract_strided_slice %767 {offsets = [0, 64], sizes = [8, 32], strides = [1, 1]} : vector<8x128xf32> to vector<8x32xf32>
    %777 = math.tanh %776 : vector<8x32xf32>
    %778 = arith.mulf %774, %741 : vector<8x32xf32>
    %779 = arith.mulf %773, %777 : vector<8x32xf32>
    %780 = arith.addf %778, %779 : vector<8x32xf32>
    %781 = math.tanh %780 : vector<8x32xf32>
    %782 = arith.mulf %775, %781 : vector<8x32xf32>
    %cst_184 = arith.constant dense<0.000000e+00> : vector<8x128xf32>
    %783 = tpu.matmul %782, %14, %cst_184 {dimension_numbers = #tpu.dot_dimension_numbers<[1], [0], [0], [1], [0, 0, 1, 1], [], []>} : vector<8x32xf32>, vector<32x128xf32>, vector<8x128xf32> -> vector<8x128xf32>
    %cst_185 = arith.constant dense<0.000000e+00> : vector<8x128xf32>
    %784 = tpu.matmul %782, %15, %cst_185 {dimension_numbers = #tpu.dot_dimension_numbers<[1], [0], [0], [1], [0, 0, 1, 1], [], []>} : vector<8x32xf32>, vector<32x128xf32>, vector<8x128xf32> -> vector<8x128xf32>
    %785 = arith.addf %784, %763 : vector<8x128xf32>
    %786 = arith.addf %785, %19 : vector<8x128xf32>
    %787 = arith.negf %786 : vector<8x128xf32>
    %788 = math.exp %787 : vector<8x128xf32>
    %cst_186 = arith.constant 1.000000e+00 : f32
    %789 = vector.broadcast %cst_186 : f32 to vector<8x128xf32>
    %790 = arith.addf %789, %788 : vector<8x128xf32>
    %791 = arith.divf %789, %790 : vector<8x128xf32>
    %792 = vector.extract_strided_slice %791 {offsets = [0, 0], sizes = [8, 32], strides = [1, 1]} : vector<8x128xf32> to vector<8x32xf32>
    %793 = vector.extract_strided_slice %791 {offsets = [0, 32], sizes = [8, 32], strides = [1, 1]} : vector<8x128xf32> to vector<8x32xf32>
    %794 = vector.extract_strided_slice %791 {offsets = [0, 96], sizes = [8, 32], strides = [1, 1]} : vector<8x128xf32> to vector<8x32xf32>
    %795 = vector.extract_strided_slice %786 {offsets = [0, 64], sizes = [8, 32], strides = [1, 1]} : vector<8x128xf32> to vector<8x32xf32>
    %796 = math.tanh %795 : vector<8x32xf32>
    %797 = arith.mulf %793, %760 : vector<8x32xf32>
    %798 = arith.mulf %792, %796 : vector<8x32xf32>
    %799 = arith.addf %797, %798 : vector<8x32xf32>
    %800 = math.tanh %799 : vector<8x32xf32>
    %801 = arith.mulf %794, %800 : vector<8x32xf32>
    %cst_187 = arith.constant dense<0.000000e+00> : vector<8x128xf32>
    %802 = tpu.matmul %801, %16, %cst_187 {dimension_numbers = #tpu.dot_dimension_numbers<[1], [0], [0], [1], [0, 0, 1, 1], [], []>} : vector<8x32xf32>, vector<32x128xf32>, vector<8x128xf32> -> vector<8x128xf32>
    %c152 = arith.constant 152 : index
    %c0_188 = arith.constant 0 : index
    %803 = vector.load %arg13[%c152, %c0_188] : memref<192x32xf32, #tpu.memory_space<vmem>>, vector<8x32xf32>
    tpu.vector_store %arg13[%c152, %c0_188], %801 {strides = array<i32>} : memref<192x32xf32, #tpu.memory_space<vmem>>, vector<8x32xf32>,
    %c20 = arith.constant 20 : index
    %c0_189 = arith.constant 0 : index
    %c0_190 = arith.constant 0 : index
    %804 = vector.load %arg12[%c20, %c0_189, %c0_190] : memref<24x8x128xf32, #tpu.memory_space<vmem>>, vector<1x8x128xf32>
    %805 = vector.shape_cast %804 : vector<1x8x128xf32> to vector<8x128xf32>
    %806 = arith.addf %805, %783 : vector<8x128xf32>
    %807 = arith.negf %806 : vector<8x128xf32>
    %808 = math.exp %807 : vector<8x128xf32>
    %cst_191 = arith.constant 1.000000e+00 : f32
    %809 = vector.broadcast %cst_191 : f32 to vector<8x128xf32>
    %810 = arith.addf %809, %808 : vector<8x128xf32>
    %811 = arith.divf %809, %810 : vector<8x128xf32>
    %812 = vector.extract_strided_slice %811 {offsets = [0, 0], sizes = [8, 32], strides = [1, 1]} : vector<8x128xf32> to vector<8x32xf32>
    %813 = vector.extract_strided_slice %811 {offsets = [0, 32], sizes = [8, 32], strides = [1, 1]} : vector<8x128xf32> to vector<8x32xf32>
    %814 = vector.extract_strided_slice %811 {offsets = [0, 96], sizes = [8, 32], strides = [1, 1]} : vector<8x128xf32> to vector<8x32xf32>
    %815 = vector.extract_strided_slice %806 {offsets = [0, 64], sizes = [8, 32], strides = [1, 1]} : vector<8x128xf32> to vector<8x32xf32>
    %816 = math.tanh %815 : vector<8x32xf32>
    %817 = arith.mulf %813, %780 : vector<8x32xf32>
    %818 = arith.mulf %812, %816 : vector<8x32xf32>
    %819 = arith.addf %817, %818 : vector<8x32xf32>
    %820 = math.tanh %819 : vector<8x32xf32>
    %821 = arith.mulf %814, %820 : vector<8x32xf32>
    %cst_192 = arith.constant dense<0.000000e+00> : vector<8x128xf32>
    %822 = tpu.matmul %821, %14, %cst_192 {dimension_numbers = #tpu.dot_dimension_numbers<[1], [0], [0], [1], [0, 0, 1, 1], [], []>} : vector<8x32xf32>, vector<32x128xf32>, vector<8x128xf32> -> vector<8x128xf32>
    %cst_193 = arith.constant dense<0.000000e+00> : vector<8x128xf32>
    %823 = tpu.matmul %821, %15, %cst_193 {dimension_numbers = #tpu.dot_dimension_numbers<[1], [0], [0], [1], [0, 0, 1, 1], [], []>} : vector<8x32xf32>, vector<32x128xf32>, vector<8x128xf32> -> vector<8x128xf32>
    %824 = arith.addf %823, %802 : vector<8x128xf32>
    %825 = arith.addf %824, %19 : vector<8x128xf32>
    %826 = arith.negf %825 : vector<8x128xf32>
    %827 = math.exp %826 : vector<8x128xf32>
    %cst_194 = arith.constant 1.000000e+00 : f32
    %828 = vector.broadcast %cst_194 : f32 to vector<8x128xf32>
    %829 = arith.addf %828, %827 : vector<8x128xf32>
    %830 = arith.divf %828, %829 : vector<8x128xf32>
    %831 = vector.extract_strided_slice %830 {offsets = [0, 0], sizes = [8, 32], strides = [1, 1]} : vector<8x128xf32> to vector<8x32xf32>
    %832 = vector.extract_strided_slice %830 {offsets = [0, 32], sizes = [8, 32], strides = [1, 1]} : vector<8x128xf32> to vector<8x32xf32>
    %833 = vector.extract_strided_slice %830 {offsets = [0, 96], sizes = [8, 32], strides = [1, 1]} : vector<8x128xf32> to vector<8x32xf32>
    %834 = vector.extract_strided_slice %825 {offsets = [0, 64], sizes = [8, 32], strides = [1, 1]} : vector<8x128xf32> to vector<8x32xf32>
    %835 = math.tanh %834 : vector<8x32xf32>
    %836 = arith.mulf %832, %799 : vector<8x32xf32>
    %837 = arith.mulf %831, %835 : vector<8x32xf32>
    %838 = arith.addf %836, %837 : vector<8x32xf32>
    %839 = math.tanh %838 : vector<8x32xf32>
    %840 = arith.mulf %833, %839 : vector<8x32xf32>
    %cst_195 = arith.constant dense<0.000000e+00> : vector<8x128xf32>
    %841 = tpu.matmul %840, %16, %cst_195 {dimension_numbers = #tpu.dot_dimension_numbers<[1], [0], [0], [1], [0, 0, 1, 1], [], []>} : vector<8x32xf32>, vector<32x128xf32>, vector<8x128xf32> -> vector<8x128xf32>
    %c160 = arith.constant 160 : index
    %c0_196 = arith.constant 0 : index
    %842 = vector.load %arg13[%c160, %c0_196] : memref<192x32xf32, #tpu.memory_space<vmem>>, vector<8x32xf32>
    tpu.vector_store %arg13[%c160, %c0_196], %840 {strides = array<i32>} : memref<192x32xf32, #tpu.memory_space<vmem>>, vector<8x32xf32>,
    %c21 = arith.constant 21 : index
    %c0_197 = arith.constant 0 : index
    %c0_198 = arith.constant 0 : index
    %843 = vector.load %arg12[%c21, %c0_197, %c0_198] : memref<24x8x128xf32, #tpu.memory_space<vmem>>, vector<1x8x128xf32>
    %844 = vector.shape_cast %843 : vector<1x8x128xf32> to vector<8x128xf32>
    %845 = arith.addf %844, %822 : vector<8x128xf32>
    %846 = arith.negf %845 : vector<8x128xf32>
    %847 = math.exp %846 : vector<8x128xf32>
    %cst_199 = arith.constant 1.000000e+00 : f32
    %848 = vector.broadcast %cst_199 : f32 to vector<8x128xf32>
    %849 = arith.addf %848, %847 : vector<8x128xf32>
    %850 = arith.divf %848, %849 : vector<8x128xf32>
    %851 = vector.extract_strided_slice %850 {offsets = [0, 0], sizes = [8, 32], strides = [1, 1]} : vector<8x128xf32> to vector<8x32xf32>
    %852 = vector.extract_strided_slice %850 {offsets = [0, 32], sizes = [8, 32], strides = [1, 1]} : vector<8x128xf32> to vector<8x32xf32>
    %853 = vector.extract_strided_slice %850 {offsets = [0, 96], sizes = [8, 32], strides = [1, 1]} : vector<8x128xf32> to vector<8x32xf32>
    %854 = vector.extract_strided_slice %845 {offsets = [0, 64], sizes = [8, 32], strides = [1, 1]} : vector<8x128xf32> to vector<8x32xf32>
    %855 = math.tanh %854 : vector<8x32xf32>
    %856 = arith.mulf %852, %819 : vector<8x32xf32>
    %857 = arith.mulf %851, %855 : vector<8x32xf32>
    %858 = arith.addf %856, %857 : vector<8x32xf32>
    %859 = math.tanh %858 : vector<8x32xf32>
    %860 = arith.mulf %853, %859 : vector<8x32xf32>
    %cst_200 = arith.constant dense<0.000000e+00> : vector<8x128xf32>
    %861 = tpu.matmul %860, %14, %cst_200 {dimension_numbers = #tpu.dot_dimension_numbers<[1], [0], [0], [1], [0, 0, 1, 1], [], []>} : vector<8x32xf32>, vector<32x128xf32>, vector<8x128xf32> -> vector<8x128xf32>
    %cst_201 = arith.constant dense<0.000000e+00> : vector<8x128xf32>
    %862 = tpu.matmul %860, %15, %cst_201 {dimension_numbers = #tpu.dot_dimension_numbers<[1], [0], [0], [1], [0, 0, 1, 1], [], []>} : vector<8x32xf32>, vector<32x128xf32>, vector<8x128xf32> -> vector<8x128xf32>
    %863 = arith.addf %862, %841 : vector<8x128xf32>
    %864 = arith.addf %863, %19 : vector<8x128xf32>
    %865 = arith.negf %864 : vector<8x128xf32>
    %866 = math.exp %865 : vector<8x128xf32>
    %cst_202 = arith.constant 1.000000e+00 : f32
    %867 = vector.broadcast %cst_202 : f32 to vector<8x128xf32>
    %868 = arith.addf %867, %866 : vector<8x128xf32>
    %869 = arith.divf %867, %868 : vector<8x128xf32>
    %870 = vector.extract_strided_slice %869 {offsets = [0, 0], sizes = [8, 32], strides = [1, 1]} : vector<8x128xf32> to vector<8x32xf32>
    %871 = vector.extract_strided_slice %869 {offsets = [0, 32], sizes = [8, 32], strides = [1, 1]} : vector<8x128xf32> to vector<8x32xf32>
    %872 = vector.extract_strided_slice %869 {offsets = [0, 96], sizes = [8, 32], strides = [1, 1]} : vector<8x128xf32> to vector<8x32xf32>
    %873 = vector.extract_strided_slice %864 {offsets = [0, 64], sizes = [8, 32], strides = [1, 1]} : vector<8x128xf32> to vector<8x32xf32>
    %874 = math.tanh %873 : vector<8x32xf32>
    %875 = arith.mulf %871, %838 : vector<8x32xf32>
    %876 = arith.mulf %870, %874 : vector<8x32xf32>
    %877 = arith.addf %875, %876 : vector<8x32xf32>
    %878 = math.tanh %877 : vector<8x32xf32>
    %879 = arith.mulf %872, %878 : vector<8x32xf32>
    %cst_203 = arith.constant dense<0.000000e+00> : vector<8x128xf32>
    %880 = tpu.matmul %879, %16, %cst_203 {dimension_numbers = #tpu.dot_dimension_numbers<[1], [0], [0], [1], [0, 0, 1, 1], [], []>} : vector<8x32xf32>, vector<32x128xf32>, vector<8x128xf32> -> vector<8x128xf32>
    %c168 = arith.constant 168 : index
    %c0_204 = arith.constant 0 : index
    %881 = vector.load %arg13[%c168, %c0_204] : memref<192x32xf32, #tpu.memory_space<vmem>>, vector<8x32xf32>
    tpu.vector_store %arg13[%c168, %c0_204], %879 {strides = array<i32>} : memref<192x32xf32, #tpu.memory_space<vmem>>, vector<8x32xf32>,
    %c22 = arith.constant 22 : index
    %c0_205 = arith.constant 0 : index
    %c0_206 = arith.constant 0 : index
    %882 = vector.load %arg12[%c22, %c0_205, %c0_206] : memref<24x8x128xf32, #tpu.memory_space<vmem>>, vector<1x8x128xf32>
    %883 = vector.shape_cast %882 : vector<1x8x128xf32> to vector<8x128xf32>
    %884 = arith.addf %883, %861 : vector<8x128xf32>
    %885 = arith.negf %884 : vector<8x128xf32>
    %886 = math.exp %885 : vector<8x128xf32>
    %cst_207 = arith.constant 1.000000e+00 : f32
    %887 = vector.broadcast %cst_207 : f32 to vector<8x128xf32>
    %888 = arith.addf %887, %886 : vector<8x128xf32>
    %889 = arith.divf %887, %888 : vector<8x128xf32>
    %890 = vector.extract_strided_slice %889 {offsets = [0, 0], sizes = [8, 32], strides = [1, 1]} : vector<8x128xf32> to vector<8x32xf32>
    %891 = vector.extract_strided_slice %889 {offsets = [0, 32], sizes = [8, 32], strides = [1, 1]} : vector<8x128xf32> to vector<8x32xf32>
    %892 = vector.extract_strided_slice %889 {offsets = [0, 96], sizes = [8, 32], strides = [1, 1]} : vector<8x128xf32> to vector<8x32xf32>
    %893 = vector.extract_strided_slice %884 {offsets = [0, 64], sizes = [8, 32], strides = [1, 1]} : vector<8x128xf32> to vector<8x32xf32>
    %894 = math.tanh %893 : vector<8x32xf32>
    %895 = arith.mulf %891, %858 : vector<8x32xf32>
    %896 = arith.mulf %890, %894 : vector<8x32xf32>
    %897 = arith.addf %895, %896 : vector<8x32xf32>
    %898 = math.tanh %897 : vector<8x32xf32>
    %899 = arith.mulf %892, %898 : vector<8x32xf32>
    %cst_208 = arith.constant dense<0.000000e+00> : vector<8x128xf32>
    %900 = tpu.matmul %899, %14, %cst_208 {dimension_numbers = #tpu.dot_dimension_numbers<[1], [0], [0], [1], [0, 0, 1, 1], [], []>} : vector<8x32xf32>, vector<32x128xf32>, vector<8x128xf32> -> vector<8x128xf32>
    %cst_209 = arith.constant dense<0.000000e+00> : vector<8x128xf32>
    %901 = tpu.matmul %899, %15, %cst_209 {dimension_numbers = #tpu.dot_dimension_numbers<[1], [0], [0], [1], [0, 0, 1, 1], [], []>} : vector<8x32xf32>, vector<32x128xf32>, vector<8x128xf32> -> vector<8x128xf32>
    %902 = arith.addf %901, %880 : vector<8x128xf32>
    %903 = arith.addf %902, %19 : vector<8x128xf32>
    %904 = arith.negf %903 : vector<8x128xf32>
    %905 = math.exp %904 : vector<8x128xf32>
    %cst_210 = arith.constant 1.000000e+00 : f32
    %906 = vector.broadcast %cst_210 : f32 to vector<8x128xf32>
    %907 = arith.addf %906, %905 : vector<8x128xf32>
    %908 = arith.divf %906, %907 : vector<8x128xf32>
    %909 = vector.extract_strided_slice %908 {offsets = [0, 0], sizes = [8, 32], strides = [1, 1]} : vector<8x128xf32> to vector<8x32xf32>
    %910 = vector.extract_strided_slice %908 {offsets = [0, 32], sizes = [8, 32], strides = [1, 1]} : vector<8x128xf32> to vector<8x32xf32>
    %911 = vector.extract_strided_slice %908 {offsets = [0, 96], sizes = [8, 32], strides = [1, 1]} : vector<8x128xf32> to vector<8x32xf32>
    %912 = vector.extract_strided_slice %903 {offsets = [0, 64], sizes = [8, 32], strides = [1, 1]} : vector<8x128xf32> to vector<8x32xf32>
    %913 = math.tanh %912 : vector<8x32xf32>
    %914 = arith.mulf %910, %877 : vector<8x32xf32>
    %915 = arith.mulf %909, %913 : vector<8x32xf32>
    %916 = arith.addf %914, %915 : vector<8x32xf32>
    %917 = math.tanh %916 : vector<8x32xf32>
    %918 = arith.mulf %911, %917 : vector<8x32xf32>
    %cst_211 = arith.constant dense<0.000000e+00> : vector<8x128xf32>
    %919 = tpu.matmul %918, %16, %cst_211 {dimension_numbers = #tpu.dot_dimension_numbers<[1], [0], [0], [1], [0, 0, 1, 1], [], []>} : vector<8x32xf32>, vector<32x128xf32>, vector<8x128xf32> -> vector<8x128xf32>
    %c176 = arith.constant 176 : index
    %c0_212 = arith.constant 0 : index
    %920 = vector.load %arg13[%c176, %c0_212] : memref<192x32xf32, #tpu.memory_space<vmem>>, vector<8x32xf32>
    tpu.vector_store %arg13[%c176, %c0_212], %918 {strides = array<i32>} : memref<192x32xf32, #tpu.memory_space<vmem>>, vector<8x32xf32>,
    %c23 = arith.constant 23 : index
    %c0_213 = arith.constant 0 : index
    %c0_214 = arith.constant 0 : index
    %921 = vector.load %arg12[%c23, %c0_213, %c0_214] : memref<24x8x128xf32, #tpu.memory_space<vmem>>, vector<1x8x128xf32>
    %922 = vector.shape_cast %921 : vector<1x8x128xf32> to vector<8x128xf32>
    %923 = arith.addf %922, %900 : vector<8x128xf32>
    %924 = arith.negf %923 : vector<8x128xf32>
    %925 = math.exp %924 : vector<8x128xf32>
    %cst_215 = arith.constant 1.000000e+00 : f32
    %926 = vector.broadcast %cst_215 : f32 to vector<8x128xf32>
    %927 = arith.addf %926, %925 : vector<8x128xf32>
    %928 = arith.divf %926, %927 : vector<8x128xf32>
    %929 = vector.extract_strided_slice %928 {offsets = [0, 0], sizes = [8, 32], strides = [1, 1]} : vector<8x128xf32> to vector<8x32xf32>
    %930 = vector.extract_strided_slice %928 {offsets = [0, 32], sizes = [8, 32], strides = [1, 1]} : vector<8x128xf32> to vector<8x32xf32>
    %931 = vector.extract_strided_slice %928 {offsets = [0, 96], sizes = [8, 32], strides = [1, 1]} : vector<8x128xf32> to vector<8x32xf32>
    %932 = vector.extract_strided_slice %923 {offsets = [0, 64], sizes = [8, 32], strides = [1, 1]} : vector<8x128xf32> to vector<8x32xf32>
    %933 = math.tanh %932 : vector<8x32xf32>
    %934 = arith.mulf %930, %897 : vector<8x32xf32>
    %935 = arith.mulf %929, %933 : vector<8x32xf32>
    %936 = arith.addf %934, %935 : vector<8x32xf32>
    %937 = math.tanh %936 : vector<8x32xf32>
    %938 = arith.mulf %931, %937 : vector<8x32xf32>
    %cst_216 = arith.constant dense<0.000000e+00> : vector<8x128xf32>
    %939 = tpu.matmul %938, %15, %cst_216 {dimension_numbers = #tpu.dot_dimension_numbers<[1], [0], [0], [1], [0, 0, 1, 1], [], []>} : vector<8x32xf32>, vector<32x128xf32>, vector<8x128xf32> -> vector<8x128xf32>
    %940 = arith.addf %939, %919 : vector<8x128xf32>
    %941 = arith.addf %940, %19 : vector<8x128xf32>
    %942 = arith.negf %941 : vector<8x128xf32>
    %943 = math.exp %942 : vector<8x128xf32>
    %cst_217 = arith.constant 1.000000e+00 : f32
    %944 = vector.broadcast %cst_217 : f32 to vector<8x128xf32>
    %945 = arith.addf %944, %943 : vector<8x128xf32>
    %946 = arith.divf %944, %945 : vector<8x128xf32>
    %947 = vector.extract_strided_slice %946 {offsets = [0, 0], sizes = [8, 32], strides = [1, 1]} : vector<8x128xf32> to vector<8x32xf32>
    %948 = vector.extract_strided_slice %946 {offsets = [0, 32], sizes = [8, 32], strides = [1, 1]} : vector<8x128xf32> to vector<8x32xf32>
    %949 = vector.extract_strided_slice %946 {offsets = [0, 96], sizes = [8, 32], strides = [1, 1]} : vector<8x128xf32> to vector<8x32xf32>
    %950 = vector.extract_strided_slice %941 {offsets = [0, 64], sizes = [8, 32], strides = [1, 1]} : vector<8x128xf32> to vector<8x32xf32>
    %951 = math.tanh %950 : vector<8x32xf32>
    %952 = arith.mulf %948, %916 : vector<8x32xf32>
    %953 = arith.mulf %947, %951 : vector<8x32xf32>
    %954 = arith.addf %952, %953 : vector<8x32xf32>
    %955 = math.tanh %954 : vector<8x32xf32>
    %956 = arith.mulf %949, %955 : vector<8x32xf32>
    %c184 = arith.constant 184 : index
    %c0_218 = arith.constant 0 : index
    %957 = vector.load %arg13[%c184, %c0_218] : memref<192x32xf32, #tpu.memory_space<vmem>>, vector<8x32xf32>
    tpu.vector_store %arg13[%c184, %c0_218], %956 {strides = array<i32>} : memref<192x32xf32, #tpu.memory_space<vmem>>, vector<8x32xf32>,
    %c0_219 = arith.constant 0 : index
    %c0_220 = arith.constant 0 : index
    %958 = vector.load %arg13[%c0_219, %c0_220] : memref<192x32xf32, #tpu.memory_space<vmem>>, vector<192x32xf32>
    %c0_221 = arith.constant 0 : index
    %c0_222 = arith.constant 0 : index
    %959 = vector.load %arg9[%c0_221, %c0_222] : memref<32x16xf32, #tpu.memory_space<vmem>>, vector<32x16xf32>
    %cst_223 = arith.constant dense<0.000000e+00> : vector<192x16xf32>
    %960 = tpu.matmul %958, %959, %cst_223 {dimension_numbers = #tpu.dot_dimension_numbers<[1], [0], [0], [1], [0, 0, 1, 1], [], []>} : vector<192x32xf32>, vector<32x16xf32>, vector<192x16xf32> -> vector<192x16xf32>
    %c0_224 = arith.constant 0 : index
    %c0_225 = arith.constant 0 : index
    %961 = vector.load %arg10[%c0_224, %c0_225] : memref<1x16xf32, #tpu.memory_space<vmem>>, vector<1x16xf32>
    %962 = vector.broadcast %961 : vector<1x16xf32> to vector<192x16xf32>
    %963 = arith.addf %960, %962 : vector<192x16xf32>
    %c0_226 = arith.constant 0 : index
    %c0_227 = arith.constant 0 : index
    %964 = vector.load %arg11[%c0_226, %c0_227] : memref<192x16xf32, #tpu.memory_space<vmem>>, vector<192x16xf32>
    tpu.vector_store %arg11[%c0_226, %c0_227], %963 {strides = array<i32>} : memref<192x16xf32, #tpu.memory_space<vmem>>, vector<192x16xf32>,
    return
  }
}

</mosaic_0001>

<bundles_post_ra>
// kernel: _lambda_.1
= control target key start
LH: loop header
LB: loop body
LE: loop exit
PB: predicated region body
PF: predicated region fallthrough
CT: control target
= control target key end

     0   :  { %vm47_vm0 = vcmask 64512   ;;  %v9098_v0 = vmov 0.0   ;;  %vm9099_vm1 = vmmov 0   ;;  %vm148_vm2 = vcmask 195584   ;;  %s10993_s3 = inlined_call_operand.vmem [shape: f32[8,128], index: 3, kind: input, shape index: {}]   ;;  %s10994_s2 = inlined_call_operand.vmem [shape: f32[24,128], index: 2, kind: input, shape index: {}]   ;;  %s10995_s1 = inlined_call_operand.vmem [shape: f32[8,8], index: 1, kind: input, shape index: {}]   ;;  %s10996_s0 = inlined_call_operand.vmem [shape: f32[192,24], index: 0, kind: input, shape index: {}]   ;;  %s10997_s4 = inlined_call_operand.vmem [shape: f32[1,128], index: 4, kind: input, shape index: {}]   ;;  %s10998_s5 = inlined_call_operand.vmem [shape: f32[32,128], index: 5, kind: input, shape index: {}]   ;;  %s10999_s6 = inlined_call_operand.vmem [shape: f32[32,128], index: 6, kind: input, shape index: {}]   ;;  %s11000_s8 = inlined_call_operand.vmem [shape: f32[1,128], index: 8, kind: input, shape index: {}]   ;;  %s11001_s7 = inlined_call_operand.vmem [shape: f32[32,128], index: 7, kind: input, shape index: {}]   ;;  %s11002_s9 = inlined_call_operand.vmem [shape: f32[32,16], index: 9, kind: input, shape index: {}]   ;;  %s11003_s10 = inlined_call_operand.vmem [shape: f32[1,16], index: 10, kind: input, shape index: {}]   ;;  %s11004_s11 = inlined_call_operand.vmem [shape: f32[192,16], index: 11, kind: output, shape index: {}]  }
   0x1   :  { %7804 = vmatprep.subr.mxu0 %v9098_v0  ;;  %v39_v1 = vld [vmem:[%s10993_s3] sm:$0xff]  ;;  %7806 = vmatprep.mubr.msk.f32.mxu0 %vm9099_vm1, %v9098_v0  ;;  %v147_v2 = vld [vmem:[%s10994_s2 + $0x10] sm:$0xff]  ;;  %v146_v4 = vld [vmem:[%s10994_s2 + $0x8] sm:$0xff]  ;;  %vm502_vm3 = vcmask 261120   ;;  %vm7198_vm4 = vcmask 130048  }
   0x2   :  { %v38_v3 = vld [vmem:[%s10995_s1] sm:$0xff]  ;;  %7805 = vmatpush3.msra.mxu0 %v39_v1  ;;  %8665 = vmatprep.subr.mxu1 %v147_v2  ;;  %v134_v8 = vld [vmem:[%s10996_s0 + $0x68] sm:$0xff]  ;;  %v135_v10 = vld [vmem:[%s10996_s0 + $0x70] sm:$0xff] }
   0x3   :  { %7807 = vmatmul.mubr.msk.f32.vlgmr.msra.gmra.mxu0 %vm47_vm0, %v38_v3  ;;  %7809 = vmatprep.subr.mxu0 %v147_v2  ;;  %v145_v5 = vld [vmem:[%s10994_s2] sm:$0xff]  ;;  %v122_v9 = vld [vmem:[%s10996_s0 + $0x8] sm:$0xff]  ;;  %v123_v11 = vld [vmem:[%s10996_s0 + $0x10] sm:$0xff] }
   0x4   :  { %8668 = vmatpush3.msra.mxu1 %v147_v2  ;;  %7810 = vmatpush3.msra.mxu0 %v147_v2  ;;  %v133_v6 = vld [vmem:[%s10996_s0 + $0x60] sm:$0xff]  ;;  %v136_v12 = vld [vmem:[%s10996_s0 + $0x78] sm:$0xff]  ;;  %v138_v16 = vld [vmem:[%s10996_s0 + $0x88] sm:$0xff] }
   0x5   :  { %8666 = vmatprep.subr.mxu1 %v146_v4  ;;  %7811 = vmatprep.subr.mxu0 %v146_v4  ;;  %v121_v7 = vld [vmem:[%s10996_s0] sm:$0xff]  ;;  %v124_v13 = vld [vmem:[%s10996_s0 + $0x18] sm:$0xff]  ;;  %v126_v17 = vld [vmem:[%s10996_s0 + $0x28] sm:$0xff] }
   0x6   :  { %8669 = vmatpush3.msra.mxu1 %v146_v4  ;;  %7812 = vmatpush3.msra.mxu0 %v146_v4  ;;  %v137_v14 = vld [vmem:[%s10996_s0 + $0x80] sm:$0xff]  ;;  %v139_v18 = vld [vmem:[%s10996_s0 + $0x90] sm:$0xff]  ;;  %v140_v20 = vld [vmem:[%s10996_s0 + $0x98] sm:$0xff] }
   0x7   :  { %8667 = vmatprep.subr.mxu1 %v145_v5  ;;  %7813 = vmatprep.subr.mxu0 %v145_v5  ;;  %v125_v15 = vld [vmem:[%s10996_s0 + $0x20] sm:$0xff]  ;;  %v127_v19 = vld [vmem:[%s10996_s0 + $0x30] sm:$0xff]  ;;  %v128_v21 = vld [vmem:[%s10996_s0 + $0x38] sm:$0xff] }
   0x8   :  { %8670 = vmatpush3.msra.mxu1 %v145_v5  ;;  %7833 = vmatprep.mubr.msk.f32.mxu1 %vm148_vm2, %v133_v6  ;;  %v141_v22 = vld [vmem:[%s10996_s0 + $0xa0] sm:$0xff]  ;;  %v142_v24 = vld [vmem:[%s10996_s0 + $0xa8] sm:$0xff]  ;;  %v143_v26 = vld [vmem:[%s10996_s0 + $0xb0] sm:$0xff] }
   0x9   :  { %7814 = vmatpush3.msra.mxu0 %v145_v5  ;;  %7815 = vmatprep.mubr.msk.f32.mxu0 %vm148_vm2, %v121_v7  ;;  %v129_v23 = vld [vmem:[%s10996_s0 + $0x40] sm:$0xff]  ;;  %v130_v25 = vld [vmem:[%s10996_s0 + $0x48] sm:$0xff]  ;;  %v131_v27 = vld [vmem:[%s10996_s0 + $0x50] sm:$0xff] }
   0xa   :  { %7834 = vmatmul.mubr.msk.f32.vlgmr.msra.gmra.mxu1 %vm148_vm2, %v134_v8  ;;  %7816 = vmatmul.mubr.msk.f32.vlgmr.msra.gmra.mxu0 %vm148_vm2, %v122_v9  ;;  %v144_v28 = vld [vmem:[%s10996_s0 + $0xb8] sm:$0xff]  ;;  %v7227_v32 = vld [vmem:[%s10997_s4] ss:$0 sm:$0xff]  ;;  %s9101_s4 = smov 32  }
   0xb   :  { %7836 = vmatprep.mubr.msk.f32.mxu1 %vm148_vm2, %v135_v10  ;;  %7818 = vmatprep.mubr.msk.f32.mxu0 %vm148_vm2, %v123_v11  ;;  %v132_v29 = vld [vmem:[%s10996_s0 + $0x58] sm:$0xff]  ;;  %s9100_s0 = smov 64  }
   0xc   :  { %7851 = vmatprep.subr.mxu0 %v9098_v0  ;;  %7917 = vmatprep.subr.mxu1 %v9098_v0 }
   0xe   :  { %7837 = vmatmul.mubr.msk.f32.gmra.mxu1 %vm148_vm2, %v136_v12  ;;  %7819 = vmatmul.mubr.msk.f32.gmra.mxu0 %vm148_vm2, %v124_v13 }
   0xf   :  { %7839 = vmatprep.mubr.msk.f32.mxu1 %vm148_vm2, %v137_v14  ;;  %7821 = vmatprep.mubr.msk.f32.mxu0 %vm148_vm2, %v125_v15 }
  0x12   :  { %7840 = vmatmul.mubr.msk.f32.gmra.mxu1 %vm148_vm2, %v138_v16  ;;  %7822 = vmatmul.mubr.msk.f32.gmra.mxu0 %vm148_vm2, %v126_v17 }
  0x13   :  { %7842 = vmatprep.mubr.msk.f32.mxu1 %vm148_vm2, %v139_v18  ;;  %7824 = vmatprep.mubr.msk.f32.mxu0 %vm148_vm2, %v127_v19 }
  0x16   :  { %7843 = vmatmul.mubr.msk.f32.gmra.mxu1 %vm148_vm2, %v140_v20  ;;  %7825 = vmatmul.mubr.msk.f32.gmra.mxu0 %vm148_vm2, %v128_v21 }
  0x17   :  { %7845 = vmatprep.mubr.msk.f32.mxu1 %vm148_vm2, %v141_v22  ;;  %7827 = vmatprep.mubr.msk.f32.mxu0 %vm148_vm2, %v129_v23 }
  0x1a   :  { %7846 = vmatmul.mubr.msk.f32.gmra.mxu1 %vm148_vm2, %v142_v24  ;;  %7828 = vmatmul.mubr.msk.f32.gmra.mxu0 %vm148_vm2, %v130_v25  ;;  %v9359_v25 = vld [vmem:[%s10998_s5 + $0x18] sm:$0xff] }
  0x1b   :  { %7848 = vmatprep.mubr.msk.f32.mxu1 %vm148_vm2, %v143_v26  ;;  %7830 = vmatprep.mubr.msk.f32.mxu0 %vm148_vm2, %v131_v27  ;;  %v9364_v26 = vld [vmem:[%s10998_s5 + $0x10] sm:$0xff]  ;;  %v9372_v27 = vld [vmem:[%s10998_s5 + $0x8] sm:$0xff] }
  0x1c   :  { %7852 = vmatpush3.msra.mxu0 %v9359_v25  ;;  %7918 = vmatpush3.msra.mxu1 %v9359_v25 }
  0x1d   :  { %7853 = vmatprep.subr.mxu0 %v9098_v0  ;;  %7919 = vmatprep.subr.mxu1 %v9098_v0 }
  0x1e   :  { %7849 = vmatmul.mubr.msk.f32.gmra.mxu1 %vm148_vm2, %v144_v28  ;;  %7831 = vmatmul.mubr.msk.f32.gmra.mxu0 %vm148_vm2, %v132_v29  ;;  %v9381_v28 = vld [vmem:[%s10998_s5] sm:$0xff] }
  0x1f   :  { %7859 = vmatprep.mubr.msk.f32.mxu0 %vm9099_vm1, %v9098_v0  ;;  %7925 = vmatprep.mubr.msk.f32.mxu1 %vm9099_vm1, %v9098_v0 }
  0x20   :  { %7854 = vmatpush3.msra.mxu0 %v9364_v26  ;;  %7920 = vmatpush3.msra.mxu1 %v9364_v26 }
  0x21   :  { %7855 = vmatprep.subr.mxu0 %v9098_v0  ;;  %7921 = vmatprep.subr.mxu1 %v9098_v0 }
  0x22   :  { %7856 = vmatpush3.msra.mxu0 %v9372_v27  ;;  %7922 = vmatpush3.msra.mxu1 %v9372_v27 }
  0x23   :  { %7857 = vmatprep.subr.mxu0 %v9098_v0  ;;  %7923 = vmatprep.subr.mxu1 %v9098_v0 }
  0x24   :  { %7858 = vmatpush3.msra.mxu0 %v9381_v28  ;;  %7924 = vmatpush3.msra.mxu1 %v9381_v28 }
  0x25   :  { %7862 = vmatprep.subr.mxu0 %v9098_v0  ;;  %7939 = vmatprep.subr.mxu1 %v9098_v0 }
  0xc3   :  { %v117_v30 = vpop.f32.mrf.mxu0 }
  0xc4   :  { %v9285_v33 = vadd.f32 %v7227_v32, %v117_v30  ;;  %v9397_v32 = vld [vmem:[%s10999_s6 + $0x18] sm:$0xff] }
  0xc5   :  { %v7808_v31 = vpop.f32.mrf.mxu0 }
  0xca   :  { %v7835_v34 = vpop.f32.mrf.mxu1  ;;  %v7817_v35 = vpop.f32.mrf.mxu0 }
  0xcb   :  { %v9288_v36 = vadd.f32 %v7835_v34, %v9285_v33  ;;  %v9291_v37 = vadd.f32 %v7817_v35, %v9285_v33  ;;  %v9403_v35 = vld [vmem:[%s10999_s6 + $0x10] sm:$0xff] }
  0xcc   :  { %v347_v38 = vpop.f32.mrf.mxu1  ;;  %v287_v39 = vpop.f32.mrf.mxu0 }
  0xcd   :  { %v9294_v40 = vadd.f32 %v347_v38, %v9285_v33  ;;  %v406_v41 = vadd.f32 %v287_v39, %v9285_v33  ;;  %v9412_v38 = vld [vmem:[%s10999_s6 + $0x8] sm:$0xff]  ;;  %v9419_v39 = vld [vmem:[%s10999_s6] sm:$0xff] }
  0xce   :  { %v7838_v42 = vpop.f32.mrf.mxu1  ;;  %v7820_v43 = vpop.f32.mrf.mxu0 }
  0xcf   :  { %8675 = vtanh.f32 %v406_v41  ;;  %v9298_v44 = vadd.f32 %v7838_v42, %v9285_v33  ;;  %v9301_v45 = vadd.f32 %v7820_v43, %v9285_v33  ;;  %v7254_v16 = vmul.f32 -1.442695, %v406_v41 }
  0xd0   :  { %v357_v46 = vpop.f32.mrf.mxu1  ;;  %v297_v47 = vpop.f32.mrf.mxu0 }
  0xd1   :  { %v9304_v48 = vadd.f32 %v357_v46, %v9285_v33  ;;  %v9307_v49 = vadd.f32 %v297_v47, %v9285_v33  ;;  %8677 = vpow2.f32 %v7254_v16  ;;  %v9434_v47 = vld [vmem:[%s11000_s8] ss:$0 sm:$0xff] }
  0xd2   :  { %v7841_v50 = vpop.f32.mrf.mxu1  ;;  %v7823_v51 = vpop.f32.mrf.mxu0 }
  0xd3   :  { %v9310_v52 = vadd.f32 %v7841_v50, %v9285_v33  ;;  %v9313_v53 = vadd.f32 %v7823_v51, %v9285_v33 }
  0xd4   :  { %v367_v54 = vpop.f32.mrf.mxu1  ;;  %v307_v55 = vpop.f32.mrf.mxu0 }
  0xd5   :  { %v9316_v56 = vadd.f32 %v367_v54, %v9285_v33  ;;  %v9319_v57 = vadd.f32 %v307_v55, %v9285_v33 }
  0xd6   :  { %v7844_v58 = vpop.f32.mrf.mxu1  ;;  %v7826_v59 = vpop.f32.mrf.mxu0 }
  0xd7   :  { %v9322_v60 = vadd.f32 %v7844_v58, %v9285_v33  ;;  %v9325_v61 = vadd.f32 %v7826_v59, %v9285_v33 }
  0xd8   :  { %v377_v62 = vpop.f32.mrf.mxu1  ;;  %v317_v63 = vpop.f32.mrf.mxu0 }
  0xd9   :  { %v9328_v1 = vadd.f32 %v377_v62, %v9285_v33  ;;  %v9331_v2 = vadd.f32 %v317_v63, %v9285_v33 }
  0xda   :  { %v7847_v3 = vpop.f32.mrf.mxu1  ;;  %v7829_v4 = vpop.f32.mrf.mxu0 }
  0xdb   :  { %v9334_v5 = vadd.f32 %v7847_v3, %v9285_v33  ;;  %v9337_v6 = vadd.f32 %v7829_v4, %v9285_v33 }
  0xdc   :  { %v8676_v7 = vpop.eup %8675  ;;  %v387_v8 = vpop.f32.mrf.mxu1 }
  0xdd   :  { %v327_v9 = vpop.f32.mrf.mxu0  ;;  %v9340_v10 = vadd.f32 %v387_v8, %v9285_v33  ;;  %484 = vrot.lane.b32.xlu0 %v8676_v7, %s9100_s0 }
  0xde   :  { %v9343_v11 = vadd.f32 %v327_v9, %v9285_v33  ;;  %v7850_v12 = vpop.f32.mrf.mxu1  ;;  %v8678_v17 = vpop.eup %8677 }
  0xdf   :  { %v7832_v13 = vpop.f32.mrf.mxu0  ;;  %v9347_v14 = vadd.f32 %v7850_v12, %v9285_v33  ;;  %v478_v18 = vadd.f32 1.0, %v8678_v17 }
  0xe0   :  { %v9350_v15 = vadd.f32 %v7832_v13, %v9285_v33 }
  0xe1   :  { %8679 = vrcp.f32 %v478_v18  ;;  %v9428_v41 = vpop.f32.mrf.mxu0 }
  0xee   :  { %v8680_v19 = vpop.eup %8679 }
  0xef   :  { %v482_v22 = vmul.f32 0.0, %v8680_v19 }
 0x14f   :  { %v485_v20 = vpop.permute.xlu0 %484 }
 0x150   :  { %v487_v21 = vmul.f32 %v8680_v19, %v485_v20 }
 0x152   :  { %489 = vrot.lane.b32.xlu0 %v487_v21, %s9101_s4 }
 0x1c4   :  { %v490_v23 = vpop.permute.xlu0 %489 }
 0x1c5   :  { %v9353_v24 = vadd.f32 %v490_v23, %v482_v22  ;;  %v9451_v23 = vld [vmem:[%s11001_s7 + $0x18] sm:$0xff] }
 0x1c7   :  { %8681 = vtanh.f32 %v9353_v24 }
 0x1d4   :  { %v8682_v29 = vpop.eup %8681 }
 0x1d5   :  { %495 = vrot.lane.b32.xlu1 %v8682_v29, %s9100_s0 }
 0x247   :  { %v496_v30 = vpop.permute.xlu1 %495 }
 0x248   :  { %v498_v31 = vmul.f32 %v8680_v19, %v496_v30  ;;  %v9460_v30 = vld [vmem:[%s11001_s7 + $0x10] sm:$0xff] }
 0x24a   :  { %500 = vrot.lane.b32.xlu1 %v498_v31, %s9101_s4  ;;  %v9465_v31 = vld [vmem:[%s11001_s7 + $0x8] sm:$0xff] }
 0x2bc   :  { %v501_v34 = vpop.permute.xlu1 %500 }
 0x2bd   :  { %7860 = vmatmul.mubr.msk.f32.vlgmr.msra.gmra.mxu0 %vm502_vm3, %v501_v34 }
 0x2be   :  { %7863 = vmatpush3.msra.mxu0 %v9397_v32  ;;  %7870 = vmatprep.mubr.msk.f32.mxu0 %vm9099_vm1, %v9098_v0 }
 0x2bf   :  { %7864 = vmatprep.subr.mxu0 %v9098_v0 }
 0x2c0   :  { %7865 = vmatpush3.msra.mxu0 %v9403_v35 }
 0x2c1   :  { %7866 = vmatprep.subr.mxu0 %v9098_v0 }
 0x2c2   :  { %7867 = vmatpush3.msra.mxu0 %v9412_v38 }
 0x2c3   :  { %7868 = vmatprep.subr.mxu0 %v9098_v0 }
 0x2c4   :  { %7869 = vmatpush3.msra.mxu0 %v9419_v39 }
 0x2c5   :  { %7871 = vmatmul.mubr.msk.f32.vlgmr.msra.gmra.mxu0 %vm502_vm3, %v501_v34  ;;  %7873 = vmatprep.subr.mxu0 %v9098_v0  ;;  %v9472_v34 = vld [vmem:[%s11001_s7] sm:$0xff] }
 0x2c6   :  { %7881 = vmatprep.mubr.msk.f32.mxu0 %vm9099_vm1, %v9098_v0  ;;  %7874 = vmatpush3.msra.mxu0 %v9451_v23 }
 0x2c7   :  { %7875 = vmatprep.subr.mxu0 %v9098_v0 }
 0x2c8   :  { %7876 = vmatpush3.msra.mxu0 %v9460_v30 }
 0x2c9   :  { %7877 = vmatprep.subr.mxu0 %v9098_v0 }
 0x2ca   :  { %7878 = vmatpush3.msra.mxu0 %v9465_v31 }
 0x2cb   :  { %7879 = vmatprep.subr.mxu0 %v9098_v0 }
 0x2cc   :  { %7880 = vmatpush3.msra.mxu0 %v9472_v34 }
 0x2cd   :  { %7884 = vmatprep.subr.mxu0 %v9098_v0 }
 0x37d   :  { %v571_v42 = vpop.f32.mrf.mxu0 }
 0x37e   :  { %v748_v43 = vadd.f32 %v571_v42, %v9291_v37 }
 0x37f   :  { %v7861_v46 = vpop.f32.mrf.mxu0 }
 0x380   :  { %8683 = vtanh.f32 %v748_v43  ;;  %v7259_v59 = vmul.f32 -1.442695, %v748_v43 }
 0x385   :  { %v641_v50 = vpop.f32.mrf.mxu0 }
 0x386   :  { %v642_v51 = vadd.f32 %v9434_v47, %v641_v50 }
 0x387   :  { %v7872_v54 = vpop.f32.mrf.mxu0 }
 0x388   :  { %8685 = vtanh.f32 %v642_v51  ;;  %v7257_v37 = vmul.f32 -1.442695, %v642_v51 }
 0x389   :  { %8687 = vpow2.f32 %v7259_v59 }
 0x38a   :  { %8689 = vpow2.f32 %v7257_v37 }
 0x38d   :  { %v8684_v55 = vpop.eup %8683 }
 0x38e   :  { %758 = vrot.lane.b32.xlu1 %v8684_v55, %s9100_s0 }
 0x395   :  { %v8686_v58 = vpop.eup %8685 }
 0x396   :  { %654 = vrot.lane.b32.xlu0 %v8686_v58, %s9100_s0  ;;  %v8688_v62 = vpop.eup %8687 }
 0x397   :  { %v752_v63 = vadd.f32 1.0, %v8688_v62  ;;  %v8690_v3 = vpop.eup %8689 }
 0x398   :  { %v648_v4 = vadd.f32 1.0, %v8690_v3 }
 0x399   :  { %8691 = vrcp.f32 %v752_v63 }
 0x39a   :  { %8693 = vrcp.f32 %v648_v4 }
 0x3a6   :  { %v8692_v7 = vpop.eup %8691 }
 0x3a7   :  { %v8694_v12 = vpop.eup %8693  ;;  %v756_v17 = vmul.f32 %v8692_v7, %v9353_v24 }
 0x3a8   :  { %v652_v20 = vmul.f32 0.0, %v8694_v12 }
 0x400   :  { %v759_v8 = vpop.permute.xlu1 %758 }
 0x401   :  { %v761_v9 = vmul.f32 %v8692_v7, %v759_v8 }
 0x403   :  { %763 = vrot.lane.b32.xlu1 %v761_v9, %s9101_s4 }
 0x408   :  { %v655_v13 = vpop.permute.xlu0 %654 }
 0x409   :  { %v657_v16 = vmul.f32 %v8694_v12, %v655_v13 }
 0x40b   :  { %659 = vrot.lane.b32.xlu0 %v657_v16, %s9101_s4 }
 0x475   :  { %v764_v18 = vpop.permute.xlu1 %763 }
 0x476   :  { %v9442_v19 = vadd.f32 %v764_v18, %v756_v17 }
 0x478   :  { %8695 = vtanh.f32 %v9442_v19 }
 0x47d   :  { %v660_v21 = vpop.permute.xlu0 %659 }
 0x47e   :  { %v9445_v22 = vadd.f32 %v660_v21, %v652_v20 }
 0x480   :  { %8697 = vtanh.f32 %v9445_v22 }
 0x485   :  { %v8696_v29 = vpop.eup %8695 }
 0x486   :  { %769 = vrot.lane.b32.xlu1 %v8696_v29, %s9100_s0 }
 0x48d   :  { %v8698_v24 = vpop.eup %8697 }
 0x48e   :  { %665 = vrot.lane.b32.xlu0 %v8698_v24, %s9100_s0 }
 0x4f8   :  { %v770_v42 = vpop.permute.xlu1 %769 }
 0x4f9   :  { %v772_v43 = vmul.f32 %v8692_v7, %v770_v42 }
 0x4fb   :  { %774 = vrot.lane.b32.xlu1 %v772_v43, %s9101_s4 }
 0x500   :  { %v666_v46 = vpop.permute.xlu0 %665 }
 0x501   :  { %v668_v50 = vmul.f32 %v8694_v12, %v666_v46 }
 0x503   :  { %670 = vrot.lane.b32.xlu0 %v668_v50, %s9101_s4 }
 0x56d   :  { %v775_v54 = vpop.permute.xlu1 %774 }
 0x575   :  { %v671_v51 = vpop.permute.xlu0 %670 }
 0x576   :  { %745 = vst.msk [vmem:[#allocation3] sm:$0xff] %vm502_vm3, %v671_v51  ;;  %7882 = vmatmul.mubr.msk.f32.vlgmr.msra.gmra.mxu0 %vm502_vm3, %v671_v51 }
 0x577   :  { %7885 = vmatpush3.msra.mxu0 %v9359_v25  ;;  %7892 = vmatprep.mubr.msk.f32.mxu0 %vm9099_vm1, %v9098_v0 }
 0x578   :  { %7886 = vmatprep.subr.mxu0 %v9098_v0 }
 0x579   :  { %7887 = vmatpush3.msra.mxu0 %v9364_v26 }
 0x57a   :  { %7888 = vmatprep.subr.mxu0 %v9098_v0 }
 0x57b   :  { %7889 = vmatpush3.msra.mxu0 %v9372_v27 }
 0x57c   :  { %7890 = vmatprep.subr.mxu0 %v9098_v0 }
 0x57d   :  { %7891 = vmatpush3.msra.mxu0 %v9381_v28 }
 0x57e   :  { %7893 = vmatmul.mubr.msk.f32.vlgmr.msra.gmra.mxu0 %vm502_vm3, %v775_v54  ;;  %7895 = vmatprep.subr.mxu0 %v9098_v0 }
 0x57f   :  { %7896 = vmatpush3.msra.mxu0 %v9397_v32  ;;  %7903 = vmatprep.mubr.msk.f32.mxu0 %vm9099_vm1, %v9098_v0 }
 0x580   :  { %7897 = vmatprep.subr.mxu0 %v9098_v0 }
 0x581   :  { %7898 = vmatpush3.msra.mxu0 %v9403_v35 }
 0x582   :  { %7899 = vmatprep.subr.mxu0 %v9098_v0 }
 0x583   :  { %7900 = vmatpush3.msra.mxu0 %v9412_v38 }
 0x584   :  { %7901 = vmatprep.subr.mxu0 %v9098_v0 }
 0x585   :  { %7902 = vmatpush3.msra.mxu0 %v9419_v39 }
 0x586   :  { %7904 = vmatmul.mubr.msk.f32.vlgmr.msra.gmra.mxu0 %vm502_vm3, %v775_v54  ;;  %7906 = vmatprep.subr.mxu0 %v9098_v0 }
 0x587   :  { %7907 = vmatpush3.msra.mxu0 %v9451_v23  ;;  %7914 = vmatprep.mubr.msk.f32.mxu0 %vm9099_vm1, %v9098_v0 }
 0x588   :  { %7908 = vmatprep.subr.mxu0 %v9098_v0 }
 0x589   :  { %7909 = vmatpush3.msra.mxu0 %v9460_v30 }
 0x58a   :  { %7910 = vmatprep.subr.mxu0 %v9098_v0 }
 0x58b   :  { %7911 = vmatpush3.msra.mxu0 %v9465_v31 }
 0x58c   :  { %7912 = vmatprep.subr.mxu0 %v9098_v0 }
 0x58d   :  { %7913 = vmatpush3.msra.mxu0 %v9472_v34 }
 0x58e   :  { %7928 = vmatprep.subr.mxu0 %v9098_v0 }
 0x636   :  { %v740_v55 = vpop.f32.mrf.mxu0 }
 0x638   :  { %v7883_v58 = vpop.f32.mrf.mxu0 }
 0x63e   :  { %v844_v59 = vpop.f32.mrf.mxu0 }
 0x63f   :  { %v1022_v37 = vadd.f32 %v844_v59, %v9307_v49 }
 0x640   :  { %v7894_v62 = vpop.f32.mrf.mxu0 }
 0x641   :  { %8699 = vtanh.f32 %v1022_v37  ;;  %v7264_v12 = vmul.f32 -1.442695, %v1022_v37 }
 0x646   :  { %v914_v63 = vpop.f32.mrf.mxu0 }
 0x647   :  { %v915_v3 = vadd.f32 %v914_v63, %v740_v55 }
 0x648   :  { %v7905_v4 = vpop.f32.mrf.mxu0 }
 0x649   :  { %v918_v7 = vadd.f32 %v9434_v47, %v915_v3 }
 0x64b   :  { %8701 = vtanh.f32 %v918_v7  ;;  %v7262_v13 = vmul.f32 -1.442695, %v918_v7  ;;  %v9566_v7 = vpop.f32.mrf.mxu1 }
 0x64c   :  { %8703 = vpow2.f32 %v7264_v12 }
 0x64d   :  { %8705 = vpow2.f32 %v7262_v13 }
 0x64e   :  { %v8700_v8 = vpop.eup %8699 }
 0x64f   :  { %1032 = vrot.lane.b32.xlu1 %v8700_v8, %s9100_s0 }
 0x658   :  { %v8702_v9 = vpop.eup %8701 }
 0x659   :  { %928 = vrot.lane.b32.xlu0 %v8702_v9, %s9100_s0  ;;  %v8704_v16 = vpop.eup %8703 }
 0x65a   :  { %v1026_v49 = vadd.f32 1.0, %v8704_v16  ;;  %v8706_v17 = vpop.eup %8705 }
 0x65b   :  { %v922_v18 = vadd.f32 1.0, %v8706_v17 }
 0x65c   :  { %8707 = vrcp.f32 %v1026_v49 }
 0x65d   :  { %8709 = vrcp.f32 %v922_v18 }
 0x669   :  { %v8708_v20 = vpop.eup %8707 }
 0x66a   :  { %v8710_v24 = vpop.eup %8709  ;;  %v1030_v46 = vmul.f32 %v8708_v20, %v9442_v19 }
 0x66b   :  { %v926_v54 = vmul.f32 %v8710_v24, %v9445_v22 }
 0x6c1   :  { %v1033_v21 = vpop.permute.xlu1 %1032 }
 0x6c2   :  { %v1035_v29 = vmul.f32 %v8708_v20, %v1033_v21 }
 0x6c4   :  { %1037 = vrot.lane.b32.xlu1 %v1035_v29, %s9101_s4 }
 0x6cb   :  { %v929_v42 = vpop.permute.xlu0 %928 }
 0x6cc   :  { %v931_v43 = vmul.f32 %v8710_v24, %v929_v42 }
 0x6ce   :  { %933 = vrot.lane.b32.xlu0 %v931_v43, %s9101_s4 }
 0x736   :  { %v1038_v50 = vpop.permute.xlu1 %1037 }
 0x737   :  { %v9521_v51 = vadd.f32 %v1038_v50, %v1030_v46 }
 0x739   :  { %8711 = vtanh.f32 %v9521_v51 }
 0x740   :  { %v934_v55 = vpop.permute.xlu0 %933 }
 0x741   :  { %v9525_v58 = vadd.f32 %v934_v55, %v926_v54 }
 0x743   :  { %8713 = vtanh.f32 %v9525_v58 }
 0x746   :  { %v8712_v59 = vpop.eup %8711 }
 0x747   :  { %1043 = vrot.lane.b32.xlu1 %v8712_v59, %s9100_s0 }
 0x750   :  { %v8714_v37 = vpop.eup %8713 }
 0x751   :  { %939 = vrot.lane.b32.xlu0 %v8714_v37, %s9100_s0 }
 0x7b9   :  { %v1044_v62 = vpop.permute.xlu1 %1043 }
 0x7ba   :  { %v1046_v19 = vmul.f32 %v8708_v20, %v1044_v62 }
 0x7bc   :  { %1048 = vrot.lane.b32.xlu1 %v1046_v19, %s9101_s4 }
 0x7c3   :  { %v940_v63 = vpop.permute.xlu0 %939 }
 0x7c4   :  { %v942_v3 = vmul.f32 %v8710_v24, %v940_v63 }
 0x7c6   :  { %944 = vrot.lane.b32.xlu0 %v942_v3, %s9101_s4 }
 0x82e   :  { %v1049_v22 = vpop.permute.xlu1 %1048 }
 0x82f   :  { %7926 = vmatmul.mubr.msk.f32.vlgmr.msra.gmra.mxu1 %vm502_vm3, %v1049_v22 }
 0x830   :  { %7940 = vmatpush3.msra.mxu1 %v9451_v23  ;;  %7947 = vmatprep.mubr.msk.f32.mxu1 %vm9099_vm1, %v9098_v0 }
 0x831   :  { %7941 = vmatprep.subr.mxu1 %v9098_v0 }
 0x832   :  { %7942 = vmatpush3.msra.mxu1 %v9460_v30 }
 0x833   :  { %7943 = vmatprep.subr.mxu1 %v9098_v0 }
 0x834   :  { %7944 = vmatpush3.msra.mxu1 %v9465_v31 }
 0x835   :  { %7945 = vmatprep.subr.mxu1 %v9098_v0 }
 0x836   :  { %7946 = vmatpush3.msra.mxu1 %v9472_v34 }
 0x837   :  { %7961 = vmatprep.subr.mxu1 %v9098_v0 }
 0x838   :  { %v945_v4 = vpop.permute.xlu0 %944 }
 0x839   :  { %1019 = vst.msk [vmem:[#allocation3 + $0x8] sm:$0xff] %vm502_vm3, %v945_v4  ;;  %7915 = vmatmul.mubr.msk.f32.vlgmr.msra.gmra.mxu0 %vm502_vm3, %v945_v4 }
 0x83a   :  { %7929 = vmatpush3.msra.mxu0 %v9397_v32  ;;  %7936 = vmatprep.mubr.msk.f32.mxu0 %vm9099_vm1, %v9098_v0 }
 0x83b   :  { %7930 = vmatprep.subr.mxu0 %v9098_v0 }
 0x83c   :  { %7931 = vmatpush3.msra.mxu0 %v9403_v35 }
 0x83d   :  { %7932 = vmatprep.subr.mxu0 %v9098_v0 }
 0x83e   :  { %7933 = vmatpush3.msra.mxu0 %v9412_v38 }
 0x83f   :  { %7934 = vmatprep.subr.mxu0 %v9098_v0 }
 0x840   :  { %7935 = vmatpush3.msra.mxu0 %v9419_v39 }
 0x841   :  { %7937 = vmatmul.mubr.msk.f32.vlgmr.msra.gmra.mxu0 %vm502_vm3, %v1049_v22  ;;  %7950 = vmatprep.subr.mxu0 %v9098_v0 }
 0x842   :  { %7951 = vmatpush3.msra.mxu0 %v9359_v25  ;;  %7958 = vmatprep.mubr.msk.f32.mxu0 %vm9099_vm1, %v9098_v0 }
 0x843   :  { %7952 = vmatprep.subr.mxu0 %v9098_v0 }
 0x844   :  { %7953 = vmatpush3.msra.mxu0 %v9364_v26 }
 0x845   :  { %7954 = vmatprep.subr.mxu0 %v9098_v0 }
 0x846   :  { %7955 = vmatpush3.msra.mxu0 %v9372_v27 }
 0x847   :  { %7956 = vmatprep.subr.mxu0 %v9098_v0 }
 0x848   :  { %7957 = vmatpush3.msra.mxu0 %v9381_v28 }
 0x849   :  { %7972 = vmatprep.subr.mxu0 %v9098_v0 }
 0x8ef   :  { %v1118_v8 = vpop.f32.mrf.mxu1 }
 0x8f0   :  { %v1296_v9 = vadd.f32 %v1118_v8, %v9301_v45 }
 0x8f1   :  { %v7927_v12 = vpop.f32.mrf.mxu1 }
 0x8f2   :  { %8715 = vtanh.f32 %v1296_v9  ;;  %v7269_v24 = vmul.f32 -1.442695, %v1296_v9 }
 0x8f9   :  { %v1014_v13 = vpop.f32.mrf.mxu0 }
 0x8fb   :  { %v7916_v16 = vpop.f32.mrf.mxu0 }
 0x8ff   :  { %v8716_v49 = vpop.eup %8715 }
 0x900   :  { %1306 = vrot.lane.b32.xlu1 %v8716_v49, %s9100_s0 }
 0x901   :  { %v1188_v17 = vpop.f32.mrf.mxu0 }
 0x902   :  { %v1189_v18 = vadd.f32 %v1188_v17, %v1014_v13 }
 0x903   :  { %v7938_v20 = vpop.f32.mrf.mxu0 }
 0x904   :  { %v1192_v21 = vadd.f32 %v9434_v47, %v1189_v18 }
 0x906   :  { %8717 = vtanh.f32 %v1192_v21  ;;  %v7267_v43 = vmul.f32 -1.442695, %v1192_v21 }
 0x907   :  { %8719 = vpow2.f32 %v7269_v24 }
 0x913   :  { %v8718_v29 = vpop.eup %8717 }
 0x914   :  { %1202 = vrot.lane.b32.xlu0 %v8718_v29, %s9100_s0  ;;  %v8720_v42 = vpop.eup %8719 }
 0x915   :  { %v1300_v45 = vadd.f32 1.0, %v8720_v42 }
 0x917   :  { %8721 = vrcp.f32 %v1300_v45 }
 0x918   :  { %8723 = vpow2.f32 %v7267_v43 }
 0x924   :  { %v8722_v46 = vpop.eup %8721 }
 0x925   :  { %v8724_v50 = vpop.eup %8723  ;;  %v1304_v63 = vmul.f32 %v8722_v46, %v9521_v51 }
 0x926   :  { %v1196_v59 = vadd.f32 1.0, %v8724_v50 }
 0x928   :  { %8725 = vrcp.f32 %v1196_v59 }
 0x935   :  { %v8726_v37 = vpop.eup %8725 }
 0x936   :  { %v1200_v8 = vmul.f32 %v8726_v37, %v9525_v58 }
 0x972   :  { %v1307_v54 = vpop.permute.xlu1 %1306 }
 0x973   :  { %v1309_v55 = vmul.f32 %v8722_v46, %v1307_v54 }
 0x975   :  { %1311 = vrot.lane.b32.xlu1 %v1309_v55, %s9101_s4 }
 0x986   :  { %v1203_v62 = vpop.permute.xlu0 %1202 }
 0x987   :  { %v1205_v19 = vmul.f32 %v8726_v37, %v1203_v62 }
 0x989   :  { %1207 = vrot.lane.b32.xlu0 %v1205_v19, %s9101_s4 }
 0x9e7   :  { %v1312_v3 = vpop.permute.xlu1 %1311 }
 0x9e8   :  { %v9575_v22 = vadd.f32 %v1312_v3, %v1304_v63 }
 0x9ea   :  { %8727 = vtanh.f32 %v9575_v22 }
 0x9f7   :  { %v8728_v4 = vpop.eup %8727 }
 0x9f8   :  { %1317 = vrot.lane.b32.xlu1 %v8728_v4, %s9100_s0 }
 0x9fb   :  { %v1208_v9 = vpop.permute.xlu0 %1207 }
 0x9fc   :  { %v9580_v12 = vadd.f32 %v1208_v9, %v1200_v8 }
 0x9fe   :  { %8729 = vtanh.f32 %v9580_v12 }
 0xa0b   :  { %v8730_v13 = vpop.eup %8729 }
 0xa0c   :  { %1213 = vrot.lane.b32.xlu0 %v8730_v13, %s9100_s0 }
 0xa6a   :  { %v1318_v16 = vpop.permute.xlu1 %1317 }
 0xa6b   :  { %v1320_v51 = vmul.f32 %v8722_v46, %v1318_v16 }
 0xa6d   :  { %1322 = vrot.lane.b32.xlu1 %v1320_v51, %s9101_s4 }
 0xa7e   :  { %v1214_v49 = vpop.permute.xlu0 %1213 }
 0xa7f   :  { %v1216_v17 = vmul.f32 %v8726_v37, %v1214_v49 }
 0xa81   :  { %1218 = vrot.lane.b32.xlu0 %v1216_v17, %s9101_s4 }
 0xadf   :  { %v1323_v18 = vpop.permute.xlu1 %1322 }
 0xae0   :  { %7959 = vmatmul.mubr.msk.f32.vlgmr.msra.gmra.mxu0 %vm502_vm3, %v1323_v18 }
 0xae1   :  { %7973 = vmatpush3.msra.mxu0 %v9451_v23  ;;  %7980 = vmatprep.mubr.msk.f32.mxu0 %vm9099_vm1, %v9098_v0 }
 0xae2   :  { %7974 = vmatprep.subr.mxu0 %v9098_v0 }
 0xae3   :  { %7975 = vmatpush3.msra.mxu0 %v9460_v30 }
 0xae4   :  { %7976 = vmatprep.subr.mxu0 %v9098_v0 }
 0xae5   :  { %7977 = vmatpush3.msra.mxu0 %v9465_v31 }
 0xae6   :  { %7978 = vmatprep.subr.mxu0 %v9098_v0 }
 0xae7   :  { %7979 = vmatpush3.msra.mxu0 %v9472_v34 }
 0xae8   :  { %7994 = vmatprep.subr.mxu0 %v9098_v0 }
 0xaf3   :  { %v1219_v58 = vpop.permute.xlu0 %1218 }
 0xaf4   :  { %1293 = vst.msk [vmem:[#allocation3 + $0x10] sm:$0xff] %vm502_vm3, %v1219_v58  ;;  %7948 = vmatmul.mubr.msk.f32.vlgmr.msra.gmra.mxu1 %vm502_vm3, %v1219_v58 }
 0xaf5   :  { %7962 = vmatpush3.msra.mxu1 %v9397_v32  ;;  %7969 = vmatprep.mubr.msk.f32.mxu1 %vm9099_vm1, %v9098_v0 }
 0xaf6   :  { %7963 = vmatprep.subr.mxu1 %v9098_v0 }
 0xaf7   :  { %7964 = vmatpush3.msra.mxu1 %v9403_v35 }
 0xaf8   :  { %7965 = vmatprep.subr.mxu1 %v9098_v0 }
 0xaf9   :  { %7966 = vmatpush3.msra.mxu1 %v9412_v38 }
 0xafa   :  { %7967 = vmatprep.subr.mxu1 %v9098_v0 }
 0xafb   :  { %7968 = vmatpush3.msra.mxu1 %v9419_v39 }
 0xafc   :  { %7970 = vmatmul.mubr.msk.f32.vlgmr.msra.gmra.mxu1 %vm502_vm3, %v1323_v18  ;;  %7983 = vmatprep.subr.mxu1 %v9098_v0 }
 0xafd   :  { %7984 = vmatpush3.msra.mxu1 %v9359_v25  ;;  %7991 = vmatprep.mubr.msk.f32.mxu1 %vm9099_vm1, %v9098_v0 }
 0xafe   :  { %7985 = vmatprep.subr.mxu1 %v9098_v0 }
 0xaff   :  { %7986 = vmatpush3.msra.mxu1 %v9364_v26 }
 0xb00   :  { %7987 = vmatprep.subr.mxu1 %v9098_v0 }
 0xb01   :  { %7988 = vmatpush3.msra.mxu1 %v9372_v27 }
 0xb02   :  { %7989 = vmatprep.subr.mxu1 %v9098_v0 }
 0xb03   :  { %7990 = vmatpush3.msra.mxu1 %v9381_v28 }
 0xb04   :  { %8005 = vmatprep.subr.mxu1 %v9098_v0 }
 0xba0   :  { %v1392_v20 = vpop.f32.mrf.mxu0 }
 0xba1   :  { %v1570_v21 = vadd.f32 %v1392_v20, %v9319_v57 }
 0xba2   :  { %v7960_v29 = vpop.f32.mrf.mxu0 }
 0xba3   :  { %8731 = vtanh.f32 %v1570_v21  ;;  %v7274_v59 = vmul.f32 -1.442695, %v1570_v21 }
 0xbb0   :  { %v8732_v24 = vpop.eup %8731 }
 0xbb1   :  { %1580 = vrot.lane.b32.xlu1 %v8732_v24, %s9100_s0 }
 0xbb4   :  { %v1288_v42 = vpop.f32.mrf.mxu1 }
 0xbb6   :  { %v7949_v45 = vpop.f32.mrf.mxu1 }
 0xbbc   :  { %v1462_v43 = vpop.f32.mrf.mxu1 }
 0xbbd   :  { %v1463_v46 = vadd.f32 %v1462_v43, %v1288_v42 }
 0xbbe   :  { %v7971_v50 = vpop.f32.mrf.mxu1 }
 0xbbf   :  { %v1466_v54 = vadd.f32 %v9434_v47, %v1463_v46 }
 0xbc1   :  { %8733 = vtanh.f32 %v1466_v54  ;;  %v7272_v62 = vmul.f32 -1.442695, %v1466_v54 }
 0xbc2   :  { %8735 = vpow2.f32 %v7274_v59 }
 0xbce   :  { %v8734_v55 = vpop.eup %8733 }
 0xbcf   :  { %1476 = vrot.lane.b32.xlu0 %v8734_v55, %s9100_s0  ;;  %v8736_v37 = vpop.eup %8735 }
 0xbd0   :  { %v1574_v57 = vadd.f32 1.0, %v8736_v37 }
 0xbd2   :  { %8737 = vrcp.f32 %v1574_v57 }
 0xbd3   :  { %8739 = vpow2.f32 %v7272_v62 }
 0xbdf   :  { %v8738_v19 = vpop.eup %8737 }
 0xbe0   :  { %v8740_v4 = vpop.eup %8739  ;;  %v1578_v51 = vmul.f32 %v8738_v19, %v9575_v22 }
 0xbe1   :  { %v1470_v8 = vadd.f32 1.0, %v8740_v4 }
 0xbe3   :  { %8741 = vrcp.f32 %v1470_v8 }
 0xbf0   :  { %v8742_v9 = vpop.eup %8741 }
 0xbf1   :  { %v1474_v58 = vmul.f32 %v8742_v9, %v9580_v12 }
 0xc23   :  { %v1581_v63 = vpop.permute.xlu1 %1580 }
 0xc24   :  { %v1583_v3 = vmul.f32 %v8738_v19, %v1581_v63 }
 0xc26   :  { %1585 = vrot.lane.b32.xlu1 %v1583_v3, %s9101_s4 }
 0xc41   :  { %v1477_v13 = vpop.permute.xlu0 %1476 }
 0xc42   :  { %v1479_v16 = vmul.f32 %v8742_v9, %v1477_v13 }
 0xc44   :  { %1481 = vrot.lane.b32.xlu0 %v1479_v16, %s9101_s4 }
 0xc98   :  { %v1586_v49 = vpop.permute.xlu1 %1585 }
 0xc99   :  { %v9627_v17 = vadd.f32 %v1586_v49, %v1578_v51 }
 0xc9b   :  { %8743 = vtanh.f32 %v9627_v17 }
 0xca8   :  { %v8744_v18 = vpop.eup %8743 }
 0xca9   :  { %1591 = vrot.lane.b32.xlu1 %v8744_v18, %s9100_s0 }
 0xcb6   :  { %v1482_v20 = vpop.permute.xlu0 %1481 }
 0xcb7   :  { %v9632_v21 = vadd.f32 %v1482_v20, %v1474_v58 }
 0xcb9   :  { %8745 = vtanh.f32 %v9632_v21 }
 0xcc6   :  { %v8746_v29 = vpop.eup %8745 }
 0xcc7   :  { %1487 = vrot.lane.b32.xlu0 %v8746_v29, %s9100_s0 }
 0xd1b   :  { %v1592_v24 = vpop.permute.xlu1 %1591 }
 0xd1c   :  { %v1594_v22 = vmul.f32 %v8738_v19, %v1592_v24 }
 0xd1e   :  { %1596 = vrot.lane.b32.xlu1 %v1594_v22, %s9101_s4 }
 0xd39   :  { %v1488_v42 = vpop.permute.xlu0 %1487 }
 0xd3a   :  { %v1490_v45 = vmul.f32 %v8742_v9, %v1488_v42 }
 0xd3c   :  { %1492 = vrot.lane.b32.xlu0 %v1490_v45, %s9101_s4 }
 0xd90   :  { %v1597_v43 = vpop.permute.xlu1 %1596 }
 0xd91   :  { %7992 = vmatmul.mubr.msk.f32.vlgmr.msra.gmra.mxu1 %vm502_vm3, %v1597_v43 }
 0xd92   :  { %8006 = vmatpush3.msra.mxu1 %v9451_v23  ;;  %8013 = vmatprep.mubr.msk.f32.mxu1 %vm9099_vm1, %v9098_v0 }
 0xd93   :  { %8007 = vmatprep.subr.mxu1 %v9098_v0 }
 0xd94   :  { %8008 = vmatpush3.msra.mxu1 %v9460_v30 }
 0xd95   :  { %8009 = vmatprep.subr.mxu1 %v9098_v0 }
 0xd96   :  { %8010 = vmatpush3.msra.mxu1 %v9465_v31 }
 0xd97   :  { %8011 = vmatprep.subr.mxu1 %v9098_v0 }
 0xd98   :  { %8012 = vmatpush3.msra.mxu1 %v9472_v34 }
 0xd99   :  { %8027 = vmatprep.subr.mxu1 %v9098_v0 }
 0xdae   :  { %v1493_v12 = vpop.permute.xlu0 %1492 }
 0xdaf   :  { %1567 = vst.msk [vmem:[#allocation3 + $0x18] sm:$0xff] %vm502_vm3, %v1493_v12  ;;  %7981 = vmatmul.mubr.msk.f32.vlgmr.msra.gmra.mxu0 %vm502_vm3, %v1493_v12 }
 0xdb0   :  { %7995 = vmatpush3.msra.mxu0 %v9397_v32  ;;  %8002 = vmatprep.mubr.msk.f32.mxu0 %vm9099_vm1, %v9098_v0 }
 0xdb1   :  { %7996 = vmatprep.subr.mxu0 %v9098_v0 }
 0xdb2   :  { %7997 = vmatpush3.msra.mxu0 %v9403_v35 }
 0xdb3   :  { %7998 = vmatprep.subr.mxu0 %v9098_v0 }
 0xdb4   :  { %7999 = vmatpush3.msra.mxu0 %v9412_v38 }
 0xdb5   :  { %8000 = vmatprep.subr.mxu0 %v9098_v0 }
 0xdb6   :  { %8001 = vmatpush3.msra.mxu0 %v9419_v39 }
 0xdb7   :  { %8003 = vmatmul.mubr.msk.f32.vlgmr.msra.gmra.mxu0 %vm502_vm3, %v1597_v43  ;;  %8016 = vmatprep.subr.mxu0 %v9098_v0 }
 0xdb8   :  { %8017 = vmatpush3.msra.mxu0 %v9359_v25  ;;  %8024 = vmatprep.mubr.msk.f32.mxu0 %vm9099_vm1, %v9098_v0 }
 0xdb9   :  { %8018 = vmatprep.subr.mxu0 %v9098_v0 }
 0xdba   :  { %8019 = vmatpush3.msra.mxu0 %v9364_v26 }
 0xdbb   :  { %8020 = vmatprep.subr.mxu0 %v9098_v0 }
 0xdbc   :  { %8021 = vmatpush3.msra.mxu0 %v9372_v27 }
 0xdbd   :  { %8022 = vmatprep.subr.mxu0 %v9098_v0 }
 0xdbe   :  { %8023 = vmatpush3.msra.mxu0 %v9381_v28 }
 0xdbf   :  { %8038 = vmatprep.subr.mxu0 %v9098_v0 }
 0xe51   :  { %v1666_v46 = vpop.f32.mrf.mxu1 }
 0xe52   :  { %v1844_v50 = vadd.f32 %v1666_v46, %v9313_v53 }
 0xe53   :  { %v7993_v54 = vpop.f32.mrf.mxu1 }
 0xe54   :  { %8747 = vtanh.f32 %v1844_v50  ;;  %v7279_v4 = vmul.f32 -1.442695, %v1844_v50 }
 0xe61   :  { %v8748_v55 = vpop.eup %8747 }
 0xe62   :  { %1854 = vrot.lane.b32.xlu1 %v8748_v55, %s9100_s0 }
 0xe6f   :  { %v1562_v59 = vpop.f32.mrf.mxu0 }
 0xe71   :  { %v7982_v37 = vpop.f32.mrf.mxu0 }
 0xe77   :  { %v1736_v57 = vpop.f32.mrf.mxu0 }
 0xe78   :  { %v1737_v62 = vadd.f32 %v1736_v57, %v1562_v59 }
 0xe79   :  { %v8004_v19 = vpop.f32.mrf.mxu0 }
 0xe7a   :  { %v1740_v63 = vadd.f32 %v9434_v47, %v1737_v62 }
 0xe7c   :  { %8749 = vtanh.f32 %v1740_v63  ;;  %v7277_v51 = vmul.f32 -1.442695, %v1740_v63 }
 0xe7d   :  { %8751 = vpow2.f32 %v7279_v4 }
 0xe89   :  { %v8750_v3 = vpop.eup %8749 }
 0xe8a   :  { %1750 = vrot.lane.b32.xlu0 %v8750_v3, %s9100_s0  ;;  %v8752_v8 = vpop.eup %8751 }
 0xe8b   :  { %v1848_v53 = vadd.f32 1.0, %v8752_v8 }
 0xe8d   :  { %8753 = vrcp.f32 %v1848_v53 }
 0xe8e   :  { %8755 = vpow2.f32 %v7277_v51 }
 0xe9a   :  { %v8754_v9 = vpop.eup %8753 }
 0xe9b   :  { %v8756_v49 = vpop.eup %8755  ;;  %v1852_v24 = vmul.f32 %v8754_v9, %v9627_v17 }
 0xe9c   :  { %v1744_v18 = vadd.f32 1.0, %v8756_v49 }
 0xe9e   :  { %8757 = vrcp.f32 %v1744_v18 }
 0xeab   :  { %v8758_v58 = vpop.eup %8757 }
 0xeac   :  { %v1748_v43 = vmul.f32 %v8758_v58, %v9632_v21 }
 0xed4   :  { %v1855_v13 = vpop.permute.xlu1 %1854 }
 0xed5   :  { %v1857_v16 = vmul.f32 %v8754_v9, %v1855_v13 }
 0xed7   :  { %1859 = vrot.lane.b32.xlu1 %v1857_v16, %s9101_s4 }
 0xefc   :  { %v1751_v20 = vpop.permute.xlu0 %1750 }
 0xefd   :  { %v1753_v29 = vmul.f32 %v8758_v58, %v1751_v20 }
 0xeff   :  { %1755 = vrot.lane.b32.xlu0 %v1753_v29, %s9101_s4 }
 0xf49   :  { %v1860_v22 = vpop.permute.xlu1 %1859 }
 0xf4a   :  { %v9679_v42 = vadd.f32 %v1860_v22, %v1852_v24 }
 0xf4c   :  { %8759 = vtanh.f32 %v9679_v42 }
 0xf59   :  { %v8760_v45 = vpop.eup %8759 }
 0xf5a   :  { %1865 = vrot.lane.b32.xlu1 %v8760_v45, %s9100_s0 }
 0xf71   :  { %v1756_v12 = vpop.permute.xlu0 %1755 }
 0xf72   :  { %v9684_v46 = vadd.f32 %v1756_v12, %v1748_v43 }
 0xf74   :  { %8761 = vtanh.f32 %v9684_v46 }
 0xf81   :  { %v8762_v50 = vpop.eup %8761 }
 0xf82   :  { %1761 = vrot.lane.b32.xlu0 %v8762_v50, %s9100_s0 }
 0xfcc   :  { %v1866_v54 = vpop.permute.xlu1 %1865 }
 0xfcd   :  { %v1868_v17 = vmul.f32 %v8754_v9, %v1866_v54 }
 0xfcf   :  { %1870 = vrot.lane.b32.xlu1 %v1868_v17, %s9101_s4 }
 0xff4   :  { %v1762_v55 = vpop.permute.xlu0 %1761 }
 0xff5   :  { %v1764_v59 = vmul.f32 %v8758_v58, %v1762_v55  ;;  %v9789_v55 = vld [vmem:[%s10998_s5 + $0x18] sm:$0xff] }
 0xff7   :  { %1766 = vrot.lane.b32.xlu0 %v1764_v59, %s9101_s4  ;;  %v9798_v59 = vld [vmem:[%s10998_s5 + $0x10] sm:$0xff] }
0x1041   :  { %v1871_v37 = vpop.permute.xlu1 %1870 }
0x1042   :  { %8025 = vmatmul.mubr.msk.f32.vlgmr.msra.gmra.mxu0 %vm502_vm3, %v1871_v37 }
0x1043   :  { %8039 = vmatpush3.msra.mxu0 %v9451_v23  ;;  %8046 = vmatprep.mubr.msk.f32.mxu0 %vm9099_vm1, %v9098_v0 }
0x1044   :  { %8040 = vmatprep.subr.mxu0 %v9098_v0 }
0x1045   :  { %8041 = vmatpush3.msra.mxu0 %v9460_v30 }
0x1046   :  { %8042 = vmatprep.subr.mxu0 %v9098_v0 }
0x1047   :  { %8043 = vmatpush3.msra.mxu0 %v9465_v31 }
0x1048   :  { %8044 = vmatprep.subr.mxu0 %v9098_v0 }
0x1049   :  { %8045 = vmatpush3.msra.mxu0 %v9472_v34 }
0x104a   :  { %8060 = vmatprep.subr.mxu0 %v9098_v0 }
0x1069   :  { %v1767_v21 = vpop.permute.xlu0 %1766 }
0x106a   :  { %1841 = vst.msk [vmem:[#allocation3 + $0x20] sm:$0xff] %vm502_vm3, %v1767_v21  ;;  %8014 = vmatmul.mubr.msk.f32.vlgmr.msra.gmra.mxu1 %vm502_vm3, %v1767_v21  ;;  %v9812_v21 = vld [vmem:[%s10998_s5] sm:$0xff] }
0x106b   :  { %8028 = vmatpush3.msra.mxu1 %v9397_v32  ;;  %8035 = vmatprep.mubr.msk.f32.mxu1 %vm9099_vm1, %v9098_v0 }
0x106c   :  { %8029 = vmatprep.subr.mxu1 %v9098_v0 }
0x106d   :  { %8030 = vmatpush3.msra.mxu1 %v9403_v35 }
0x106e   :  { %8031 = vmatprep.subr.mxu1 %v9098_v0 }
0x106f   :  { %8032 = vmatpush3.msra.mxu1 %v9412_v38 }
0x1070   :  { %8033 = vmatprep.subr.mxu1 %v9098_v0 }
0x1071   :  { %8034 = vmatpush3.msra.mxu1 %v9419_v39 }
0x1072   :  { %8036 = vmatmul.mubr.msk.f32.vlgmr.msra.gmra.mxu1 %vm502_vm3, %v1871_v37  ;;  %8049 = vmatprep.subr.mxu1 %v9098_v0  ;;  %v9805_v37 = vld [vmem:[%s10998_s5 + $0x8] sm:$0xff] }
0x1073   :  { %8050 = vmatpush3.msra.mxu1 %v9359_v25  ;;  %8057 = vmatprep.mubr.msk.f32.mxu1 %vm9099_vm1, %v9098_v0 }
0x1074   :  { %8051 = vmatprep.subr.mxu1 %v9098_v0 }
0x1075   :  { %8052 = vmatpush3.msra.mxu1 %v9364_v26 }
0x1076   :  { %8053 = vmatprep.subr.mxu1 %v9098_v0 }
0x1077   :  { %8054 = vmatpush3.msra.mxu1 %v9372_v27 }
0x1078   :  { %8055 = vmatprep.subr.mxu1 %v9098_v0 }
0x1079   :  { %8056 = vmatpush3.msra.mxu1 %v9381_v28 }
0x107a   :  { %8071 = vmatprep.subr.mxu1 %v9098_v0 }
0x1102   :  { %v1940_v32 = vpop.f32.mrf.mxu0 }
0x1103   :  { %v2118_v25 = vadd.f32 %v1940_v32, %v9331_v2 }
0x1104   :  { %v8026_v35 = vpop.f32.mrf.mxu0 }
0x1105   :  { %8763 = vtanh.f32 %v2118_v25  ;;  %v7284_v28 = vmul.f32 -1.442695, %v2118_v25 }
0x1112   :  { %v8764_v38 = vpop.eup %8763 }
0x1113   :  { %2128 = vrot.lane.b32.xlu1 %v8764_v38, %s9100_s0 }
0x112a   :  { %v1836_v39 = vpop.f32.mrf.mxu1 }
0x112c   :  { %v8015_v26 = vpop.f32.mrf.mxu1 }
0x1132   :  { %v2010_v57 = vpop.f32.mrf.mxu1 }
0x1133   :  { %v2011_v62 = vadd.f32 %v2010_v57, %v1836_v39 }
0x1134   :  { %v8037_v19 = vpop.f32.mrf.mxu1 }
0x1135   :  { %v2014_v27 = vadd.f32 %v9434_v47, %v2011_v62 }
0x1137   :  { %8765 = vtanh.f32 %v2014_v27  ;;  %v7282_v9 = vmul.f32 -1.442695, %v2014_v27  ;;  %v9821_v27 = vld [vmem:[%s11000_s8] ss:$0 sm:$0xff] }
0x1138   :  { %8767 = vpow2.f32 %v7284_v28 }
0x1144   :  { %v8766_v63 = vpop.eup %8765 }
0x1145   :  { %2024 = vrot.lane.b32.xlu0 %v8766_v63, %s9100_s0  ;;  %v8768_v3 = vpop.eup %8767 }
0x1146   :  { %v2122_v2 = vadd.f32 1.0, %v8768_v3 }
0x1148   :  { %8769 = vrcp.f32 %v2122_v2 }
0x1149   :  { %8771 = vpow2.f32 %v7282_v9 }
0x1155   :  { %v8770_v4 = vpop.eup %8769 }
0x1156   :  { %v8772_v13 = vpop.eup %8771  ;;  %v2126_v18 = vmul.f32 %v8770_v4, %v9679_v42 }
0x1157   :  { %v2018_v16 = vadd.f32 1.0, %v8772_v13 }
0x1159   :  { %8773 = vrcp.f32 %v2018_v16 }
0x1166   :  { %v8774_v47 = vpop.eup %8773 }
0x1167   :  { %v2022_v24 = vmul.f32 %v8774_v47, %v9684_v46 }
0x1185   :  { %v2129_v8 = vpop.permute.xlu1 %2128 }
0x1186   :  { %v2131_v53 = vmul.f32 %v8770_v4, %v2129_v8 }
0x1188   :  { %2133 = vrot.lane.b32.xlu1 %v2131_v53, %s9101_s4 }
0x11b7   :  { %v2025_v51 = vpop.permute.xlu0 %2024 }
0x11b8   :  { %v2027_v49 = vmul.f32 %v8774_v47, %v2025_v51 }
0x11ba   :  { %2029 = vrot.lane.b32.xlu0 %v2027_v49, %s9101_s4 }
0x11fa   :  { %v2134_v58 = vpop.permute.xlu1 %2133 }
0x11fb   :  { %v9731_v20 = vadd.f32 %v2134_v58, %v2126_v18 }
0x11fd   :  { %8775 = vtanh.f32 %v9731_v20 }
0x120a   :  { %v8776_v29 = vpop.eup %8775 }
0x120b   :  { %2139 = vrot.lane.b32.xlu1 %v8776_v29, %s9100_s0 }
0x122c   :  { %v2030_v22 = vpop.permute.xlu0 %2029 }
0x122d   :  { %v9736_v45 = vadd.f32 %v2030_v22, %v2022_v24 }
0x122f   :  { %8777 = vtanh.f32 %v9736_v45 }
0x123c   :  { %v8778_v43 = vpop.eup %8777 }
0x123d   :  { %2035 = vrot.lane.b32.xlu0 %v8778_v43, %s9100_s0 }
0x127d   :  { %v2140_v12 = vpop.permute.xlu1 %2139 }
0x127e   :  { %v2142_v42 = vmul.f32 %v8770_v4, %v2140_v12 }
0x1280   :  { %2144 = vrot.lane.b32.xlu1 %v2142_v42, %s9101_s4 }
0x12af   :  { %v2036_v50 = vpop.permute.xlu0 %2035 }
0x12b0   :  { %v2038_v54 = vmul.f32 %v8774_v47, %v2036_v50 }
0x12b2   :  { %2040 = vrot.lane.b32.xlu0 %v2038_v54, %s9101_s4 }
0x12f2   :  { %v2145_v17 = vpop.permute.xlu1 %2144 }
0x12f3   :  { %8058 = vmatmul.mubr.msk.f32.vlgmr.msra.gmra.mxu1 %vm502_vm3, %v2145_v17 }
0x12f4   :  { %8072 = vmatpush3.msra.mxu1 %v9451_v23  ;;  %8079 = vmatprep.mubr.msk.f32.mxu1 %vm9099_vm1, %v9098_v0  ;;  %v9758_v23 = vld [vmem:[%s10999_s6 + $0x18] sm:$0xff] }
0x12f5   :  { %8073 = vmatprep.subr.mxu1 %v9098_v0 }
0x12f6   :  { %8074 = vmatpush3.msra.mxu1 %v9460_v30  ;;  %v9767_v30 = vld [vmem:[%s10999_s6 + $0x10] sm:$0xff] }
0x12f7   :  { %8075 = vmatprep.subr.mxu1 %v9098_v0 }
0x12f8   :  { %8076 = vmatpush3.msra.mxu1 %v9465_v31  ;;  %v9774_v31 = vld [vmem:[%s10999_s6 + $0x8] sm:$0xff] }
0x12f9   :  { %8077 = vmatprep.subr.mxu1 %v9098_v0 }
0x12fa   :  { %8078 = vmatpush3.msra.mxu1 %v9472_v34  ;;  %v9781_v34 = vld [vmem:[%s10999_s6] sm:$0xff] }
0x12fb   :  { %8093 = vmatprep.subr.mxu1 %v9098_v0 }
0x1324   :  { %v2041_v46 = vpop.permute.xlu0 %2040 }
0x1325   :  { %2115 = vst.msk [vmem:[#allocation3 + $0x28] sm:$0xff] %vm502_vm3, %v2041_v46  ;;  %8047 = vmatmul.mubr.msk.f32.vlgmr.msra.gmra.mxu0 %vm502_vm3, %v2041_v46 }
0x1326   :  { %8061 = vmatpush3.msra.mxu0 %v9758_v23  ;;  %8068 = vmatprep.mubr.msk.f32.mxu0 %vm9099_vm1, %v9098_v0 }
0x1327   :  { %8062 = vmatprep.subr.mxu0 %v9098_v0 }
0x1328   :  { %8063 = vmatpush3.msra.mxu0 %v9767_v30 }
0x1329   :  { %8064 = vmatprep.subr.mxu0 %v9098_v0 }
0x132a   :  { %8065 = vmatpush3.msra.mxu0 %v9774_v31 }
0x132b   :  { %8066 = vmatprep.subr.mxu0 %v9098_v0 }
0x132c   :  { %8067 = vmatpush3.msra.mxu0 %v9781_v34 }
0x132d   :  { %8069 = vmatmul.mubr.msk.f32.vlgmr.msra.gmra.mxu0 %vm502_vm3, %v2145_v17  ;;  %8082 = vmatprep.subr.mxu0 %v9098_v0 }
0x132e   :  { %8083 = vmatpush3.msra.mxu0 %v9789_v55  ;;  %8090 = vmatprep.mubr.msk.f32.mxu0 %vm9099_vm1, %v9098_v0 }
0x132f   :  { %8084 = vmatprep.subr.mxu0 %v9098_v0 }
0x1330   :  { %8085 = vmatpush3.msra.mxu0 %v9798_v59 }
0x1331   :  { %8086 = vmatprep.subr.mxu0 %v9098_v0 }
0x1332   :  { %8087 = vmatpush3.msra.mxu0 %v9805_v37 }
0x1333   :  { %8088 = vmatprep.subr.mxu0 %v9098_v0 }
0x1334   :  { %8089 = vmatpush3.msra.mxu0 %v9812_v21 }
0x1335   :  { %8104 = vmatprep.subr.mxu0 %v9098_v0 }
0x13b3   :  { %v2214_v32 = vpop.f32.mrf.mxu1 }
0x13b4   :  { %v2392_v25 = vadd.f32 %v2214_v32, %v9325_v61  ;;  %v9852_v32 = vld [vmem:[%s11001_s7 + $0x10] sm:$0xff] }
0x13b5   :  { %v8059_v35 = vpop.f32.mrf.mxu1 }
0x13b6   :  { %8779 = vtanh.f32 %v2392_v25  ;;  %v7289_v61 = vmul.f32 -1.442695, %v2392_v25  ;;  %v9859_v25 = vld [vmem:[%s11001_s7 + $0x8] sm:$0xff]  ;;  %v9866_v35 = vld [vmem:[%s11001_s7] sm:$0xff] }
0x13c3   :  { %v8780_v38 = vpop.eup %8779 }
0x13c4   :  { %2402 = vrot.lane.b32.xlu1 %v8780_v38, %s9100_s0 }
0x13e5   :  { %v2110_v39 = vpop.f32.mrf.mxu0 }
0x13e7   :  { %v8048_v26 = vpop.f32.mrf.mxu0 }
0x13ed   :  { %v2284_v57 = vpop.f32.mrf.mxu0 }
0x13ee   :  { %v2285_v62 = vadd.f32 %v2284_v57, %v2110_v39 }
0x13ef   :  { %v8070_v19 = vpop.f32.mrf.mxu0 }
0x13f0   :  { %v2288_v63 = vadd.f32 %v9821_v27, %v2285_v62 }
0x13f2   :  { %8781 = vtanh.f32 %v2288_v63  ;;  %v7287_v9 = vmul.f32 -1.442695, %v2288_v63 }
0x13f3   :  { %8783 = vpow2.f32 %v7289_v61 }
0x13ff   :  { %v8782_v28 = vpop.eup %8781 }
0x1400   :  { %2298 = vrot.lane.b32.xlu0 %v8782_v28, %s9100_s0  ;;  %v8784_v3 = vpop.eup %8783 }
0x1401   :  { %v2396_v2 = vadd.f32 1.0, %v8784_v3 }
0x1403   :  { %8785 = vrcp.f32 %v2396_v2 }
0x1404   :  { %8787 = vpow2.f32 %v7287_v9 }
0x1410   :  { %v8786_v4 = vpop.eup %8785 }
0x1411   :  { %v8788_v13 = vpop.eup %8787  ;;  %v2400_v18 = vmul.f32 %v8786_v4, %v9731_v20 }
0x1412   :  { %v2292_v16 = vadd.f32 1.0, %v8788_v13 }
0x1414   :  { %8789 = vrcp.f32 %v2292_v16 }
0x1421   :  { %v8790_v47 = vpop.eup %8789 }
0x1422   :  { %v2296_v22 = vmul.f32 %v8790_v47, %v9736_v45  ;;  %v9843_v45 = vld [vmem:[%s11001_s7 + $0x18] sm:$0xff] }
0x1436   :  { %v2403_v8 = vpop.permute.xlu1 %2402 }
0x1437   :  { %v2405_v53 = vmul.f32 %v8786_v4, %v2403_v8 }
0x1439   :  { %2407 = vrot.lane.b32.xlu1 %v2405_v53, %s9101_s4 }
0x1472   :  { %v2299_v51 = vpop.permute.xlu0 %2298 }
0x1473   :  { %v2301_v49 = vmul.f32 %v8790_v47, %v2299_v51 }
0x1475   :  { %2303 = vrot.lane.b32.xlu0 %v2301_v49, %s9101_s4 }
0x14ab   :  { %v2408_v58 = vpop.permute.xlu1 %2407 }
0x14ac   :  { %v9828_v29 = vadd.f32 %v2408_v58, %v2400_v18 }
0x14ae   :  { %8791 = vtanh.f32 %v9828_v29 }
0x14bb   :  { %v8792_v24 = vpop.eup %8791 }
0x14bc   :  { %2413 = vrot.lane.b32.xlu1 %v8792_v24, %s9100_s0 }
0x14e7   :  { %v2304_v43 = vpop.permute.xlu0 %2303 }
0x14e8   :  { %v9833_v12 = vadd.f32 %v2304_v43, %v2296_v22 }
0x14ea   :  { %8793 = vtanh.f32 %v9833_v12 }
0x14f7   :  { %v8794_v42 = vpop.eup %8793 }
0x14f8   :  { %2309 = vrot.lane.b32.xlu0 %v8794_v42, %s9100_s0 }
0x152e   :  { %v2414_v50 = vpop.permute.xlu1 %2413 }
0x152f   :  { %v2416_v20 = vmul.f32 %v8786_v4, %v2414_v50 }
0x1531   :  { %2418 = vrot.lane.b32.xlu1 %v2416_v20, %s9101_s4 }
0x156a   :  { %v2310_v54 = vpop.permute.xlu0 %2309 }
0x156b   :  { %v2312_v17 = vmul.f32 %v8790_v47, %v2310_v54 }
0x156d   :  { %2314 = vrot.lane.b32.xlu0 %v2312_v17, %s9101_s4 }
0x15a3   :  { %v2419_v46 = vpop.permute.xlu1 %2418 }
0x15a4   :  { %8091 = vmatmul.mubr.msk.f32.vlgmr.msra.gmra.mxu0 %vm502_vm3, %v2419_v46 }
0x15a5   :  { %8105 = vmatpush3.msra.mxu0 %v9843_v45  ;;  %8112 = vmatprep.mubr.msk.f32.mxu0 %vm9099_vm1, %v9098_v0 }
0x15a6   :  { %8106 = vmatprep.subr.mxu0 %v9098_v0 }
0x15a7   :  { %8107 = vmatpush3.msra.mxu0 %v9852_v32 }
0x15a8   :  { %8108 = vmatprep.subr.mxu0 %v9098_v0 }
0x15a9   :  { %8109 = vmatpush3.msra.mxu0 %v9859_v25 }
0x15aa   :  { %8110 = vmatprep.subr.mxu0 %v9098_v0 }
0x15ab   :  { %8111 = vmatpush3.msra.mxu0 %v9866_v35 }
0x15ac   :  { %8126 = vmatprep.subr.mxu0 %v9098_v0 }
0x15df   :  { %v2315_v38 = vpop.permute.xlu0 %2314 }
0x15e0   :  { %2389 = vst.msk [vmem:[#allocation3 + $0x30] sm:$0xff] %vm502_vm3, %v2315_v38  ;;  %8080 = vmatmul.mubr.msk.f32.vlgmr.msra.gmra.mxu1 %vm502_vm3, %v2315_v38 }
0x15e1   :  { %8094 = vmatpush3.msra.mxu1 %v9758_v23  ;;  %8101 = vmatprep.mubr.msk.f32.mxu1 %vm9099_vm1, %v9098_v0 }
0x15e2   :  { %8095 = vmatprep.subr.mxu1 %v9098_v0 }
0x15e3   :  { %8096 = vmatpush3.msra.mxu1 %v9767_v30 }
0x15e4   :  { %8097 = vmatprep.subr.mxu1 %v9098_v0 }
0x15e5   :  { %8098 = vmatpush3.msra.mxu1 %v9774_v31 }
0x15e6   :  { %8099 = vmatprep.subr.mxu1 %v9098_v0 }
0x15e7   :  { %8100 = vmatpush3.msra.mxu1 %v9781_v34 }
0x15e8   :  { %8102 = vmatmul.mubr.msk.f32.vlgmr.msra.gmra.mxu1 %vm502_vm3, %v2419_v46  ;;  %8115 = vmatprep.subr.mxu1 %v9098_v0 }
0x15e9   :  { %8116 = vmatpush3.msra.mxu1 %v9789_v55  ;;  %8123 = vmatprep.mubr.msk.f32.mxu1 %vm9099_vm1, %v9098_v0 }
0x15ea   :  { %8117 = vmatprep.subr.mxu1 %v9098_v0 }
0x15eb   :  { %8118 = vmatpush3.msra.mxu1 %v9798_v59 }
0x15ec   :  { %8119 = vmatprep.subr.mxu1 %v9098_v0 }
0x15ed   :  { %8120 = vmatpush3.msra.mxu1 %v9805_v37 }
0x15ee   :  { %8121 = vmatprep.subr.mxu1 %v9098_v0 }
0x15ef   :  { %8122 = vmatpush3.msra.mxu1 %v9812_v21 }
0x15f0   :  { %8137 = vmatprep.subr.mxu1 %v9098_v0 }
0x1664   :  { %v2488_v39 = vpop.f32.mrf.mxu0 }
0x1665   :  { %v2666_v26 = vadd.f32 %v2488_v39, %v9343_v11 }
0x1666   :  { %v8092_v57 = vpop.f32.mrf.mxu0 }
0x1667   :  { %8795 = vtanh.f32 %v2666_v26  ;;  %v7294_v8 = vmul.f32 -1.442695, %v2666_v26 }
0x1674   :  { %v8796_v62 = vpop.eup %8795 }
0x1675   :  { %2676 = vrot.lane.b32.xlu1 %v8796_v62, %s9100_s0 }
0x16a0   :  { %v2384_v19 = vpop.f32.mrf.mxu1 }
0x16a2   :  { %v8081_v63 = vpop.f32.mrf.mxu1 }
0x16a8   :  { %v2558_v28 = vpop.f32.mrf.mxu1 }
0x16a9   :  { %v2559_v61 = vadd.f32 %v2558_v28, %v2384_v19 }
0x16aa   :  { %v8103_v3 = vpop.f32.mrf.mxu1 }
0x16ab   :  { %v2562_v2 = vadd.f32 %v9821_v27, %v2559_v61 }
0x16ad   :  { %8797 = vtanh.f32 %v2562_v2  ;;  %v7292_v47 = vmul.f32 -1.442695, %v2562_v2 }
0x16ae   :  { %8799 = vpow2.f32 %v7294_v8 }
0x16ba   :  { %v8798_v4 = vpop.eup %8797 }
0x16bb   :  { %2572 = vrot.lane.b32.xlu0 %v8798_v4, %s9100_s0  ;;  %v8800_v53 = vpop.eup %8799 }
0x16bc   :  { %v2670_v11 = vadd.f32 1.0, %v8800_v53 }
0x16be   :  { %8801 = vrcp.f32 %v2670_v11 }
0x16bf   :  { %8803 = vpow2.f32 %v7292_v47 }
0x16cb   :  { %v8802_v9 = vpop.eup %8801 }
0x16cc   :  { %v8804_v51 = vpop.eup %8803  ;;  %v2674_v22 = vmul.f32 %v8802_v9, %v9828_v29 }
0x16cd   :  { %v2566_v49 = vadd.f32 1.0, %v8804_v51 }
0x16cf   :  { %8805 = vrcp.f32 %v2566_v49 }
0x16dc   :  { %v8806_v18 = vpop.eup %8805 }
0x16dd   :  { %v2570_v20 = vmul.f32 %v8806_v18, %v9833_v12 }
0x16e7   :  { %v2677_v13 = vpop.permute.xlu1 %2676 }
0x16e8   :  { %v2679_v16 = vmul.f32 %v8802_v9, %v2677_v13 }
0x16ea   :  { %2681 = vrot.lane.b32.xlu1 %v2679_v16, %s9101_s4 }
0x172d   :  { %v2573_v58 = vpop.permute.xlu0 %2572 }
0x172e   :  { %v2575_v24 = vmul.f32 %v8806_v18, %v2573_v58 }
0x1730   :  { %2577 = vrot.lane.b32.xlu0 %v2575_v24, %s9101_s4 }
0x175c   :  { %v2682_v43 = vpop.permute.xlu1 %2681 }
0x175d   :  { %v9900_v42 = vadd.f32 %v2682_v43, %v2674_v22 }
0x175f   :  { %8807 = vtanh.f32 %v9900_v42 }
0x176c   :  { %v8808_v50 = vpop.eup %8807 }
0x176d   :  { %2687 = vrot.lane.b32.xlu1 %v8808_v50, %s9100_s0 }
0x17a2   :  { %v2578_v54 = vpop.permute.xlu0 %2577 }
0x17a3   :  { %v9905_v17 = vadd.f32 %v2578_v54, %v2570_v20 }
0x17a5   :  { %8809 = vtanh.f32 %v9905_v17 }
0x17b2   :  { %v8810_v46 = vpop.eup %8809 }
0x17b3   :  { %2583 = vrot.lane.b32.xlu0 %v8810_v46, %s9100_s0 }
0x17df   :  { %v2688_v38 = vpop.permute.xlu1 %2687 }
0x17e0   :  { %v2690_v29 = vmul.f32 %v8802_v9, %v2688_v38 }
0x17e2   :  { %2692 = vrot.lane.b32.xlu1 %v2690_v29, %s9101_s4 }
0x1825   :  { %v2584_v39 = vpop.permute.xlu0 %2583 }
0x1826   :  { %v2586_v26 = vmul.f32 %v8806_v18, %v2584_v39 }
0x1828   :  { %2588 = vrot.lane.b32.xlu0 %v2586_v26, %s9101_s4 }
0x1854   :  { %v2693_v57 = vpop.permute.xlu1 %2692 }
0x1855   :  { %8124 = vmatmul.mubr.msk.f32.vlgmr.msra.gmra.mxu1 %vm502_vm3, %v2693_v57 }
0x1856   :  { %8138 = vmatpush3.msra.mxu1 %v9843_v45  ;;  %8145 = vmatprep.mubr.msk.f32.mxu1 %vm9099_vm1, %v9098_v0 }
0x1857   :  { %8139 = vmatprep.subr.mxu1 %v9098_v0 }
0x1858   :  { %8140 = vmatpush3.msra.mxu1 %v9852_v32 }
0x1859   :  { %8141 = vmatprep.subr.mxu1 %v9098_v0 }
0x185a   :  { %8142 = vmatpush3.msra.mxu1 %v9859_v25 }
0x185b   :  { %8143 = vmatprep.subr.mxu1 %v9098_v0 }
0x185c   :  { %8144 = vmatpush3.msra.mxu1 %v9866_v35 }
0x185d   :  { %8159 = vmatprep.subr.mxu1 %v9098_v0 }
0x189a   :  { %v2589_v12 = vpop.permute.xlu0 %2588 }
0x189b   :  { %2663 = vst.msk [vmem:[#allocation3 + $0x38] sm:$0xff] %vm502_vm3, %v2589_v12  ;;  %8113 = vmatmul.mubr.msk.f32.vlgmr.msra.gmra.mxu0 %vm502_vm3, %v2589_v12 }
0x189c   :  { %8127 = vmatpush3.msra.mxu0 %v9758_v23  ;;  %8134 = vmatprep.mubr.msk.f32.mxu0 %vm9099_vm1, %v9098_v0 }
0x189d   :  { %8128 = vmatprep.subr.mxu0 %v9098_v0 }
0x189e   :  { %8129 = vmatpush3.msra.mxu0 %v9767_v30 }
0x189f   :  { %8130 = vmatprep.subr.mxu0 %v9098_v0 }
0x18a0   :  { %8131 = vmatpush3.msra.mxu0 %v9774_v31 }
0x18a1   :  { %8132 = vmatprep.subr.mxu0 %v9098_v0 }
0x18a2   :  { %8133 = vmatpush3.msra.mxu0 %v9781_v34 }
0x18a3   :  { %8135 = vmatmul.mubr.msk.f32.vlgmr.msra.gmra.mxu0 %vm502_vm3, %v2693_v57  ;;  %8148 = vmatprep.subr.mxu0 %v9098_v0 }
0x18a4   :  { %8149 = vmatpush3.msra.mxu0 %v9789_v55  ;;  %8156 = vmatprep.mubr.msk.f32.mxu0 %vm9099_vm1, %v9098_v0 }
0x18a5   :  { %8150 = vmatprep.subr.mxu0 %v9098_v0 }
0x18a6   :  { %8151 = vmatpush3.msra.mxu0 %v9798_v59 }
0x18a7   :  { %8152 = vmatprep.subr.mxu0 %v9098_v0 }
0x18a8   :  { %8153 = vmatpush3.msra.mxu0 %v9805_v37 }
0x18a9   :  { %8154 = vmatprep.subr.mxu0 %v9098_v0 }
0x18aa   :  { %8155 = vmatpush3.msra.mxu0 %v9812_v21 }
0x18ab   :  { %8170 = vmatprep.subr.mxu0 %v9098_v0 }
0x1915   :  { %v2762_v62 = vpop.f32.mrf.mxu1 }
0x1916   :  { %v2940_v19 = vadd.f32 %v2762_v62, %v9337_v6 }
0x1917   :  { %v8125_v63 = vpop.f32.mrf.mxu1 }
0x1918   :  { %8811 = vtanh.f32 %v2940_v19  ;;  %v7299_v11 = vmul.f32 -1.442695, %v2940_v19  ;;  %v416_v63 = vadd.f32 %v9428_v41, %v9285_v33 }
0x1925   :  { %v8812_v28 = vpop.eup %8811 }
0x1926   :  { %2950 = vrot.lane.b32.xlu1 %v8812_v28, %s9100_s0 }
0x195b   :  { %v2658_v61 = vpop.f32.mrf.mxu0 }
0x195d   :  { %v8114_v3 = vpop.f32.mrf.mxu0 }
0x1963   :  { %v2832_v2 = vpop.f32.mrf.mxu0 }
0x1964   :  { %v2833_v4 = vadd.f32 %v2832_v2, %v2658_v61 }
0x1965   :  { %v8136_v8 = vpop.f32.mrf.mxu0 }
0x1966   :  { %v2836_v53 = vadd.f32 %v9821_v27, %v2833_v4 }
0x1968   :  { %8813 = vtanh.f32 %v2836_v53  ;;  %v7297_v49 = vmul.f32 -1.442695, %v2836_v53 }
0x1969   :  { %8815 = vpow2.f32 %v7299_v11 }
0x1975   :  { %v8814_v9 = vpop.eup %8813 }
0x1976   :  { %2846 = vrot.lane.b32.xlu0 %v8814_v9, %s9100_s0  ;;  %v8816_v13 = vpop.eup %8815 }
0x1977   :  { %v2944_v6 = vadd.f32 1.0, %v8816_v13 }
0x1979   :  { %8817 = vrcp.f32 %v2944_v6 }
0x197a   :  { %8819 = vpow2.f32 %v7297_v49 }
0x1986   :  { %v8818_v16 = vpop.eup %8817 }
0x1987   :  { %v8820_v18 = vpop.eup %8819  ;;  %v2948_v50 = vmul.f32 %v8818_v16, %v9900_v42 }
0x1988   :  { %v2840_v58 = vadd.f32 1.0, %v8820_v18 }
0x198a   :  { %8821 = vrcp.f32 %v2840_v58 }
0x1997   :  { %v8822_v24 = vpop.eup %8821 }
0x1998   :  { %v2951_v47 = vpop.permute.xlu1 %2950  ;;  %v2844_v38 = vmul.f32 %v8822_v24, %v9905_v17 }
0x1999   :  { %v2953_v51 = vmul.f32 %v8818_v16, %v2951_v47 }
0x199b   :  { %2955 = vrot.lane.b32.xlu1 %v2953_v51, %s9101_s4 }
0x19e8   :  { %v2847_v22 = vpop.permute.xlu0 %2846 }
0x19e9   :  { %v2849_v43 = vmul.f32 %v8822_v24, %v2847_v22 }
0x19eb   :  { %2851 = vrot.lane.b32.xlu0 %v2849_v43, %s9101_s4 }
0x1a0d   :  { %v2956_v20 = vpop.permute.xlu1 %2955 }
0x1a0e   :  { %v9952_v54 = vadd.f32 %v2956_v20, %v2948_v50 }
0x1a10   :  { %8823 = vtanh.f32 %v9952_v54 }
0x1a1d   :  { %v8824_v46 = vpop.eup %8823 }
0x1a1e   :  { %2961 = vrot.lane.b32.xlu1 %v8824_v46, %s9100_s0 }
0x1a5d   :  { %v2852_v29 = vpop.permute.xlu0 %2851 }
0x1a5e   :  { %v9957_v39 = vadd.f32 %v2852_v29, %v2844_v38 }
0x1a60   :  { %8825 = vtanh.f32 %v9957_v39 }
0x1a6d   :  { %v8826_v26 = vpop.eup %8825 }
0x1a6e   :  { %2857 = vrot.lane.b32.xlu0 %v8826_v26, %s9100_s0 }
0x1a90   :  { %v2962_v57 = vpop.permute.xlu1 %2961 }
0x1a91   :  { %v2964_v42 = vmul.f32 %v8818_v16, %v2962_v57 }
0x1a93   :  { %2966 = vrot.lane.b32.xlu1 %v2964_v42, %s9101_s4 }
0x1ae0   :  { %v2858_v12 = vpop.permute.xlu0 %2857 }
0x1ae1   :  { %v2860_v62 = vmul.f32 %v8822_v24, %v2858_v12 }
0x1ae3   :  { %2862 = vrot.lane.b32.xlu0 %v2860_v62, %s9101_s4 }
0x1b05   :  { %v2967_v19 = vpop.permute.xlu1 %2966 }
0x1b06   :  { %8157 = vmatmul.mubr.msk.f32.vlgmr.msra.gmra.mxu0 %vm502_vm3, %v2967_v19 }
0x1b07   :  { %8171 = vmatpush3.msra.mxu0 %v9843_v45  ;;  %8178 = vmatprep.mubr.msk.f32.mxu0 %vm9099_vm1, %v9098_v0 }
0x1b08   :  { %8172 = vmatprep.subr.mxu0 %v9098_v0 }
0x1b09   :  { %8173 = vmatpush3.msra.mxu0 %v9852_v32 }
0x1b0a   :  { %8174 = vmatprep.subr.mxu0 %v9098_v0 }
0x1b0b   :  { %8175 = vmatpush3.msra.mxu0 %v9859_v25 }
0x1b0c   :  { %8176 = vmatprep.subr.mxu0 %v9098_v0 }
0x1b0d   :  { %8177 = vmatpush3.msra.mxu0 %v9866_v35 }
0x1b0e   :  { %8192 = vmatprep.subr.mxu0 %v9098_v0 }
0x1b55   :  { %v2863_v17 = vpop.permute.xlu0 %2862 }
0x1b56   :  { %2937 = vst.msk [vmem:[#allocation3 + $0x40] sm:$0xff] %vm502_vm3, %v2863_v17  ;;  %8146 = vmatmul.mubr.msk.f32.vlgmr.msra.gmra.mxu1 %vm502_vm3, %v2863_v17 }
0x1b57   :  { %8160 = vmatpush3.msra.mxu1 %v9758_v23  ;;  %8167 = vmatprep.mubr.msk.f32.mxu1 %vm9099_vm1, %v9098_v0 }
0x1b58   :  { %8161 = vmatprep.subr.mxu1 %v9098_v0 }
0x1b59   :  { %8162 = vmatpush3.msra.mxu1 %v9767_v30 }
0x1b5a   :  { %8163 = vmatprep.subr.mxu1 %v9098_v0 }
0x1b5b   :  { %8164 = vmatpush3.msra.mxu1 %v9774_v31 }
0x1b5c   :  { %8165 = vmatprep.subr.mxu1 %v9098_v0 }
0x1b5d   :  { %8166 = vmatpush3.msra.mxu1 %v9781_v34 }
0x1b5e   :  { %8168 = vmatmul.mubr.msk.f32.vlgmr.msra.gmra.mxu1 %vm502_vm3, %v2967_v19  ;;  %8181 = vmatprep.subr.mxu1 %v9098_v0 }
0x1b5f   :  { %8182 = vmatpush3.msra.mxu1 %v9789_v55  ;;  %8189 = vmatprep.mubr.msk.f32.mxu1 %vm9099_vm1, %v9098_v0 }
0x1b60   :  { %8183 = vmatprep.subr.mxu1 %v9098_v0 }
0x1b61   :  { %8184 = vmatpush3.msra.mxu1 %v9798_v59 }
0x1b62   :  { %8185 = vmatprep.subr.mxu1 %v9098_v0 }
0x1b63   :  { %8186 = vmatpush3.msra.mxu1 %v9805_v37 }
0x1b64   :  { %8187 = vmatprep.subr.mxu1 %v9098_v0 }
0x1b65   :  { %8188 = vmatpush3.msra.mxu1 %v9812_v21 }
0x1b66   :  { %8203 = vmatprep.subr.mxu1 %v9098_v0 }
0x1bc6   :  { %v3036_v28 = vpop.f32.mrf.mxu0 }
0x1bc7   :  { %v3214_v61 = vadd.f32 %v3036_v28, %v416_v63 }
0x1bc8   :  { %v8158_v3 = vpop.f32.mrf.mxu0 }
0x1bc9   :  { %8827 = vtanh.f32 %v3214_v61  ;;  %v7304_v6 = vmul.f32 -1.442695, %v3214_v61 }
0x1bd6   :  { %v8828_v2 = vpop.eup %8827 }
0x1bd7   :  { %3224 = vrot.lane.b32.xlu1 %v8828_v2, %s9100_s0 }
0x1c16   :  { %v2932_v4 = vpop.f32.mrf.mxu1 }
0x1c18   :  { %v8147_v8 = vpop.f32.mrf.mxu1 }
0x1c1e   :  { %v3106_v53 = vpop.f32.mrf.mxu1 }
0x1c1f   :  { %v3107_v11 = vadd.f32 %v3106_v53, %v2932_v4 }
0x1c20   :  { %v8169_v9 = vpop.f32.mrf.mxu1 }
0x1c21   :  { %v3110_v13 = vadd.f32 %v9821_v27, %v3107_v11 }
0x1c23   :  { %8829 = vtanh.f32 %v3110_v13  ;;  %v7302_v58 = vmul.f32 -1.442695, %v3110_v13 }
0x1c24   :  { %8831 = vpow2.f32 %v7304_v6 }
0x1c30   :  { %v8830_v16 = vpop.eup %8829 }
0x1c31   :  { %3120 = vrot.lane.b32.xlu0 %v8830_v16, %s9100_s0  ;;  %v8832_v41 = vpop.eup %8831 }
0x1c32   :  { %v3218_v47 = vadd.f32 1.0, %v8832_v41 }
0x1c34   :  { %8833 = vrcp.f32 %v3218_v47 }
0x1c35   :  { %8835 = vpow2.f32 %v7302_v58 }
0x1c41   :  { %v8834_v51 = vpop.eup %8833 }
0x1c42   :  { %v8836_v24 = vpop.eup %8835  ;;  %v3222_v46 = vmul.f32 %v8834_v51, %v9952_v54 }
0x1c43   :  { %v3114_v22 = vadd.f32 1.0, %v8836_v24 }
0x1c45   :  { %8837 = vrcp.f32 %v3114_v22 }
0x1c49   :  { %v3225_v49 = vpop.permute.xlu1 %3224 }
0x1c4a   :  { %v3227_v18 = vmul.f32 %v8834_v51, %v3225_v49 }
0x1c4c   :  { %3229 = vrot.lane.b32.xlu1 %v3227_v18, %s9101_s4 }
0x1c52   :  { %v8838_v43 = vpop.eup %8837 }
0x1c53   :  { %v3118_v57 = vmul.f32 %v8838_v43, %v9957_v39 }
0x1ca3   :  { %v3121_v50 = vpop.permute.xlu0 %3120 }
0x1ca4   :  { %v3123_v20 = vmul.f32 %v8838_v43, %v3121_v50 }
0x1ca6   :  { %3125 = vrot.lane.b32.xlu0 %v3123_v20, %s9101_s4 }
0x1cbe   :  { %v3230_v38 = vpop.permute.xlu1 %3229 }
0x1cbf   :  { %v10005_v29 = vadd.f32 %v3230_v38, %v3222_v46 }
0x1cc1   :  { %8839 = vtanh.f32 %v10005_v29 }
0x1cce   :  { %v8840_v26 = vpop.eup %8839 }
0x1ccf   :  { %3235 = vrot.lane.b32.xlu1 %v8840_v26, %s9100_s0 }
0x1d18   :  { %v3126_v42 = vpop.permute.xlu0 %3125 }
0x1d19   :  { %v10010_v12 = vadd.f32 %v3126_v42, %v3118_v57 }
0x1d1b   :  { %8841 = vtanh.f32 %v10010_v12 }
0x1d28   :  { %v8842_v62 = vpop.eup %8841 }
0x1d29   :  { %3131 = vrot.lane.b32.xlu0 %v8842_v62, %s9100_s0 }
0x1d41   :  { %v3236_v19 = vpop.permute.xlu1 %3235 }
0x1d42   :  { %v3238_v54 = vmul.f32 %v8834_v51, %v3236_v19 }
0x1d44   :  { %3240 = vrot.lane.b32.xlu1 %v3238_v54, %s9101_s4 }
0x1d9b   :  { %v3132_v17 = vpop.permute.xlu0 %3131 }
0x1d9c   :  { %v3134_v63 = vmul.f32 %v8838_v43, %v3132_v17 }
0x1d9e   :  { %3136 = vrot.lane.b32.xlu0 %v3134_v63, %s9101_s4 }
0x1db6   :  { %v3241_v28 = vpop.permute.xlu1 %3240 }
0x1db7   :  { %8190 = vmatmul.mubr.msk.f32.vlgmr.msra.gmra.mxu1 %vm502_vm3, %v3241_v28 }
0x1db8   :  { %8204 = vmatpush3.msra.mxu1 %v9843_v45  ;;  %8211 = vmatprep.mubr.msk.f32.mxu1 %vm9099_vm1, %v9098_v0 }
0x1db9   :  { %8205 = vmatprep.subr.mxu1 %v9098_v0 }
0x1dba   :  { %8206 = vmatpush3.msra.mxu1 %v9852_v32 }
0x1dbb   :  { %8207 = vmatprep.subr.mxu1 %v9098_v0 }
0x1dbc   :  { %8208 = vmatpush3.msra.mxu1 %v9859_v25 }
0x1dbd   :  { %8209 = vmatprep.subr.mxu1 %v9098_v0 }
0x1dbe   :  { %8210 = vmatpush3.msra.mxu1 %v9866_v35 }
0x1dbf   :  { %8225 = vmatprep.subr.mxu1 %v9098_v0 }
0x1e10   :  { %v3137_v39 = vpop.permute.xlu0 %3136 }
0x1e11   :  { %3211 = vst.msk [vmem:[#allocation3 + $0x48] sm:$0xff] %vm502_vm3, %v3137_v39  ;;  %8179 = vmatmul.mubr.msk.f32.vlgmr.msra.gmra.mxu0 %vm502_vm3, %v3137_v39 }
0x1e12   :  { %8193 = vmatpush3.msra.mxu0 %v9758_v23  ;;  %8200 = vmatprep.mubr.msk.f32.mxu0 %vm9099_vm1, %v9098_v0 }
0x1e13   :  { %8194 = vmatprep.subr.mxu0 %v9098_v0 }
0x1e14   :  { %8195 = vmatpush3.msra.mxu0 %v9767_v30 }
0x1e15   :  { %8196 = vmatprep.subr.mxu0 %v9098_v0 }
0x1e16   :  { %8197 = vmatpush3.msra.mxu0 %v9774_v31 }
0x1e17   :  { %8198 = vmatprep.subr.mxu0 %v9098_v0 }
0x1e18   :  { %8199 = vmatpush3.msra.mxu0 %v9781_v34 }
0x1e19   :  { %8201 = vmatmul.mubr.msk.f32.vlgmr.msra.gmra.mxu0 %vm502_vm3, %v3241_v28  ;;  %8214 = vmatprep.subr.mxu0 %v9098_v0 }
0x1e1a   :  { %8215 = vmatpush3.msra.mxu0 %v9789_v55  ;;  %8222 = vmatprep.mubr.msk.f32.mxu0 %vm9099_vm1, %v9098_v0 }
0x1e1b   :  { %8216 = vmatprep.subr.mxu0 %v9098_v0 }
0x1e1c   :  { %8217 = vmatpush3.msra.mxu0 %v9798_v59 }
0x1e1d   :  { %8218 = vmatprep.subr.mxu0 %v9098_v0 }
0x1e1e   :  { %8219 = vmatpush3.msra.mxu0 %v9805_v37 }
0x1e1f   :  { %8220 = vmatprep.subr.mxu0 %v9098_v0 }
0x1e20   :  { %8221 = vmatpush3.msra.mxu0 %v9812_v21 }
0x1e21   :  { %8236 = vmatprep.subr.mxu0 %v9098_v0 }
0x1e77   :  { %v3310_v61 = vpop.f32.mrf.mxu1 }
0x1e78   :  { %v3488_v3 = vadd.f32 %v3310_v61, %v9350_v15 }
0x1e79   :  { %v8191_v2 = vpop.f32.mrf.mxu1 }
0x1e7a   :  { %8843 = vtanh.f32 %v3488_v3  ;;  %v7309_v11 = vmul.f32 -1.442695, %v3488_v3 }
0x1e7c   :  { %8845 = vpow2.f32 %v7309_v11 }
0x1e87   :  { %v8844_v4 = vpop.eup %8843 }
0x1e88   :  { %3498 = vrot.lane.b32.xlu1 %v8844_v4, %s9100_s0 }
0x1e89   :  { %v8846_v41 = vpop.eup %8845 }
0x1e8a   :  { %v3492_v47 = vadd.f32 1.0, %v8846_v41 }
0x1ed1   :  { %v3206_v8 = vpop.f32.mrf.mxu0 }
0x1ed3   :  { %v8180_v53 = vpop.f32.mrf.mxu0 }
0x1ed9   :  { %v3380_v9 = vpop.f32.mrf.mxu0 }
0x1eda   :  { %v3381_v13 = vadd.f32 %v3380_v9, %v3206_v8 }
0x1edb   :  { %v8202_v6 = vpop.f32.mrf.mxu0 }
0x1edc   :  { %v3384_v16 = vadd.f32 %v9821_v27, %v3381_v13 }
0x1ede   :  { %8847 = vtanh.f32 %v3384_v16  ;;  %v7307_v58 = vmul.f32 -1.442695, %v3384_v16 }
0x1edf   :  { %8849 = vrcp.f32 %v3492_v47 }
0x1ee0   :  { %8851 = vpow2.f32 %v7307_v58 }
0x1eeb   :  { %v8848_v51 = vpop.eup %8847 }
0x1eec   :  { %3394 = vrot.lane.b32.xlu0 %v8848_v51, %s9100_s0  ;;  %v8850_v15 = vpop.eup %8849 }
0x1eed   :  { %v8852_v24 = vpop.eup %8851  ;;  %v3496_v46 = vmul.f32 %v8850_v15, %v10005_v29 }
0x1eee   :  { %v3388_v22 = vadd.f32 1.0, %v8852_v24 }
0x1ef0   :  { %8853 = vrcp.f32 %v3388_v22 }
0x1efa   :  { %v3499_v49 = vpop.permute.xlu1 %3498 }
0x1efb   :  { %v3501_v18 = vmul.f32 %v8850_v15, %v3499_v49 }
0x1efd   :  { %3503 = vrot.lane.b32.xlu1 %v3501_v18, %s9101_s4  ;;  %v8854_v43 = vpop.eup %8853 }
0x1efe   :  { %v3392_v42 = vmul.f32 %v8854_v43, %v10010_v12 }
0x1f5e   :  { %v3395_v50 = vpop.permute.xlu0 %3394 }
0x1f5f   :  { %v3397_v20 = vmul.f32 %v8854_v43, %v3395_v50 }
0x1f61   :  { %3399 = vrot.lane.b32.xlu0 %v3397_v20, %s9101_s4 }
0x1f6f   :  { %v3504_v38 = vpop.permute.xlu1 %3503 }
0x1f70   :  { %v10057_v26 = vadd.f32 %v3504_v38, %v3496_v46 }
0x1f72   :  { %8855 = vtanh.f32 %v10057_v26 }
0x1f7f   :  { %v8856_v57 = vpop.eup %8855 }
0x1f80   :  { %3509 = vrot.lane.b32.xlu1 %v8856_v57, %s9100_s0 }
0x1fd3   :  { %v3400_v62 = vpop.permute.xlu0 %3399 }
0x1fd4   :  { %v10062_v19 = vadd.f32 %v3400_v62, %v3392_v42 }
0x1fd6   :  { %8857 = vtanh.f32 %v10062_v19 }
0x1fe3   :  { %v8858_v54 = vpop.eup %8857 }
0x1fe4   :  { %3405 = vrot.lane.b32.xlu0 %v8858_v54, %s9100_s0 }
0x1ff2   :  { %v3510_v17 = vpop.permute.xlu1 %3509 }
0x1ff3   :  { %v3512_v29 = vmul.f32 %v8850_v15, %v3510_v17 }
0x1ff5   :  { %3514 = vrot.lane.b32.xlu1 %v3512_v29, %s9101_s4 }
0x2056   :  { %v3406_v63 = vpop.permute.xlu0 %3405 }
0x2057   :  { %v3408_v28 = vmul.f32 %v8854_v43, %v3406_v63 }
0x2059   :  { %3410 = vrot.lane.b32.xlu0 %v3408_v28, %s9101_s4 }
0x2067   :  { %v3515_v39 = vpop.permute.xlu1 %3514 }
0x2068   :  { %8223 = vmatmul.mubr.msk.f32.vlgmr.msra.gmra.mxu0 %vm502_vm3, %v3515_v39 }
0x2069   :  { %8237 = vmatpush3.msra.mxu0 %v9843_v45  ;;  %8244 = vmatprep.mubr.msk.f32.mxu0 %vm9099_vm1, %v9098_v0 }
0x206a   :  { %8238 = vmatprep.subr.mxu0 %v9098_v0 }
0x206b   :  { %8239 = vmatpush3.msra.mxu0 %v9852_v32 }
0x206c   :  { %8240 = vmatprep.subr.mxu0 %v9098_v0 }
0x206d   :  { %8241 = vmatpush3.msra.mxu0 %v9859_v25 }
0x206e   :  { %8242 = vmatprep.subr.mxu0 %v9098_v0 }
0x206f   :  { %8243 = vmatpush3.msra.mxu0 %v9866_v35 }
0x2070   :  { %8258 = vmatprep.subr.mxu0 %v9098_v0 }
0x20cb   :  { %v3411_v12 = vpop.permute.xlu0 %3410 }
0x20cc   :  { %3485 = vst.msk [vmem:[#allocation3 + $0x50] sm:$0xff] %vm502_vm3, %v3411_v12  ;;  %8212 = vmatmul.mubr.msk.f32.vlgmr.msra.gmra.mxu1 %vm502_vm3, %v3411_v12 }
0x20cd   :  { %8226 = vmatpush3.msra.mxu1 %v9758_v23  ;;  %8233 = vmatprep.mubr.msk.f32.mxu1 %vm9099_vm1, %v9098_v0 }
0x20ce   :  { %8227 = vmatprep.subr.mxu1 %v9098_v0 }
0x20cf   :  { %8228 = vmatpush3.msra.mxu1 %v9767_v30 }
0x20d0   :  { %8229 = vmatprep.subr.mxu1 %v9098_v0 }
0x20d1   :  { %8230 = vmatpush3.msra.mxu1 %v9774_v31 }
0x20d2   :  { %8231 = vmatprep.subr.mxu1 %v9098_v0 }
0x20d3   :  { %8232 = vmatpush3.msra.mxu1 %v9781_v34 }
0x20d4   :  { %8234 = vmatmul.mubr.msk.f32.vlgmr.msra.gmra.mxu1 %vm502_vm3, %v3515_v39  ;;  %8247 = vmatprep.subr.mxu1 %v9098_v0 }
0x20d5   :  { %8248 = vmatpush3.msra.mxu1 %v9789_v55  ;;  %8255 = vmatprep.mubr.msk.f32.mxu1 %vm9099_vm1, %v9098_v0 }
0x20d6   :  { %8249 = vmatprep.subr.mxu1 %v9098_v0 }
0x20d7   :  { %8250 = vmatpush3.msra.mxu1 %v9798_v59 }
0x20d8   :  { %8251 = vmatprep.subr.mxu1 %v9098_v0 }
0x20d9   :  { %8252 = vmatpush3.msra.mxu1 %v9805_v37 }
0x20da   :  { %8253 = vmatprep.subr.mxu1 %v9098_v0 }
0x20db   :  { %8254 = vmatpush3.msra.mxu1 %v9812_v21 }
0x20dc   :  { %8269 = vmatprep.subr.mxu1 %v9098_v0 }
0x2128   :  { %v3584_v61 = vpop.f32.mrf.mxu0 }
0x2129   :  { %v3762_v3 = vadd.f32 %v3584_v61, %v9294_v40 }
0x212a   :  { %v8224_v2 = vpop.f32.mrf.mxu0 }
0x212b   :  { %8859 = vtanh.f32 %v3762_v3  ;;  %v7314_v8 = vmul.f32 -1.442695, %v3762_v3 }
0x212d   :  { %8861 = vpow2.f32 %v7314_v8 }
0x2138   :  { %v8860_v4 = vpop.eup %8859 }
0x2139   :  { %3772 = vrot.lane.b32.xlu1 %v8860_v4, %s9100_s0 }
0x213a   :  { %v8862_v16 = vpop.eup %8861 }
0x213b   :  { %v3766_v47 = vadd.f32 1.0, %v8862_v16 }
0x218c   :  { %v3480_v53 = vpop.f32.mrf.mxu1 }
0x218e   :  { %v8213_v11 = vpop.f32.mrf.mxu1 }
0x2194   :  { %v3654_v9 = vpop.f32.mrf.mxu1 }
0x2195   :  { %v3655_v13 = vadd.f32 %v3654_v9, %v3480_v53 }
0x2196   :  { %v8235_v6 = vpop.f32.mrf.mxu1 }
0x2197   :  { %v3658_v41 = vadd.f32 %v9821_v27, %v3655_v13 }
0x2199   :  { %8863 = vtanh.f32 %v3658_v41  ;;  %v7312_v18 = vmul.f32 -1.442695, %v3658_v41 }
0x219a   :  { %8865 = vrcp.f32 %v3766_v47 }
0x219b   :  { %8867 = vpow2.f32 %v7312_v18 }
0x21a6   :  { %v8864_v51 = vpop.eup %8863 }
0x21a7   :  { %3668 = vrot.lane.b32.xlu0 %v8864_v51, %s9100_s0  ;;  %v8866_v40 = vpop.eup %8865 }
0x21a8   :  { %v8868_v58 = vpop.eup %8867  ;;  %v3770_v20 = vmul.f32 %v8866_v40, %v10057_v26 }
0x21a9   :  { %v3662_v24 = vadd.f32 1.0, %v8868_v58 }
0x21ab   :  { %v3773_v15 = vpop.permute.xlu1 %3772  ;;  %8869 = vrcp.f32 %v3662_v24 }
0x21ac   :  { %v3775_v49 = vmul.f32 %v8866_v40, %v3773_v15 }
0x21ae   :  { %3777 = vrot.lane.b32.xlu1 %v3775_v49, %s9101_s4 }
0x21b8   :  { %v8870_v22 = vpop.eup %8869 }
0x21b9   :  { %v3666_v42 = vmul.f32 %v8870_v22, %v10062_v19 }
0x2219   :  { %v3669_v43 = vpop.permute.xlu0 %3668 }
0x221a   :  { %v3671_v50 = vmul.f32 %v8870_v22, %v3669_v43 }
0x221c   :  { %3673 = vrot.lane.b32.xlu0 %v3671_v50, %s9101_s4 }
0x2220   :  { %v3778_v46 = vpop.permute.xlu1 %3777 }
0x2221   :  { %v10109_v38 = vadd.f32 %v3778_v46, %v3770_v20 }
0x2223   :  { %8871 = vtanh.f32 %v10109_v38 }
0x2230   :  { %v8872_v57 = vpop.eup %8871 }
0x2231   :  { %3783 = vrot.lane.b32.xlu1 %v8872_v57, %s9100_s0  ;;  %v10219_v57 = vld [vmem:[%s10998_s5 + $0x18] sm:$0xff] }
0x228e   :  { %v3674_v62 = vpop.permute.xlu0 %3673 }
0x228f   :  { %v10114_v54 = vadd.f32 %v3674_v62, %v3666_v42  ;;  %v10228_v42 = vld [vmem:[%s10998_s5 + $0x10] sm:$0xff]  ;;  %v10235_v62 = vld [vmem:[%s10998_s5 + $0x8] sm:$0xff] }
0x2291   :  { %8873 = vtanh.f32 %v10114_v54 }
0x229e   :  { %v8874_v17 = vpop.eup %8873 }
0x229f   :  { %3679 = vrot.lane.b32.xlu0 %v8874_v17, %s9100_s0 }
0x22a3   :  { %v3784_v29 = vpop.permute.xlu1 %3783 }
0x22a4   :  { %v3786_v26 = vmul.f32 %v8866_v40, %v3784_v29 }
0x22a6   :  { %3788 = vrot.lane.b32.xlu1 %v3786_v26, %s9101_s4 }
0x2311   :  { %v3680_v63 = vpop.permute.xlu0 %3679 }
0x2312   :  { %v3682_v28 = vmul.f32 %v8870_v22, %v3680_v63 }
0x2314   :  { %3684 = vrot.lane.b32.xlu0 %v3682_v28, %s9101_s4 }
0x2318   :  { %v3789_v39 = vpop.permute.xlu1 %3788 }
0x2319   :  { %8256 = vmatmul.mubr.msk.f32.vlgmr.msra.gmra.mxu1 %vm502_vm3, %v3789_v39 }
0x231a   :  { %8270 = vmatpush3.msra.mxu1 %v9843_v45  ;;  %8277 = vmatprep.mubr.msk.f32.mxu1 %vm9099_vm1, %v9098_v0 }
0x231b   :  { %8271 = vmatprep.subr.mxu1 %v9098_v0 }
0x231c   :  { %8272 = vmatpush3.msra.mxu1 %v9852_v32 }
0x231d   :  { %8273 = vmatprep.subr.mxu1 %v9098_v0 }
0x231e   :  { %8274 = vmatpush3.msra.mxu1 %v9859_v25 }
0x231f   :  { %8275 = vmatprep.subr.mxu1 %v9098_v0 }
0x2320   :  { %8276 = vmatpush3.msra.mxu1 %v9866_v35 }
0x2321   :  { %8291 = vmatprep.subr.mxu1 %v9098_v0 }
0x2386   :  { %v3685_v19 = vpop.permute.xlu0 %3684 }
0x2387   :  { %3759 = vst.msk [vmem:[#allocation3 + $0x58] sm:$0xff] %vm502_vm3, %v3685_v19  ;;  %8245 = vmatmul.mubr.msk.f32.vlgmr.msra.gmra.mxu0 %vm502_vm3, %v3685_v19 }
0x2388   :  { %8259 = vmatpush3.msra.mxu0 %v9758_v23  ;;  %8266 = vmatprep.mubr.msk.f32.mxu0 %vm9099_vm1, %v9098_v0 }
0x2389   :  { %8260 = vmatprep.subr.mxu0 %v9098_v0 }
0x238a   :  { %8261 = vmatpush3.msra.mxu0 %v9767_v30 }
0x238b   :  { %8262 = vmatprep.subr.mxu0 %v9098_v0 }
0x238c   :  { %8263 = vmatpush3.msra.mxu0 %v9774_v31 }
0x238d   :  { %8264 = vmatprep.subr.mxu0 %v9098_v0 }
0x238e   :  { %8265 = vmatpush3.msra.mxu0 %v9781_v34 }
0x238f   :  { %8267 = vmatmul.mubr.msk.f32.vlgmr.msra.gmra.mxu0 %vm502_vm3, %v3789_v39  ;;  %8280 = vmatprep.subr.mxu0 %v9098_v0 }
0x2390   :  { %8281 = vmatpush3.msra.mxu0 %v9789_v55  ;;  %8288 = vmatprep.mubr.msk.f32.mxu0 %vm9099_vm1, %v9098_v0 }
0x2391   :  { %8282 = vmatprep.subr.mxu0 %v9098_v0 }
0x2392   :  { %8283 = vmatpush3.msra.mxu0 %v9798_v59 }
0x2393   :  { %8284 = vmatprep.subr.mxu0 %v9098_v0 }
0x2394   :  { %8285 = vmatpush3.msra.mxu0 %v9805_v37 }
0x2395   :  { %8286 = vmatprep.subr.mxu0 %v9098_v0 }
0x2396   :  { %8287 = vmatpush3.msra.mxu0 %v9812_v21 }
0x2397   :  { %8302 = vmatprep.subr.mxu0 %v9098_v0 }
0x23d9   :  { %v3858_v23 = vpop.f32.mrf.mxu1 }
0x23da   :  { %v4036_v30 = vadd.f32 %v3858_v23, %v9288_v36 }
0x23db   :  { %v8257_v31 = vpop.f32.mrf.mxu1 }
0x23dc   :  { %8875 = vtanh.f32 %v4036_v30  ;;  %v7319_v55 = vmul.f32 -1.442695, %v4036_v30 }
0x23de   :  { %8877 = vpow2.f32 %v7319_v55 }
0x23e9   :  { %v8876_v34 = vpop.eup %8875 }
0x23ea   :  { %4046 = vrot.lane.b32.xlu1 %v8876_v34, %s9100_s0 }
0x23eb   :  { %v8878_v12 = vpop.eup %8877 }
0x23ec   :  { %v4040_v37 = vadd.f32 1.0, %v8878_v12 }
0x23ee   :  { %8879 = vrcp.f32 %v4040_v37 }
0x23fb   :  { %v8880_v8 = vpop.eup %8879 }
0x23fc   :  { %v4044_v16 = vmul.f32 %v8880_v8, %v10109_v38  ;;  %v10211_v38 = vld [vmem:[%s10999_s6] sm:$0xff] }
0x2447   :  { %v3754_v59 = vpop.f32.mrf.mxu0 }
0x2449   :  { %v8246_v61 = vpop.f32.mrf.mxu0 }
0x244f   :  { %v3928_v3 = vpop.f32.mrf.mxu0 }
0x2450   :  { %v3929_v2 = vadd.f32 %v3928_v3, %v3754_v59 }
0x2451   :  { %v8268_v21 = vpop.f32.mrf.mxu0 }
0x2452   :  { %v3932_v4 = vadd.f32 %v9821_v27, %v3929_v2 }
0x2454   :  { %8881 = vtanh.f32 %v3932_v4  ;;  %v7317_v9 = vmul.f32 -1.442695, %v3932_v4 }
0x2456   :  { %8883 = vpow2.f32 %v7317_v9 }
0x245c   :  { %v4047_v36 = vpop.permute.xlu1 %4046 }
0x245d   :  { %v4049_v53 = vmul.f32 %v8880_v8, %v4047_v36 }
0x245f   :  { %4051 = vrot.lane.b32.xlu1 %v4049_v53, %s9101_s4 }
0x2461   :  { %v8882_v11 = vpop.eup %8881 }
0x2462   :  { %3942 = vrot.lane.b32.xlu0 %v8882_v11, %s9100_s0 }
0x2463   :  { %v8884_v13 = vpop.eup %8883 }
0x2464   :  { %v3936_v6 = vadd.f32 1.0, %v8884_v13 }
0x2466   :  { %8885 = vrcp.f32 %v3936_v6 }
0x2473   :  { %v8886_v27 = vpop.eup %8885 }
0x2474   :  { %v3940_v49 = vmul.f32 %v8886_v27, %v10114_v54  ;;  %v10242_v54 = vld [vmem:[%s10998_s5] sm:$0xff] }
0x24d1   :  { %v4052_v41 = vpop.permute.xlu1 %4051 }
0x24d2   :  { %v10160_v47 = vadd.f32 %v4052_v41, %v4044_v16 }
0x24d4   :  { %v3943_v51 = vpop.permute.xlu0 %3942  ;;  %8887 = vtanh.f32 %v10160_v47 }
0x24d5   :  { %v3945_v40 = vmul.f32 %v8886_v27, %v3943_v51 }
0x24d7   :  { %3947 = vrot.lane.b32.xlu0 %v3945_v40, %s9101_s4 }
0x24e1   :  { %v8888_v15 = vpop.eup %8887 }
0x24e2   :  { %4057 = vrot.lane.b32.xlu1 %v8888_v15, %s9100_s0 }
0x2549   :  { %v3948_v18 = vpop.permute.xlu0 %3947 }
0x254a   :  { %v10166_v58 = vadd.f32 %v3948_v18, %v3940_v49  ;;  %v10272_v49 = vld [vmem:[%s11001_s7 + $0x18] sm:$0xff]  ;;  %v10281_v18 = vld [vmem:[%s11001_s7 + $0x10] sm:$0xff] }
0x254c   :  { %8889 = vtanh.f32 %v10166_v58 }
0x2554   :  { %v4058_v24 = vpop.permute.xlu1 %4057 }
0x2555   :  { %v4060_v22 = vmul.f32 %v8880_v8, %v4058_v24  ;;  %v10295_v24 = vld [vmem:[%s11001_s7] sm:$0xff] }
0x2557   :  { %4062 = vrot.lane.b32.xlu1 %v4060_v22, %s9101_s4 }
0x2559   :  { %v8890_v43 = vpop.eup %8889 }
0x255a   :  { %3953 = vrot.lane.b32.xlu0 %v8890_v43, %s9100_s0 }
0x25c9   :  { %v4063_v50 = vpop.permute.xlu1 %4062 }
0x25ca   :  { %8289 = vmatmul.mubr.msk.f32.vlgmr.msra.gmra.mxu0 %vm502_vm3, %v4063_v50 }
0x25cb   :  { %8303 = vmatpush3.msra.mxu0 %v9843_v45  ;;  %8310 = vmatprep.mubr.msk.f32.mxu0 %vm9099_vm1, %v9098_v0 }
0x25cc   :  { %v3954_v20 = vpop.permute.xlu0 %3953  ;;  %8304 = vmatprep.subr.mxu0 %v9098_v0 }
0x25cd   :  { %v3956_v46 = vmul.f32 %v8886_v27, %v3954_v20  ;;  %8305 = vmatpush3.msra.mxu0 %v9852_v32  ;;  %v10188_v32 = vld [vmem:[%s10999_s6 + $0x18] sm:$0xff] }
0x25ce   :  { %8306 = vmatprep.subr.mxu0 %v9098_v0 }
0x25cf   :  { %3958 = vrot.lane.b32.xlu0 %v3956_v46, %s9101_s4  ;;  %8307 = vmatpush3.msra.mxu0 %v9859_v25  ;;  %v10197_v25 = vld [vmem:[%s10999_s6 + $0x10] sm:$0xff] }
0x25d0   :  { %8308 = vmatprep.subr.mxu0 %v9098_v0 }
0x25d1   :  { %8309 = vmatpush3.msra.mxu0 %v9866_v35  ;;  %v10204_v35 = vld [vmem:[%s10999_s6 + $0x8] sm:$0xff] }
0x25d2   :  { %8324 = vmatprep.subr.mxu0 %v9098_v0 }
0x2641   :  { %v3959_v45 = vpop.permute.xlu0 %3958 }
0x2642   :  { %4033 = vst.msk [vmem:[#allocation3 + $0x60] sm:$0xff] %vm502_vm3, %v3959_v45  ;;  %8278 = vmatmul.mubr.msk.f32.vlgmr.msra.gmra.mxu1 %vm502_vm3, %v3959_v45 }
0x2643   :  { %8292 = vmatpush3.msra.mxu1 %v10188_v32  ;;  %8299 = vmatprep.mubr.msk.f32.mxu1 %vm9099_vm1, %v9098_v0 }
0x2644   :  { %8293 = vmatprep.subr.mxu1 %v9098_v0 }
0x2645   :  { %8294 = vmatpush3.msra.mxu1 %v10197_v25 }
0x2646   :  { %8295 = vmatprep.subr.mxu1 %v9098_v0 }
0x2647   :  { %8296 = vmatpush3.msra.mxu1 %v10204_v35 }
0x2648   :  { %8297 = vmatprep.subr.mxu1 %v9098_v0 }
0x2649   :  { %8298 = vmatpush3.msra.mxu1 %v10211_v38 }
0x264a   :  { %8300 = vmatmul.mubr.msk.f32.vlgmr.msra.gmra.mxu1 %vm502_vm3, %v4063_v50  ;;  %8313 = vmatprep.subr.mxu1 %v9098_v0 }
0x264b   :  { %8314 = vmatpush3.msra.mxu1 %v10219_v57  ;;  %8321 = vmatprep.mubr.msk.f32.mxu1 %vm9099_vm1, %v9098_v0 }
0x264c   :  { %8315 = vmatprep.subr.mxu1 %v9098_v0 }
0x264d   :  { %8316 = vmatpush3.msra.mxu1 %v10228_v42 }
0x264e   :  { %8317 = vmatprep.subr.mxu1 %v9098_v0 }
0x264f   :  { %8318 = vmatpush3.msra.mxu1 %v10235_v62 }
0x2650   :  { %8319 = vmatprep.subr.mxu1 %v9098_v0 }
0x2651   :  { %8320 = vmatpush3.msra.mxu1 %v10242_v54 }
0x2652   :  { %8335 = vmatprep.subr.mxu1 %v9098_v0 }
0x268a   :  { %v4132_v17 = vpop.f32.mrf.mxu0 }
0x268b   :  { %v4310_v29 = vadd.f32 %v4132_v17, %v9304_v48  ;;  %v10251_v48 = vld [vmem:[%s11000_s8] ss:$0 sm:$0xff] }
0x268c   :  { %v8290_v26 = vpop.f32.mrf.mxu0 }
0x268d   :  { %8891 = vtanh.f32 %v4310_v29  ;;  %v7324_v28 = vmul.f32 -1.442695, %v4310_v29 }
0x268f   :  { %8893 = vpow2.f32 %v7324_v28 }
0x269a   :  { %v8892_v63 = vpop.eup %8891 }
0x269b   :  { %4320 = vrot.lane.b32.xlu1 %v8892_v63, %s9100_s0 }
0x269c   :  { %v8894_v39 = vpop.eup %8893 }
0x269d   :  { %v4314_v19 = vadd.f32 1.0, %v8894_v39 }
0x269f   :  { %8895 = vrcp.f32 %v4314_v19 }
0x26ac   :  { %v8896_v59 = vpop.eup %8895 }
0x26ad   :  { %v4318_v8 = vmul.f32 %v8896_v59, %v10160_v47 }
0x2702   :  { %v4028_v23 = vpop.f32.mrf.mxu1 }
0x2704   :  { %v8279_v30 = vpop.f32.mrf.mxu1 }
0x270a   :  { %v4202_v31 = vpop.f32.mrf.mxu1 }
0x270b   :  { %v4203_v34 = vadd.f32 %v4202_v31, %v4028_v23 }
0x270c   :  { %v8301_v55 = vpop.f32.mrf.mxu1 }
0x270d   :  { %v4206_v12 = vadd.f32 %v10251_v48, %v4203_v34  ;;  %v4321_v61 = vpop.permute.xlu1 %4320 }
0x270e   :  { %v4323_v37 = vmul.f32 %v8896_v59, %v4321_v61 }
0x270f   :  { %8897 = vtanh.f32 %v4206_v12  ;;  %v7322_v2 = vmul.f32 -1.442695, %v4206_v12 }
0x2710   :  { %4325 = vrot.lane.b32.xlu1 %v4323_v37, %s9101_s4 }
0x2711   :  { %8899 = vpow2.f32 %v7322_v2 }
0x271c   :  { %v8898_v3 = vpop.eup %8897 }
0x271d   :  { %4216 = vrot.lane.b32.xlu0 %v8898_v3, %s9100_s0 }
0x271e   :  { %v8900_v21 = vpop.eup %8899 }
0x271f   :  { %v4210_v4 = vadd.f32 1.0, %v8900_v21 }
0x2721   :  { %8901 = vrcp.f32 %v4210_v4 }
0x272e   :  { %v8902_v11 = vpop.eup %8901 }
0x272f   :  { %v4214_v16 = vmul.f32 %v8902_v11, %v10166_v58  ;;  %v10288_v58 = vld [vmem:[%s11001_s7 + $0x8] sm:$0xff] }
0x2782   :  { %v4326_v36 = vpop.permute.xlu1 %4325 }
0x2783   :  { %v10257_v53 = vadd.f32 %v4326_v36, %v4318_v8 }
0x2785   :  { %8903 = vtanh.f32 %v10257_v53 }
0x278f   :  { %v4217_v9 = vpop.permute.xlu0 %4216 }
0x2790   :  { %v4219_v13 = vmul.f32 %v8902_v11, %v4217_v9 }
0x2792   :  { %v8904_v6 = vpop.eup %8903  ;;  %4221 = vrot.lane.b32.xlu0 %v4219_v13, %s9101_s4 }
0x2793   :  { %4331 = vrot.lane.b32.xlu1 %v8904_v6, %s9100_s0 }
0x2804   :  { %v4222_v41 = vpop.permute.xlu0 %4221 }
0x2805   :  { %v10263_v27 = vadd.f32 %v4222_v41, %v4214_v16  ;;  %v4332_v47 = vpop.permute.xlu1 %4331 }
0x2806   :  { %v4334_v51 = vmul.f32 %v8896_v59, %v4332_v47 }
0x2807   :  { %8905 = vtanh.f32 %v10263_v27 }
0x2808   :  { %4336 = vrot.lane.b32.xlu1 %v4334_v51, %s9101_s4 }
0x2814   :  { %v8906_v40 = vpop.eup %8905 }
0x2815   :  { %4227 = vrot.lane.b32.xlu0 %v8906_v40, %s9100_s0 }
0x287a   :  { %v4337_v15 = vpop.permute.xlu1 %4336 }
0x287b   :  { %8322 = vmatmul.mubr.msk.f32.vlgmr.msra.gmra.mxu1 %vm502_vm3, %v4337_v15 }
0x287c   :  { %8336 = vmatpush3.msra.mxu1 %v10272_v49  ;;  %8343 = vmatprep.mubr.msk.f32.mxu1 %vm9099_vm1, %v9098_v0 }
0x287d   :  { %8337 = vmatprep.subr.mxu1 %v9098_v0 }
0x287e   :  { %8338 = vmatpush3.msra.mxu1 %v10281_v18 }
0x287f   :  { %8339 = vmatprep.subr.mxu1 %v9098_v0 }
0x2880   :  { %8340 = vmatpush3.msra.mxu1 %v10288_v58 }
0x2881   :  { %8341 = vmatprep.subr.mxu1 %v9098_v0 }
0x2882   :  { %8342 = vmatpush3.msra.mxu1 %v10295_v24 }
0x2883   :  { %8357 = vmatprep.subr.mxu1 %v9098_v0 }
0x2887   :  { %v4228_v22 = vpop.permute.xlu0 %4227 }
0x2888   :  { %v4230_v43 = vmul.f32 %v8902_v11, %v4228_v22 }
0x288a   :  { %4232 = vrot.lane.b32.xlu0 %v4230_v43, %s9101_s4 }
0x28fc   :  { %v4233_v50 = vpop.permute.xlu0 %4232 }
0x28fd   :  { %4307 = vst.msk [vmem:[#allocation3 + $0x68] sm:$0xff] %vm502_vm3, %v4233_v50  ;;  %8311 = vmatmul.mubr.msk.f32.vlgmr.msra.gmra.mxu0 %vm502_vm3, %v4233_v50 }
0x28fe   :  { %8325 = vmatpush3.msra.mxu0 %v10188_v32  ;;  %8332 = vmatprep.mubr.msk.f32.mxu0 %vm9099_vm1, %v9098_v0 }
0x28ff   :  { %8326 = vmatprep.subr.mxu0 %v9098_v0 }
0x2900   :  { %8327 = vmatpush3.msra.mxu0 %v10197_v25 }
0x2901   :  { %8328 = vmatprep.subr.mxu0 %v9098_v0 }
0x2902   :  { %8329 = vmatpush3.msra.mxu0 %v10204_v35 }
0x2903   :  { %8330 = vmatprep.subr.mxu0 %v9098_v0 }
0x2904   :  { %8331 = vmatpush3.msra.mxu0 %v10211_v38 }
0x2905   :  { %8333 = vmatmul.mubr.msk.f32.vlgmr.msra.gmra.mxu0 %vm502_vm3, %v4337_v15  ;;  %8346 = vmatprep.subr.mxu0 %v9098_v0 }
0x2906   :  { %8347 = vmatpush3.msra.mxu0 %v10219_v57  ;;  %8354 = vmatprep.mubr.msk.f32.mxu0 %vm9099_vm1, %v9098_v0 }
0x2907   :  { %8348 = vmatprep.subr.mxu0 %v9098_v0 }
0x2908   :  { %8349 = vmatpush3.msra.mxu0 %v10228_v42 }
0x2909   :  { %8350 = vmatprep.subr.mxu0 %v9098_v0 }
0x290a   :  { %8351 = vmatpush3.msra.mxu0 %v10235_v62 }
0x290b   :  { %8352 = vmatprep.subr.mxu0 %v9098_v0 }
0x290c   :  { %8353 = vmatpush3.msra.mxu0 %v10242_v54 }
0x290d   :  { %8368 = vmatprep.subr.mxu0 %v9098_v0 }
0x293b   :  { %v4406_v20 = vpop.f32.mrf.mxu1 }
0x293c   :  { %v4584_v46 = vadd.f32 %v4406_v20, %v9298_v44 }
0x293d   :  { %v8323_v45 = vpop.f32.mrf.mxu1 }
0x293e   :  { %8907 = vtanh.f32 %v4584_v46  ;;  %v7329_v29 = vmul.f32 -1.442695, %v4584_v46 }
0x2940   :  { %8909 = vpow2.f32 %v7329_v29 }
0x294b   :  { %v8908_v17 = vpop.eup %8907 }
0x294c   :  { %4594 = vrot.lane.b32.xlu1 %v8908_v17, %s9100_s0 }
0x294d   :  { %v8910_v26 = vpop.eup %8909 }
0x294e   :  { %v4588_v63 = vadd.f32 1.0, %v8910_v26 }
0x2950   :  { %8911 = vrcp.f32 %v4588_v63 }
0x295d   :  { %v8912_v39 = vpop.eup %8911 }
0x295e   :  { %v4592_v61 = vmul.f32 %v8912_v39, %v10257_v53 }
0x29bd   :  { %v4302_v28 = vpop.f32.mrf.mxu0 }
0x29be   :  { %v4595_v19 = vpop.permute.xlu1 %4594 }
0x29bf   :  { %v8312_v23 = vpop.f32.mrf.mxu0  ;;  %v4597_v30 = vmul.f32 %v8912_v39, %v4595_v19 }
0x29c1   :  { %4599 = vrot.lane.b32.xlu1 %v4597_v30, %s9101_s4 }
0x29c5   :  { %v4476_v31 = vpop.f32.mrf.mxu0 }
0x29c6   :  { %v4477_v34 = vadd.f32 %v4476_v31, %v4302_v28 }
0x29c7   :  { %v8334_v44 = vpop.f32.mrf.mxu0 }
0x29c8   :  { %v4480_v55 = vadd.f32 %v10251_v48, %v4477_v34 }
0x29ca   :  { %8913 = vtanh.f32 %v4480_v55  ;;  %v7327_v12 = vmul.f32 -1.442695, %v4480_v55 }
0x29cc   :  { %8915 = vpow2.f32 %v7327_v12 }
0x29d7   :  { %v8914_v59 = vpop.eup %8913 }
0x29d8   :  { %4490 = vrot.lane.b32.xlu0 %v8914_v59, %s9100_s0 }
0x29d9   :  { %v8916_v2 = vpop.eup %8915 }
0x29da   :  { %v4484_v21 = vadd.f32 1.0, %v8916_v2 }
0x2a33   :  { %v4600_v37 = vpop.permute.xlu1 %4599 }
0x2a34   :  { %v10329_v3 = vadd.f32 %v4600_v37, %v4592_v61 }
0x2a36   :  { %8917 = vtanh.f32 %v10329_v3 }
0x2a37   :  { %8919 = vrcp.f32 %v4484_v21 }
0x2a43   :  { %v8918_v4 = vpop.eup %8917 }
0x2a44   :  { %4605 = vrot.lane.b32.xlu1 %v8918_v4, %s9100_s0  ;;  %v8920_v8 = vpop.eup %8919 }
0x2a45   :  { %v4488_v53 = vmul.f32 %v8920_v8, %v10263_v27 }
0x2a4a   :  { %v4491_v36 = vpop.permute.xlu0 %4490 }
0x2a4b   :  { %v4493_v11 = vmul.f32 %v8920_v8, %v4491_v36 }
0x2a4d   :  { %4495 = vrot.lane.b32.xlu0 %v4493_v11, %s9101_s4 }
0x2ab6   :  { %v4606_v9 = vpop.permute.xlu1 %4605 }
0x2ab7   :  { %v4608_v13 = vmul.f32 %v8912_v39, %v4606_v9 }
0x2ab9   :  { %4610 = vrot.lane.b32.xlu1 %v4608_v13, %s9101_s4 }
0x2abf   :  { %v4496_v6 = vpop.permute.xlu0 %4495 }
0x2ac0   :  { %v10336_v16 = vadd.f32 %v4496_v6, %v4488_v53 }
0x2ac2   :  { %8921 = vtanh.f32 %v10336_v16 }
0x2acf   :  { %v8922_v41 = vpop.eup %8921 }
0x2ad0   :  { %4501 = vrot.lane.b32.xlu0 %v8922_v41, %s9100_s0 }
0x2b2b   :  { %v4611_v47 = vpop.permute.xlu1 %4610 }
0x2b2c   :  { %8355 = vmatmul.mubr.msk.f32.vlgmr.msra.gmra.mxu0 %vm502_vm3, %v4611_v47 }
0x2b2d   :  { %8369 = vmatpush3.msra.mxu0 %v10272_v49  ;;  %8376 = vmatprep.mubr.msk.f32.mxu0 %vm9099_vm1, %v9098_v0 }
0x2b2e   :  { %8370 = vmatprep.subr.mxu0 %v9098_v0 }
0x2b2f   :  { %8371 = vmatpush3.msra.mxu0 %v10281_v18 }
0x2b30   :  { %8372 = vmatprep.subr.mxu0 %v9098_v0 }
0x2b31   :  { %8373 = vmatpush3.msra.mxu0 %v10288_v58 }
0x2b32   :  { %8374 = vmatprep.subr.mxu0 %v9098_v0 }
0x2b33   :  { %8375 = vmatpush3.msra.mxu0 %v10295_v24 }
0x2b34   :  { %8390 = vmatprep.subr.mxu0 %v9098_v0 }
0x2b42   :  { %v4502_v27 = vpop.permute.xlu0 %4501 }
0x2b43   :  { %v4504_v51 = vmul.f32 %v8920_v8, %v4502_v27 }
0x2b45   :  { %4506 = vrot.lane.b32.xlu0 %v4504_v51, %s9101_s4 }
0x2bb7   :  { %v4507_v40 = vpop.permute.xlu0 %4506 }
0x2bb8   :  { %4581 = vst.msk [vmem:[#allocation3 + $0x70] sm:$0xff] %vm502_vm3, %v4507_v40  ;;  %8344 = vmatmul.mubr.msk.f32.vlgmr.msra.gmra.mxu1 %vm502_vm3, %v4507_v40 }
0x2bb9   :  { %8358 = vmatpush3.msra.mxu1 %v10188_v32  ;;  %8365 = vmatprep.mubr.msk.f32.mxu1 %vm9099_vm1, %v9098_v0 }
0x2bba   :  { %8359 = vmatprep.subr.mxu1 %v9098_v0 }
0x2bbb   :  { %8360 = vmatpush3.msra.mxu1 %v10197_v25 }
0x2bbc   :  { %8361 = vmatprep.subr.mxu1 %v9098_v0 }
0x2bbd   :  { %8362 = vmatpush3.msra.mxu1 %v10204_v35 }
0x2bbe   :  { %8363 = vmatprep.subr.mxu1 %v9098_v0 }
0x2bbf   :  { %8364 = vmatpush3.msra.mxu1 %v10211_v38 }
0x2bc0   :  { %8366 = vmatmul.mubr.msk.f32.vlgmr.msra.gmra.mxu1 %vm502_vm3, %v4611_v47  ;;  %8379 = vmatprep.subr.mxu1 %v9098_v0 }
0x2bc1   :  { %8380 = vmatpush3.msra.mxu1 %v10219_v57  ;;  %8387 = vmatprep.mubr.msk.f32.mxu1 %vm9099_vm1, %v9098_v0 }
0x2bc2   :  { %8381 = vmatprep.subr.mxu1 %v9098_v0 }
0x2bc3   :  { %8382 = vmatpush3.msra.mxu1 %v10228_v42 }
0x2bc4   :  { %8383 = vmatprep.subr.mxu1 %v9098_v0 }
0x2bc5   :  { %8384 = vmatpush3.msra.mxu1 %v10235_v62 }
0x2bc6   :  { %8385 = vmatprep.subr.mxu1 %v9098_v0 }
0x2bc7   :  { %8386 = vmatpush3.msra.mxu1 %v10242_v54 }
0x2bc8   :  { %8401 = vmatprep.subr.mxu1 %v9098_v0 }
0x2bec   :  { %v4680_v15 = vpop.f32.mrf.mxu0 }
0x2bed   :  { %v4858_v22 = vadd.f32 %v4680_v15, %v9316_v56 }
0x2bee   :  { %v8356_v43 = vpop.f32.mrf.mxu0 }
0x2bef   :  { %8923 = vtanh.f32 %v4858_v22  ;;  %v7334_v20 = vmul.f32 -1.442695, %v4858_v22 }
0x2bf1   :  { %8925 = vpow2.f32 %v7334_v20 }
0x2bfc   :  { %v8924_v50 = vpop.eup %8923 }
0x2bfd   :  { %4868 = vrot.lane.b32.xlu1 %v8924_v50, %s9100_s0 }
0x2bfe   :  { %v8926_v46 = vpop.eup %8925 }
0x2bff   :  { %v4862_v45 = vadd.f32 1.0, %v8926_v46 }
0x2c01   :  { %8927 = vrcp.f32 %v4862_v45 }
0x2c0e   :  { %v8928_v17 = vpop.eup %8927 }
0x2c0f   :  { %v4866_v34 = vmul.f32 %v8928_v17, %v10329_v3 }
0x2c6f   :  { %v4869_v29 = vpop.permute.xlu1 %4868 }
0x2c70   :  { %v4871_v26 = vmul.f32 %v8928_v17, %v4869_v29 }
0x2c72   :  { %4873 = vrot.lane.b32.xlu1 %v4871_v26, %s9101_s4 }
0x2c78   :  { %v4576_v63 = vpop.f32.mrf.mxu1 }
0x2c7a   :  { %v8345_v28 = vpop.f32.mrf.mxu1 }
0x2c80   :  { %v4750_v39 = vpop.f32.mrf.mxu1 }
0x2c81   :  { %v4751_v19 = vadd.f32 %v4750_v39, %v4576_v63 }
0x2c82   :  { %v8367_v56 = vpop.f32.mrf.mxu1 }
0x2c83   :  { %v4754_v23 = vadd.f32 %v10251_v48, %v4751_v19 }
0x2c85   :  { %8929 = vtanh.f32 %v4754_v23  ;;  %v7332_v31 = vmul.f32 -1.442695, %v4754_v23 }
0x2c87   :  { %8931 = vpow2.f32 %v7332_v31 }
0x2c92   :  { %v8930_v30 = vpop.eup %8929 }
0x2c93   :  { %4764 = vrot.lane.b32.xlu0 %v8930_v30, %s9100_s0 }
0x2c94   :  { %v8932_v59 = vpop.eup %8931 }
0x2c95   :  { %v4758_v61 = vadd.f32 1.0, %v8932_v59 }
0x2ce4   :  { %v4874_v44 = vpop.permute.xlu1 %4873 }
0x2ce5   :  { %v10381_v55 = vadd.f32 %v4874_v44, %v4866_v34 }
0x2ce7   :  { %8933 = vtanh.f32 %v10381_v55 }
0x2ce8   :  { %8935 = vrcp.f32 %v4758_v61 }
0x2cf4   :  { %v8934_v12 = vpop.eup %8933 }
0x2cf5   :  { %4879 = vrot.lane.b32.xlu1 %v8934_v12, %s9100_s0  ;;  %v8936_v37 = vpop.eup %8935 }
0x2cf6   :  { %v4762_v3 = vmul.f32 %v8936_v37, %v10336_v16 }
0x2d05   :  { %v4765_v2 = vpop.permute.xlu0 %4764 }
0x2d06   :  { %v4767_v21 = vmul.f32 %v8936_v37, %v4765_v2 }
0x2d08   :  { %4769 = vrot.lane.b32.xlu0 %v4767_v21, %s9101_s4 }
0x2d67   :  { %v4880_v4 = vpop.permute.xlu1 %4879 }
0x2d68   :  { %v4882_v8 = vmul.f32 %v8928_v17, %v4880_v4 }
0x2d6a   :  { %4884 = vrot.lane.b32.xlu1 %v4882_v8, %s9101_s4 }
0x2d7a   :  { %v4770_v36 = vpop.permute.xlu0 %4769 }
0x2d7b   :  { %v10388_v11 = vadd.f32 %v4770_v36, %v4762_v3 }
0x2d7d   :  { %8937 = vtanh.f32 %v10388_v11 }
0x2d8a   :  { %v8938_v9 = vpop.eup %8937 }
0x2d8b   :  { %4775 = vrot.lane.b32.xlu0 %v8938_v9, %s9100_s0 }
0x2ddc   :  { %v4885_v13 = vpop.permute.xlu1 %4884 }
0x2ddd   :  { %8388 = vmatmul.mubr.msk.f32.vlgmr.msra.gmra.mxu1 %vm502_vm3, %v4885_v13 }
0x2dde   :  { %8402 = vmatpush3.msra.mxu1 %v10272_v49  ;;  %8409 = vmatprep.mubr.msk.f32.mxu1 %vm9099_vm1, %v9098_v0 }
0x2ddf   :  { %8403 = vmatprep.subr.mxu1 %v9098_v0 }
0x2de0   :  { %8404 = vmatpush3.msra.mxu1 %v10281_v18 }
0x2de1   :  { %8405 = vmatprep.subr.mxu1 %v9098_v0 }
0x2de2   :  { %8406 = vmatpush3.msra.mxu1 %v10288_v58 }
0x2de3   :  { %8407 = vmatprep.subr.mxu1 %v9098_v0 }
0x2de4   :  { %8408 = vmatpush3.msra.mxu1 %v10295_v24 }
0x2de5   :  { %8423 = vmatprep.subr.mxu1 %v9098_v0 }
0x2dfd   :  { %v4776_v53 = vpop.permute.xlu0 %4775 }
0x2dfe   :  { %v4778_v6 = vmul.f32 %v8936_v37, %v4776_v53 }
0x2e00   :  { %4780 = vrot.lane.b32.xlu0 %v4778_v6, %s9101_s4 }
0x2e72   :  { %v4781_v16 = vpop.permute.xlu0 %4780 }
0x2e73   :  { %4855 = vst.msk [vmem:[#allocation3 + $0x78] sm:$0xff] %vm502_vm3, %v4781_v16  ;;  %8377 = vmatmul.mubr.msk.f32.vlgmr.msra.gmra.mxu0 %vm502_vm3, %v4781_v16 }
0x2e74   :  { %8391 = vmatpush3.msra.mxu0 %v10188_v32  ;;  %8398 = vmatprep.mubr.msk.f32.mxu0 %vm9099_vm1, %v9098_v0 }
0x2e75   :  { %8392 = vmatprep.subr.mxu0 %v9098_v0 }
0x2e76   :  { %8393 = vmatpush3.msra.mxu0 %v10197_v25 }
0x2e77   :  { %8394 = vmatprep.subr.mxu0 %v9098_v0 }
0x2e78   :  { %8395 = vmatpush3.msra.mxu0 %v10204_v35 }
0x2e79   :  { %8396 = vmatprep.subr.mxu0 %v9098_v0 }
0x2e7a   :  { %8397 = vmatpush3.msra.mxu0 %v10211_v38 }
0x2e7b   :  { %8399 = vmatmul.mubr.msk.f32.vlgmr.msra.gmra.mxu0 %vm502_vm3, %v4885_v13  ;;  %8412 = vmatprep.subr.mxu0 %v9098_v0 }
0x2e7c   :  { %8413 = vmatpush3.msra.mxu0 %v10219_v57  ;;  %8420 = vmatprep.mubr.msk.f32.mxu0 %vm9099_vm1, %v9098_v0 }
0x2e7d   :  { %8414 = vmatprep.subr.mxu0 %v9098_v0 }
0x2e7e   :  { %8415 = vmatpush3.msra.mxu0 %v10228_v42 }
0x2e7f   :  { %8416 = vmatprep.subr.mxu0 %v9098_v0 }
0x2e80   :  { %8417 = vmatpush3.msra.mxu0 %v10235_v62 }
0x2e81   :  { %8418 = vmatprep.subr.mxu0 %v9098_v0 }
0x2e82   :  { %8419 = vmatpush3.msra.mxu0 %v10242_v54 }
0x2e83   :  { %8434 = vmatprep.subr.mxu0 %v9098_v0 }
0x2e9d   :  { %v4954_v41 = vpop.f32.mrf.mxu1 }
0x2e9e   :  { %v5132_v47 = vadd.f32 %v4954_v41, %v9310_v52 }
0x2e9f   :  { %v8389_v27 = vpop.f32.mrf.mxu1 }
0x2ea0   :  { %8939 = vtanh.f32 %v5132_v47  ;;  %v7339_v40 = vmul.f32 -1.442695, %v5132_v47 }
0x2ea2   :  { %8941 = vpow2.f32 %v7339_v40 }
0x2ead   :  { %v8940_v51 = vpop.eup %8939 }
0x2eae   :  { %5142 = vrot.lane.b32.xlu1 %v8940_v51, %s9100_s0 }
0x2eaf   :  { %v8942_v15 = vpop.eup %8941 }
0x2eb0   :  { %v5136_v22 = vadd.f32 1.0, %v8942_v15 }
0x2eb2   :  { %8943 = vrcp.f32 %v5136_v22 }
0x2ebf   :  { %v8944_v43 = vpop.eup %8943 }
0x2ec0   :  { %v5140_v28 = vmul.f32 %v8944_v43, %v10381_v55 }
0x2f20   :  { %v5143_v50 = vpop.permute.xlu1 %5142 }
0x2f21   :  { %v5145_v20 = vmul.f32 %v8944_v43, %v5143_v50 }
0x2f23   :  { %5147 = vrot.lane.b32.xlu1 %v5145_v20, %s9101_s4 }
0x2f33   :  { %v4850_v46 = vpop.f32.mrf.mxu0 }
0x2f35   :  { %v8378_v45 = vpop.f32.mrf.mxu0 }
0x2f3b   :  { %v5024_v17 = vpop.f32.mrf.mxu0 }
0x2f3c   :  { %v5025_v29 = vadd.f32 %v5024_v17, %v4850_v46 }
0x2f3d   :  { %v8400_v52 = vpop.f32.mrf.mxu0 }
0x2f3e   :  { %v5028_v26 = vadd.f32 %v10251_v48, %v5025_v29 }
0x2f40   :  { %8945 = vtanh.f32 %v5028_v26  ;;  %v7337_v56 = vmul.f32 -1.442695, %v5028_v26 }
0x2f4d   :  { %v8946_v63 = vpop.eup %8945 }
0x2f4e   :  { %5038 = vrot.lane.b32.xlu0 %v8946_v63, %s9100_s0 }
0x2f95   :  { %v5148_v39 = vpop.permute.xlu1 %5147 }
0x2f96   :  { %v10433_v19 = vadd.f32 %v5148_v39, %v5140_v28 }
0x2f98   :  { %8947 = vtanh.f32 %v10433_v19 }
0x2f99   :  { %8949 = vpow2.f32 %v7337_v56 }
0x2fa5   :  { %v8948_v23 = vpop.eup %8947 }
0x2fa6   :  { %5153 = vrot.lane.b32.xlu1 %v8948_v23, %s9100_s0  ;;  %v8950_v30 = vpop.eup %8949 }
0x2fa7   :  { %v5032_v31 = vadd.f32 1.0, %v8950_v30 }
0x2fa9   :  { %8951 = vrcp.f32 %v5032_v31 }
0x2fb6   :  { %v8952_v34 = vpop.eup %8951 }
0x2fb7   :  { %v5036_v61 = vmul.f32 %v8952_v34, %v10388_v11 }
0x2fc0   :  { %v5039_v44 = vpop.permute.xlu0 %5038 }
0x2fc1   :  { %v5041_v59 = vmul.f32 %v8952_v34, %v5039_v44 }
0x2fc3   :  { %5043 = vrot.lane.b32.xlu0 %v5041_v59, %s9101_s4 }
0x3018   :  { %v5154_v12 = vpop.permute.xlu1 %5153 }
0x3019   :  { %v5156_v55 = vmul.f32 %v8944_v43, %v5154_v12 }
0x301b   :  { %5158 = vrot.lane.b32.xlu1 %v5156_v55, %s9101_s4 }
0x3035   :  { %v5044_v37 = vpop.permute.xlu0 %5043 }
0x3036   :  { %v10440_v2 = vadd.f32 %v5044_v37, %v5036_v61 }
0x3038   :  { %8953 = vtanh.f32 %v10440_v2 }
0x3045   :  { %v8954_v21 = vpop.eup %8953 }
0x3046   :  { %5049 = vrot.lane.b32.xlu0 %v8954_v21, %s9100_s0 }
0x308d   :  { %v5159_v4 = vpop.permute.xlu1 %5158 }
0x308e   :  { %8421 = vmatmul.mubr.msk.f32.vlgmr.msra.gmra.mxu0 %vm502_vm3, %v5159_v4 }
0x308f   :  { %8435 = vmatpush3.msra.mxu0 %v10272_v49  ;;  %8442 = vmatprep.mubr.msk.f32.mxu0 %vm9099_vm1, %v9098_v0 }
0x3090   :  { %8436 = vmatprep.subr.mxu0 %v9098_v0 }
0x3091   :  { %8437 = vmatpush3.msra.mxu0 %v10281_v18 }
0x3092   :  { %8438 = vmatprep.subr.mxu0 %v9098_v0 }
0x3093   :  { %8439 = vmatpush3.msra.mxu0 %v10288_v58 }
0x3094   :  { %8440 = vmatprep.subr.mxu0 %v9098_v0 }
0x3095   :  { %8441 = vmatpush3.msra.mxu0 %v10295_v24 }
0x3096   :  { %8456 = vmatprep.subr.mxu0 %v9098_v0 }
0x30b8   :  { %v5050_v8 = vpop.permute.xlu0 %5049 }
0x30b9   :  { %v5052_v3 = vmul.f32 %v8952_v34, %v5050_v8 }
0x30bb   :  { %5054 = vrot.lane.b32.xlu0 %v5052_v3, %s9101_s4 }
0x312d   :  { %v5055_v36 = vpop.permute.xlu0 %5054 }
0x312e   :  { %5129 = vst.msk [vmem:[#allocation3 + $0x80] sm:$0xff] %vm502_vm3, %v5055_v36  ;;  %8410 = vmatmul.mubr.msk.f32.vlgmr.msra.gmra.mxu1 %vm502_vm3, %v5055_v36 }
0x312f   :  { %8424 = vmatpush3.msra.mxu1 %v10188_v32  ;;  %8431 = vmatprep.mubr.msk.f32.mxu1 %vm9099_vm1, %v9098_v0 }
0x3130   :  { %8425 = vmatprep.subr.mxu1 %v9098_v0 }
0x3131   :  { %8426 = vmatpush3.msra.mxu1 %v10197_v25 }
0x3132   :  { %8427 = vmatprep.subr.mxu1 %v9098_v0 }
0x3133   :  { %8428 = vmatpush3.msra.mxu1 %v10204_v35 }
0x3134   :  { %8429 = vmatprep.subr.mxu1 %v9098_v0 }
0x3135   :  { %8430 = vmatpush3.msra.mxu1 %v10211_v38 }
0x3136   :  { %8432 = vmatmul.mubr.msk.f32.vlgmr.msra.gmra.mxu1 %vm502_vm3, %v5159_v4  ;;  %8445 = vmatprep.subr.mxu1 %v9098_v0 }
0x3137   :  { %8446 = vmatpush3.msra.mxu1 %v10219_v57  ;;  %8453 = vmatprep.mubr.msk.f32.mxu1 %vm9099_vm1, %v9098_v0 }
0x3138   :  { %8447 = vmatprep.subr.mxu1 %v9098_v0 }
0x3139   :  { %8448 = vmatpush3.msra.mxu1 %v10228_v42 }
0x313a   :  { %8449 = vmatprep.subr.mxu1 %v9098_v0 }
0x313b   :  { %8450 = vmatpush3.msra.mxu1 %v10235_v62 }
0x313c   :  { %8451 = vmatprep.subr.mxu1 %v9098_v0 }
0x313d   :  { %8452 = vmatpush3.msra.mxu1 %v10242_v54 }
0x313e   :  { %8467 = vmatprep.subr.mxu1 %v9098_v0 }
0x314e   :  { %v5228_v11 = vpop.f32.mrf.mxu0 }
0x314f   :  { %v5406_v9 = vadd.f32 %v5228_v11, %v9328_v1 }
0x3150   :  { %v8422_v13 = vpop.f32.mrf.mxu0 }
0x3151   :  { %8955 = vtanh.f32 %v5406_v9  ;;  %v7344_v6 = vmul.f32 -1.442695, %v5406_v9 }
0x3153   :  { %8957 = vpow2.f32 %v7344_v6 }
0x315e   :  { %v8956_v53 = vpop.eup %8955 }
0x315f   :  { %5416 = vrot.lane.b32.xlu1 %v8956_v53, %s9100_s0 }
0x3160   :  { %v8958_v16 = vpop.eup %8957 }
0x3161   :  { %v5410_v41 = vadd.f32 1.0, %v8958_v16 }
0x3163   :  { %8959 = vrcp.f32 %v5410_v41 }
0x3170   :  { %v8960_v47 = vpop.eup %8959 }
0x3171   :  { %v5414_v46 = vmul.f32 %v8960_v47, %v10433_v19 }
0x31d1   :  { %v5417_v27 = vpop.permute.xlu1 %5416 }
0x31d2   :  { %v5419_v51 = vmul.f32 %v8960_v47, %v5417_v27 }
0x31d4   :  { %5421 = vrot.lane.b32.xlu1 %v5419_v51, %s9101_s4 }
0x31ee   :  { %v5124_v40 = vpop.f32.mrf.mxu1 }
0x31f0   :  { %v8411_v15 = vpop.f32.mrf.mxu1 }
0x31f6   :  { %v5298_v22 = vpop.f32.mrf.mxu1 }
0x31f7   :  { %v5299_v43 = vadd.f32 %v5298_v22, %v5124_v40 }
0x31f8   :  { %v8433_v1 = vpop.f32.mrf.mxu1 }
0x31f9   :  { %v5302_v50 = vadd.f32 %v10251_v48, %v5299_v43 }
0x31fb   :  { %8961 = vtanh.f32 %v5302_v50  ;;  %v7342_v52 = vmul.f32 -1.442695, %v5302_v50 }
0x3208   :  { %v8962_v20 = vpop.eup %8961 }
0x3209   :  { %5312 = vrot.lane.b32.xlu0 %v8962_v20, %s9100_s0 }
0x3246   :  { %v5422_v45 = vpop.permute.xlu1 %5421 }
0x3247   :  { %v10485_v17 = vadd.f32 %v5422_v45, %v5414_v46 }
0x3249   :  { %8963 = vtanh.f32 %v10485_v17 }
0x324a   :  { %8965 = vpow2.f32 %v7342_v52 }
0x3256   :  { %v8964_v29 = vpop.eup %8963 }
0x3257   :  { %5427 = vrot.lane.b32.xlu1 %v8964_v29, %s9100_s0  ;;  %v8966_v26 = vpop.eup %8965 }
0x3258   :  { %v5306_v63 = vadd.f32 1.0, %v8966_v26 }
0x325a   :  { %8967 = vrcp.f32 %v5306_v63 }
0x3267   :  { %v8968_v28 = vpop.eup %8967 }
0x3268   :  { %v5310_v30 = vmul.f32 %v8968_v28, %v10440_v2 }
0x327b   :  { %v5313_v39 = vpop.permute.xlu0 %5312 }
0x327c   :  { %v5315_v56 = vmul.f32 %v8968_v28, %v5313_v39 }
0x327e   :  { %5317 = vrot.lane.b32.xlu0 %v5315_v56, %s9101_s4 }
0x32c9   :  { %v5428_v23 = vpop.permute.xlu1 %5427 }
0x32ca   :  { %v5430_v19 = vmul.f32 %v8960_v47, %v5428_v23 }
0x32cc   :  { %5432 = vrot.lane.b32.xlu1 %v5430_v19, %s9101_s4 }
0x32f0   :  { %v5318_v31 = vpop.permute.xlu0 %5317 }
0x32f1   :  { %v10492_v34 = vadd.f32 %v5318_v31, %v5310_v30 }
0x32f3   :  { %8969 = vtanh.f32 %v10492_v34 }
0x3300   :  { %v8970_v44 = vpop.eup %8969 }
0x3301   :  { %5323 = vrot.lane.b32.xlu0 %v8970_v44, %s9100_s0 }
0x333e   :  { %v5433_v59 = vpop.permute.xlu1 %5432 }
0x333f   :  { %8454 = vmatmul.mubr.msk.f32.vlgmr.msra.gmra.mxu1 %vm502_vm3, %v5433_v59 }
0x3340   :  { %8468 = vmatpush3.msra.mxu1 %v10272_v49  ;;  %8475 = vmatprep.mubr.msk.f32.mxu1 %vm9099_vm1, %v9098_v0 }
0x3341   :  { %8469 = vmatprep.subr.mxu1 %v9098_v0 }
0x3342   :  { %8470 = vmatpush3.msra.mxu1 %v10281_v18 }
0x3343   :  { %8471 = vmatprep.subr.mxu1 %v9098_v0 }
0x3344   :  { %8472 = vmatpush3.msra.mxu1 %v10288_v58 }
0x3345   :  { %8473 = vmatprep.subr.mxu1 %v9098_v0 }
0x3346   :  { %8474 = vmatpush3.msra.mxu1 %v10295_v24 }
0x3347   :  { %8489 = vmatprep.subr.mxu1 %v9098_v0 }
0x3373   :  { %v5324_v12 = vpop.permute.xlu0 %5323 }
0x3374   :  { %v5326_v55 = vmul.f32 %v8968_v28, %v5324_v12 }
0x3376   :  { %5328 = vrot.lane.b32.xlu0 %v5326_v55, %s9101_s4 }
0x33e8   :  { %v5329_v61 = vpop.permute.xlu0 %5328 }
0x33e9   :  { %5403 = vst.msk [vmem:[#allocation3 + $0x88] sm:$0xff] %vm502_vm3, %v5329_v61  ;;  %8443 = vmatmul.mubr.msk.f32.vlgmr.msra.gmra.mxu0 %vm502_vm3, %v5329_v61 }
0x33ea   :  { %8457 = vmatpush3.msra.mxu0 %v10188_v32  ;;  %8464 = vmatprep.mubr.msk.f32.mxu0 %vm9099_vm1, %v9098_v0 }
0x33eb   :  { %8458 = vmatprep.subr.mxu0 %v9098_v0 }
0x33ec   :  { %8459 = vmatpush3.msra.mxu0 %v10197_v25 }
0x33ed   :  { %8460 = vmatprep.subr.mxu0 %v9098_v0 }
0x33ee   :  { %8461 = vmatpush3.msra.mxu0 %v10204_v35 }
0x33ef   :  { %8462 = vmatprep.subr.mxu0 %v9098_v0 }
0x33f0   :  { %8463 = vmatpush3.msra.mxu0 %v10211_v38 }
0x33f1   :  { %8465 = vmatmul.mubr.msk.f32.vlgmr.msra.gmra.mxu0 %vm502_vm3, %v5433_v59  ;;  %8478 = vmatprep.subr.mxu0 %v9098_v0 }
0x33f2   :  { %8479 = vmatpush3.msra.mxu0 %v10219_v57  ;;  %8486 = vmatprep.mubr.msk.f32.mxu0 %vm9099_vm1, %v9098_v0 }
0x33f3   :  { %8480 = vmatprep.subr.mxu0 %v9098_v0 }
0x33f4   :  { %8481 = vmatpush3.msra.mxu0 %v10228_v42 }
0x33f5   :  { %8482 = vmatprep.subr.mxu0 %v9098_v0 }
0x33f6   :  { %8483 = vmatpush3.msra.mxu0 %v10235_v62 }
0x33f7   :  { %8484 = vmatprep.subr.mxu0 %v9098_v0 }
0x33f8   :  { %8485 = vmatpush3.msra.mxu0 %v10242_v54 }
0x33f9   :  { %8500 = vmatprep.subr.mxu0 %v9098_v0 }
0x33ff   :  { %v5502_v37 = vpop.f32.mrf.mxu1 }
0x3400   :  { %v5680_v2 = vadd.f32 %v5502_v37, %v9322_v60 }
0x3401   :  { %v8455_v21 = vpop.f32.mrf.mxu1 }
0x3402   :  { %8971 = vtanh.f32 %v5680_v2  ;;  %v7349_v8 = vmul.f32 -1.442695, %v5680_v2 }
0x3404   :  { %8973 = vpow2.f32 %v7349_v8 }
0x340f   :  { %v8972_v4 = vpop.eup %8971 }
0x3410   :  { %5690 = vrot.lane.b32.xlu1 %v8972_v4, %s9100_s0 }
0x3411   :  { %v8974_v3 = vpop.eup %8973 }
0x3412   :  { %v5684_v36 = vadd.f32 1.0, %v8974_v3 }
0x3414   :  { %8975 = vrcp.f32 %v5684_v36 }
0x3421   :  { %v8976_v11 = vpop.eup %8975 }
0x3422   :  { %v5688_v51 = vmul.f32 %v8976_v11, %v10485_v17 }
0x3482   :  { %v5691_v9 = vpop.permute.xlu1 %5690 }
0x3483   :  { %v5693_v13 = vmul.f32 %v8976_v11, %v5691_v9 }
0x3485   :  { %5695 = vrot.lane.b32.xlu1 %v5693_v13, %s9101_s4 }
0x34a9   :  { %v5398_v53 = vpop.f32.mrf.mxu0 }
0x34ab   :  { %v8444_v6 = vpop.f32.mrf.mxu0 }
0x34b1   :  { %v5572_v16 = vpop.f32.mrf.mxu0 }
0x34b2   :  { %v5573_v41 = vadd.f32 %v5572_v16, %v5398_v53 }
0x34b3   :  { %v8466_v60 = vpop.f32.mrf.mxu0 }
0x34b4   :  { %v5576_v47 = vadd.f32 %v10251_v48, %v5573_v41 }
0x34b6   :  { %8977 = vtanh.f32 %v5576_v47  ;;  %v7347_v43 = vmul.f32 -1.442695, %v5576_v47 }
0x34c3   :  { %v8978_v27 = vpop.eup %8977 }
0x34c4   :  { %5586 = vrot.lane.b32.xlu0 %v8978_v27, %s9100_s0 }
0x34f7   :  { %v5696_v40 = vpop.permute.xlu1 %5695 }
0x34f8   :  { %v10537_v15 = vadd.f32 %v5696_v40, %v5688_v51 }
0x34fa   :  { %8979 = vtanh.f32 %v10537_v15 }
0x34fb   :  { %8981 = vpow2.f32 %v7347_v43  ;;  %v10641_v43 = vld [vmem:[%s10999_s6] sm:$0xff] }
0x3507   :  { %v8980_v22 = vpop.eup %8979 }
0x3508   :  { %5701 = vrot.lane.b32.xlu1 %v8980_v22, %s9100_s0  ;;  %v8982_v1 = vpop.eup %8981  ;;  %v10634_v22 = vld [vmem:[%s10999_s6 + $0x8] sm:$0xff] }
0x3509   :  { %v5580_v50 = vadd.f32 1.0, %v8982_v1  ;;  %v10658_v1 = vld [vmem:[%s10998_s5 + $0x10] sm:$0xff] }
0x350b   :  { %8983 = vrcp.f32 %v5580_v50  ;;  %v10665_v50 = vld [vmem:[%s10998_s5 + $0x8] sm:$0xff] }
0x3518   :  { %v8984_v20 = vpop.eup %8983 }
0x3519   :  { %v5584_v52 = vmul.f32 %v8984_v20, %v10492_v34 }
0x3536   :  { %v5587_v46 = vpop.permute.xlu0 %5586 }
0x3537   :  { %v5589_v45 = vmul.f32 %v8984_v20, %v5587_v46 }
0x3539   :  { %5591 = vrot.lane.b32.xlu0 %v5589_v45, %s9101_s4 }
0x357a   :  { %v5702_v29 = vpop.permute.xlu1 %5701 }
0x357b   :  { %v5704_v17 = vmul.f32 %v8976_v11, %v5702_v29 }
0x357d   :  { %5706 = vrot.lane.b32.xlu1 %v5704_v17, %s9101_s4 }
0x35ab   :  { %v5592_v26 = vpop.permute.xlu0 %5591 }
0x35ac   :  { %v10544_v63 = vadd.f32 %v5592_v26, %v5584_v52 }
0x35ae   :  { %8985 = vtanh.f32 %v10544_v63 }
0x35bb   :  { %v8986_v28 = vpop.eup %8985 }
0x35bc   :  { %5597 = vrot.lane.b32.xlu0 %v8986_v28, %s9100_s0 }
0x35ef   :  { %v5707_v39 = vpop.permute.xlu1 %5706 }
0x35f0   :  { %8487 = vmatmul.mubr.msk.f32.vlgmr.msra.gmra.mxu0 %vm502_vm3, %v5707_v39 }
0x35f1   :  { %8501 = vmatpush3.msra.mxu0 %v10272_v49  ;;  %8508 = vmatprep.mubr.msk.f32.mxu0 %vm9099_vm1, %v9098_v0 }
0x35f2   :  { %8502 = vmatprep.subr.mxu0 %v9098_v0 }
0x35f3   :  { %8503 = vmatpush3.msra.mxu0 %v10281_v18 }
0x35f4   :  { %8504 = vmatprep.subr.mxu0 %v9098_v0 }
0x35f5   :  { %8505 = vmatpush3.msra.mxu0 %v10288_v58 }
0x35f6   :  { %8506 = vmatprep.subr.mxu0 %v9098_v0 }
0x35f7   :  { %8507 = vmatpush3.msra.mxu0 %v10295_v24 }
0x35f8   :  { %8522 = vmatprep.subr.mxu0 %v9098_v0 }
0x362e   :  { %v5598_v56 = vpop.permute.xlu0 %5597 }
0x362f   :  { %v5600_v23 = vmul.f32 %v8984_v20, %v5598_v56  ;;  %v10672_v20 = vld [vmem:[%s10998_s5] sm:$0xff] }
0x3631   :  { %5602 = vrot.lane.b32.xlu0 %v5600_v23, %s9101_s4 }
0x36a3   :  { %v5603_v19 = vpop.permute.xlu0 %5602 }
0x36a4   :  { %5677 = vst.msk [vmem:[#allocation3 + $0x90] sm:$0xff] %vm502_vm3, %v5603_v19  ;;  %8476 = vmatmul.mubr.msk.f32.vlgmr.msra.gmra.mxu1 %vm502_vm3, %v5603_v19 }
0x36a5   :  { %8490 = vmatpush3.msra.mxu1 %v10188_v32  ;;  %8497 = vmatprep.mubr.msk.f32.mxu1 %vm9099_vm1, %v9098_v0 }
0x36a6   :  { %8491 = vmatprep.subr.mxu1 %v9098_v0 }
0x36a7   :  { %8492 = vmatpush3.msra.mxu1 %v10197_v25 }
0x36a8   :  { %8493 = vmatprep.subr.mxu1 %v9098_v0 }
0x36a9   :  { %8494 = vmatpush3.msra.mxu1 %v10204_v35 }
0x36aa   :  { %8495 = vmatprep.subr.mxu1 %v9098_v0 }
0x36ab   :  { %8496 = vmatpush3.msra.mxu1 %v10211_v38 }
0x36ac   :  { %8498 = vmatmul.mubr.msk.f32.vlgmr.msra.gmra.mxu1 %vm502_vm3, %v5707_v39  ;;  %8511 = vmatprep.subr.mxu1 %v9098_v0 }
0x36ad   :  { %8512 = vmatpush3.msra.mxu1 %v10219_v57  ;;  %8519 = vmatprep.mubr.msk.f32.mxu1 %vm9099_vm1, %v9098_v0 }
0x36ae   :  { %8513 = vmatprep.subr.mxu1 %v9098_v0 }
0x36af   :  { %8514 = vmatpush3.msra.mxu1 %v10228_v42 }
0x36b0   :  { %v5776_v32 = vpop.f32.mrf.mxu0  ;;  %8515 = vmatprep.subr.mxu1 %v9098_v0 }
0x36b1   :  { %v5954_v25 = vadd.f32 %v5776_v32, %v9340_v10  ;;  %8516 = vmatpush3.msra.mxu1 %v10235_v62  ;;  %v10681_v32 = vld [vmem:[%s11000_s8] ss:$0 sm:$0xff] }
0x36b2   :  { %v8488_v35 = vpop.f32.mrf.mxu0  ;;  %8517 = vmatprep.subr.mxu1 %v9098_v0 }
0x36b3   :  { %8987 = vtanh.f32 %v5954_v25  ;;  %8518 = vmatpush3.msra.mxu1 %v10242_v54  ;;  %v7354_v57 = vmul.f32 -1.442695, %v5954_v25 }
0x36b4   :  { %8533 = vmatprep.subr.mxu1 %v9098_v0 }
0x36b5   :  { %8989 = vpow2.f32 %v7354_v57 }
0x36c0   :  { %v8988_v38 = vpop.eup %8987 }
0x36c1   :  { %5964 = vrot.lane.b32.xlu1 %v8988_v38, %s9100_s0 }
0x36c2   :  { %v8990_v42 = vpop.eup %8989 }
0x36c3   :  { %v5958_v30 = vadd.f32 1.0, %v8990_v42 }
0x36c5   :  { %8991 = vrcp.f32 %v5958_v30 }
0x36d2   :  { %v8992_v31 = vpop.eup %8991 }
0x36d3   :  { %v5962_v37 = vmul.f32 %v8992_v31, %v10537_v15 }
0x3733   :  { %v5965_v10 = vpop.permute.xlu1 %5964 }
0x3734   :  { %v5967_v34 = vmul.f32 %v8992_v31, %v5965_v10 }
0x3736   :  { %5969 = vrot.lane.b32.xlu1 %v5967_v34, %s9101_s4 }
0x3764   :  { %v5672_v62 = vpop.f32.mrf.mxu1 }
0x3766   :  { %v8477_v44 = vpop.f32.mrf.mxu1 }
0x376c   :  { %v5846_v59 = vpop.f32.mrf.mxu1 }
0x376d   :  { %v5847_v12 = vadd.f32 %v5846_v59, %v5672_v62 }
0x376e   :  { %v8499_v54 = vpop.f32.mrf.mxu1 }
0x376f   :  { %v5850_v55 = vadd.f32 %v10251_v48, %v5847_v12 }
0x3771   :  { %8993 = vtanh.f32 %v5850_v55  ;;  %v7352_v8 = vmul.f32 -1.442695, %v5850_v55 }
0x377e   :  { %v8994_v61 = vpop.eup %8993 }
0x377f   :  { %5860 = vrot.lane.b32.xlu0 %v8994_v61, %s9100_s0 }
0x37a8   :  { %v5970_v2 = vpop.permute.xlu1 %5969 }
0x37a9   :  { %v10589_v21 = vadd.f32 %v5970_v2, %v5962_v37 }
0x37ab   :  { %8995 = vtanh.f32 %v10589_v21 }
0x37ac   :  { %8997 = vpow2.f32 %v7352_v8  ;;  %v10710_v8 = vld [vmem:[%s11001_s7 + $0x10] sm:$0xff] }
0x37b8   :  { %v8996_v4 = vpop.eup %8995 }
0x37b9   :  { %5975 = vrot.lane.b32.xlu1 %v8996_v4, %s9100_s0  ;;  %v8998_v3 = vpop.eup %8997  ;;  %v10701_v4 = vld [vmem:[%s11001_s7 + $0x18] sm:$0xff] }
0x37ba   :  { %v5854_v36 = vadd.f32 1.0, %v8998_v3  ;;  %v10717_v3 = vld [vmem:[%s11001_s7 + $0x8] sm:$0xff] }
0x37bc   :  { %8999 = vrcp.f32 %v5854_v36  ;;  %v10724_v36 = vld [vmem:[%s11001_s7] sm:$0xff] }
0x37c9   :  { %v9000_v48 = vpop.eup %8999 }
0x37ca   :  { %v5858_v6 = vmul.f32 %v9000_v48, %v10544_v63 }
0x37f1   :  { %v5861_v11 = vpop.permute.xlu0 %5860 }
0x37f2   :  { %v5863_v9 = vmul.f32 %v9000_v48, %v5861_v11 }
0x37f4   :  { %5865 = vrot.lane.b32.xlu0 %v5863_v9, %s9101_s4  ;;  %v428_v9 = vadd.f32 %v9566_v7, %v9285_v33 }
0x382b   :  { %v5976_v13 = vpop.permute.xlu1 %5975 }
0x382c   :  { %v5978_v53 = vmul.f32 %v8992_v31, %v5976_v13 }
0x382e   :  { %5980 = vrot.lane.b32.xlu1 %v5978_v53, %s9101_s4 }
0x3866   :  { %v5866_v16 = vpop.permute.xlu0 %5865 }
0x3867   :  { %v10596_v41 = vadd.f32 %v5866_v16, %v5858_v6 }
0x3869   :  { %9001 = vtanh.f32 %v10596_v41 }
0x3876   :  { %v9002_v60 = vpop.eup %9001 }
0x3877   :  { %5871 = vrot.lane.b32.xlu0 %v9002_v60, %s9100_s0 }
0x38a0   :  { %v5981_v47 = vpop.permute.xlu1 %5980 }
0x38a1   :  { %8520 = vmatmul.mubr.msk.f32.vlgmr.msra.gmra.mxu1 %vm502_vm3, %v5981_v47 }
0x38a2   :  { %8534 = vmatpush3.msra.mxu1 %v10272_v49  ;;  %8541 = vmatprep.mubr.msk.f32.mxu1 %vm9099_vm1, %v9098_v0 }
0x38a3   :  { %8535 = vmatprep.subr.mxu1 %v9098_v0 }
0x38a4   :  { %8536 = vmatpush3.msra.mxu1 %v10281_v18  ;;  %v10617_v18 = vld [vmem:[%s10999_s6 + $0x18] sm:$0xff] }
0x38a5   :  { %8537 = vmatprep.subr.mxu1 %v9098_v0 }
0x38a6   :  { %8538 = vmatpush3.msra.mxu1 %v10288_v58 }
0x38a7   :  { %8539 = vmatprep.subr.mxu1 %v9098_v0 }
0x38a8   :  { %8540 = vmatpush3.msra.mxu1 %v10295_v24  ;;  %v10626_v24 = vld [vmem:[%s10999_s6 + $0x10] sm:$0xff] }
0x38a9   :  { %8555 = vmatprep.subr.mxu1 %v9098_v0 }
0x38e9   :  { %v5872_v27 = vpop.permute.xlu0 %5871 }
0x38ea   :  { %v5874_v51 = vmul.f32 %v9000_v48, %v5872_v27 }
0x38ec   :  { %5876 = vrot.lane.b32.xlu0 %v5874_v51, %s9101_s4 }
0x395e   :  { %v5877_v49 = vpop.permute.xlu0 %5876 }
0x395f   :  { %5951 = vst.msk [vmem:[#allocation3 + $0x98] sm:$0xff] %vm502_vm3, %v5877_v49  ;;  %8509 = vmatmul.mubr.msk.f32.vlgmr.msra.gmra.mxu0 %vm502_vm3, %v5877_v49 }
0x3960   :  { %8523 = vmatpush3.msra.mxu0 %v10617_v18  ;;  %8530 = vmatprep.mubr.msk.f32.mxu0 %vm9099_vm1, %v9098_v0 }
0x3961   :  { %8524 = vmatprep.subr.mxu0 %v9098_v0  ;;  %v6050_v58 = vpop.f32.mrf.mxu1 }
0x3962   :  { %8525 = vmatpush3.msra.mxu0 %v10626_v24  ;;  %v6228_v40 = vadd.f32 %v6050_v58, %v9334_v5  ;;  %v10649_v5 = vld [vmem:[%s10998_s5 + $0x18] sm:$0xff] }
0x3963   :  { %8526 = vmatprep.subr.mxu0 %v9098_v0  ;;  %v8521_v15 = vpop.f32.mrf.mxu1 }
0x3964   :  { %8527 = vmatpush3.msra.mxu0 %v10634_v22  ;;  %9003 = vtanh.f32 %v6228_v40  ;;  %v7359_v45 = vmul.f32 -1.442695, %v6228_v40 }
0x3965   :  { %8528 = vmatprep.subr.mxu0 %v9098_v0 }
0x3966   :  { %8529 = vmatpush3.msra.mxu0 %v10641_v43  ;;  %9005 = vpow2.f32 %v7359_v45 }
0x3967   :  { %8531 = vmatmul.mubr.msk.f32.vlgmr.msra.gmra.mxu0 %vm502_vm3, %v5981_v47  ;;  %8544 = vmatprep.subr.mxu0 %v9098_v0 }
0x3968   :  { %8545 = vmatpush3.msra.mxu0 %v10649_v5  ;;  %8552 = vmatprep.mubr.msk.f32.mxu0 %vm9099_vm1, %v9098_v0 }
0x3969   :  { %8546 = vmatprep.subr.mxu0 %v9098_v0 }
0x396a   :  { %8547 = vmatpush3.msra.mxu0 %v10658_v1 }
0x396b   :  { %8548 = vmatprep.subr.mxu0 %v9098_v0 }
0x396c   :  { %8549 = vmatpush3.msra.mxu0 %v10665_v50 }
0x396d   :  { %8550 = vmatprep.subr.mxu0 %v9098_v0 }
0x396e   :  { %8551 = vmatpush3.msra.mxu0 %v10672_v20 }
0x396f   :  { %8566 = vmatprep.subr.mxu0 %v9098_v0 }
0x3971   :  { %v9004_v46 = vpop.eup %9003 }
0x3972   :  { %6238 = vrot.lane.b32.xlu1 %v9004_v46, %s9100_s0 }
0x3973   :  { %v9006_v29 = vpop.eup %9005 }
0x3974   :  { %v6232_v17 = vadd.f32 1.0, %v9006_v29 }
0x3976   :  { %9007 = vrcp.f32 %v6232_v17 }
0x3983   :  { %v9008_v52 = vpop.eup %9007 }
0x3984   :  { %v6236_v38 = vmul.f32 %v9008_v52, %v10589_v21 }
0x39e4   :  { %v6239_v26 = vpop.permute.xlu1 %6238 }
0x39e5   :  { %v6241_v63 = vmul.f32 %v9008_v52, %v6239_v26 }
0x39e7   :  { %6243 = vrot.lane.b32.xlu1 %v6241_v63, %s9101_s4 }
0x3a1f   :  { %v5946_v28 = vpop.f32.mrf.mxu0 }
0x3a21   :  { %v8510_v39 = vpop.f32.mrf.mxu0 }
0x3a27   :  { %v6120_v56 = vpop.f32.mrf.mxu0 }
0x3a28   :  { %v6121_v23 = vadd.f32 %v6120_v56, %v5946_v28 }
0x3a29   :  { %v8532_v19 = vpop.f32.mrf.mxu0 }
0x3a2a   :  { %v6124_v25 = vadd.f32 %v10681_v32, %v6121_v23 }
0x3a2c   :  { %9009 = vtanh.f32 %v6124_v25  ;;  %v7357_v31 = vmul.f32 -1.442695, %v6124_v25 }
0x3a39   :  { %v9010_v35 = vpop.eup %9009 }
0x3a3a   :  { %6134 = vrot.lane.b32.xlu0 %v9010_v35, %s9100_s0 }
0x3a59   :  { %v6244_v57 = vpop.permute.xlu1 %6243 }
0x3a5a   :  { %v10686_v42 = vadd.f32 %v6244_v57, %v6236_v38 }
0x3a5c   :  { %9011 = vtanh.f32 %v10686_v42 }
0x3a5d   :  { %9013 = vpow2.f32 %v7357_v31 }
0x3a69   :  { %v9012_v30 = vpop.eup %9011 }
0x3a6a   :  { %6249 = vrot.lane.b32.xlu1 %v9012_v30, %s9100_s0  ;;  %v9014_v10 = vpop.eup %9013 }
0x3a6b   :  { %v6128_v34 = vadd.f32 1.0, %v9014_v10 }
0x3a6d   :  { %9015 = vrcp.f32 %v6128_v34 }
0x3a7a   :  { %v9016_v62 = vpop.eup %9015 }
0x3a7b   :  { %v6132_v55 = vmul.f32 %v9016_v62, %v10596_v41 }
0x3aac   :  { %v6135_v44 = vpop.permute.xlu0 %6134 }
0x3aad   :  { %v6137_v59 = vmul.f32 %v9016_v62, %v6135_v44 }
0x3aaf   :  { %6139 = vrot.lane.b32.xlu0 %v6137_v59, %s9101_s4 }
0x3adc   :  { %v6250_v12 = vpop.permute.xlu1 %6249 }
0x3add   :  { %v6252_v54 = vmul.f32 %v9008_v52, %v6250_v12 }
0x3adf   :  { %6254 = vrot.lane.b32.xlu1 %v6252_v54, %s9101_s4 }
0x3b21   :  { %v6140_v61 = vpop.permute.xlu0 %6139 }
0x3b22   :  { %v10693_v37 = vadd.f32 %v6140_v61, %v6132_v55 }
0x3b24   :  { %9017 = vtanh.f32 %v10693_v37 }
0x3b31   :  { %v9018_v2 = vpop.eup %9017 }
0x3b32   :  { %6145 = vrot.lane.b32.xlu0 %v9018_v2, %s9100_s0 }
0x3b51   :  { %v6255_v21 = vpop.permute.xlu1 %6254 }
0x3b52   :  { %8553 = vmatmul.mubr.msk.f32.vlgmr.msra.gmra.mxu0 %vm502_vm3, %v6255_v21 }
0x3b53   :  { %8567 = vmatpush3.msra.mxu0 %v10701_v4  ;;  %8574 = vmatprep.mubr.msk.f32.mxu0 %vm9099_vm1, %v9098_v0 }
0x3b54   :  { %8568 = vmatprep.subr.mxu0 %v9098_v0 }
0x3b55   :  { %8569 = vmatpush3.msra.mxu0 %v10710_v8 }
0x3b56   :  { %8570 = vmatprep.subr.mxu0 %v9098_v0 }
0x3b57   :  { %8571 = vmatpush3.msra.mxu0 %v10717_v3 }
0x3b58   :  { %8572 = vmatprep.subr.mxu0 %v9098_v0 }
0x3b59   :  { %8573 = vmatpush3.msra.mxu0 %v10724_v36 }
0x3b5a   :  { %8588 = vmatprep.subr.mxu0 %v9098_v0 }
0x3ba4   :  { %v6146_v48 = vpop.permute.xlu0 %6145 }
0x3ba5   :  { %v6148_v11 = vmul.f32 %v9016_v62, %v6146_v48 }
0x3ba7   :  { %6150 = vrot.lane.b32.xlu0 %v6148_v11, %s9101_s4 }
0x3c12   :  { %v6324_v13 = vpop.f32.mrf.mxu0 }
0x3c13   :  { %v6502_v53 = vadd.f32 %v6324_v13, %v428_v9 }
0x3c14   :  { %v8554_v6 = vpop.f32.mrf.mxu0 }
0x3c15   :  { %9019 = vtanh.f32 %v6502_v53  ;;  %v7364_v7 = vmul.f32 -1.442695, %v6502_v53 }
0x3c17   :  { %9021 = vpow2.f32 %v7364_v7 }
0x3c19   :  { %v6151_v16 = vpop.permute.xlu0 %6150 }
0x3c1a   :  { %6225 = vst.msk [vmem:[#allocation3 + $0xa0] sm:$0xff] %vm502_vm3, %v6151_v16  ;;  %8542 = vmatmul.mubr.msk.f32.vlgmr.msra.gmra.mxu1 %vm502_vm3, %v6151_v16 }
0x3c1b   :  { %8556 = vmatpush3.msra.mxu1 %v10617_v18  ;;  %8563 = vmatprep.mubr.msk.f32.mxu1 %vm9099_vm1, %v9098_v0 }
0x3c1c   :  { %8557 = vmatprep.subr.mxu1 %v9098_v0 }
0x3c1d   :  { %8558 = vmatpush3.msra.mxu1 %v10626_v24 }
0x3c1e   :  { %8559 = vmatprep.subr.mxu1 %v9098_v0 }
0x3c1f   :  { %8560 = vmatpush3.msra.mxu1 %v10634_v22 }
0x3c20   :  { %8561 = vmatprep.subr.mxu1 %v9098_v0 }
0x3c21   :  { %8562 = vmatpush3.msra.mxu1 %v10641_v43 }
0x3c22   :  { %v9020_v33 = vpop.eup %9019  ;;  %8564 = vmatmul.mubr.msk.f32.vlgmr.msra.gmra.mxu1 %vm502_vm3, %v6255_v21  ;;  %8577 = vmatprep.subr.mxu1 %v9098_v0 }
0x3c23   :  { %6512 = vrot.lane.b32.xlu1 %v9020_v33, %s9100_s0  ;;  %8578 = vmatpush3.msra.mxu1 %v10649_v5 }
0x3c24   :  { %8579 = vmatprep.subr.mxu1 %v9098_v0  ;;  %8585 = vmatprep.mubr.msk.f32.mxu1 %vm9099_vm1, %v9098_v0  ;;  %v9022_v41 = vpop.eup %9021 }
0x3c25   :  { %8580 = vmatpush3.msra.mxu1 %v10658_v1  ;;  %v6506_v60 = vadd.f32 1.0, %v9022_v41 }
0x3c26   :  { %8581 = vmatprep.subr.mxu1 %v9098_v0 }
0x3c27   :  { %8582 = vmatpush3.msra.mxu1 %v10665_v50  ;;  %9023 = vrcp.f32 %v6506_v60 }
0x3c28   :  { %8583 = vmatprep.subr.mxu1 %v9098_v0 }
0x3c29   :  { %8584 = vmatpush3.msra.mxu1 %v10672_v20 }
0x3c2a   :  { %8599 = vmatprep.subr.mxu1 %v9098_v0 }
0x3c34   :  { %v9024_v47 = vpop.eup %9023 }
0x3c35   :  { %v6510_v20 = vmul.f32 %v9024_v47, %v10686_v42 }
0x3c95   :  { %v6513_v27 = vpop.permute.xlu1 %6512 }
0x3c96   :  { %v6515_v51 = vmul.f32 %v9024_v47, %v6513_v27  ;;  %v6933_v27 = vld [vmem:[%s11002_s9 + $0x18] sm:$0xff] }
0x3c98   :  { %6517 = vrot.lane.b32.xlu1 %v6515_v51, %s9101_s4 }
0x3cda   :  { %v6220_v49 = vpop.f32.mrf.mxu1 }
0x3cdc   :  { %v8543_v58 = vpop.f32.mrf.mxu1 }
0x3ce2   :  { %v6394_v40 = vpop.f32.mrf.mxu1 }
0x3ce3   :  { %v6395_v15 = vadd.f32 %v6394_v40, %v6220_v49 }
0x3ce4   :  { %v8565_v5 = vpop.f32.mrf.mxu1 }
0x3ce5   :  { %v6398_v1 = vadd.f32 %v10681_v32, %v6395_v15  ;;  %v6932_v5 = vld [vmem:[%s11002_s9 + $0x10] sm:$0xff] }
0x3ce7   :  { %9025 = vtanh.f32 %v6398_v1  ;;  %v7362_v17 = vmul.f32 -1.442695, %v6398_v1  ;;  %v6906_v1 = vld [vmem:[#allocation3] sm:$0xff] }
0x3cf4   :  { %v9026_v50 = vpop.eup %9025 }
0x3cf5   :  { %6408 = vrot.lane.b32.xlu0 %v9026_v50, %s9100_s0  ;;  %v6931_v50 = vld [vmem:[%s11002_s9 + $0x8] sm:$0xff] }
0x3d0a   :  { %v6518_v46 = vpop.permute.xlu1 %6517 }
0x3d0b   :  { %v10759_v45 = vadd.f32 %v6518_v46, %v6510_v20  ;;  %v6930_v20 = vld [vmem:[%s11002_s9] sm:$0xff]  ;;  %v6907_v46 = vld [vmem:[#allocation3 + $0x8] sm:$0xff] }
0x3d0d   :  { %9027 = vtanh.f32 %v10759_v45 }
0x3d0e   :  { %9029 = vpow2.f32 %v7362_v17  ;;  %v6910_v17 = vld [vmem:[#allocation3 + $0x20] sm:$0xff] }
0x3d1a   :  { %v9028_v29 = vpop.eup %9027 }
0x3d1b   :  { %6523 = vrot.lane.b32.xlu1 %v9028_v29, %s9100_s0  ;;  %v9030_v52 = vpop.eup %9029  ;;  %v6909_v29 = vld [vmem:[#allocation3 + $0x18] sm:$0xff] }
0x3d1c   :  { %v6402_v26 = vadd.f32 1.0, %v9030_v52  ;;  %v6911_v52 = vld [vmem:[#allocation3 + $0x28] sm:$0xff] }
0x3d1e   :  { %9031 = vrcp.f32 %v6402_v26  ;;  %v6912_v26 = vld [vmem:[#allocation3 + $0x30] sm:$0xff] }
0x3d2b   :  { %v9032_v63 = vpop.eup %9031 }
0x3d2c   :  { %v6406_v19 = vmul.f32 %v9032_v63, %v10693_v37 }
0x3d67   :  { %v6409_v28 = vpop.permute.xlu0 %6408 }
0x3d68   :  { %v6411_v39 = vmul.f32 %v9032_v63, %v6409_v28  ;;  %v6914_v28 = vld [vmem:[#allocation3 + $0x40] sm:$0xff] }
0x3d6a   :  { %6413 = vrot.lane.b32.xlu0 %v6411_v39, %s9101_s4  ;;  %v6915_v39 = vld [vmem:[#allocation3 + $0x48] sm:$0xff] }
0x3d8d   :  { %v6524_v56 = vpop.permute.xlu1 %6523 }
0x3d8e   :  { %v6526_v23 = vmul.f32 %v9024_v47, %v6524_v56  ;;  %v6916_v56 = vld [vmem:[#allocation3 + $0x50] sm:$0xff] }
0x3d90   :  { %6528 = vrot.lane.b32.xlu1 %v6526_v23, %s9101_s4  ;;  %v6917_v23 = vld [vmem:[#allocation3 + $0x58] sm:$0xff] }
0x3ddc   :  { %v6414_v25 = vpop.permute.xlu0 %6413 }
0x3ddd   :  { %v10766_v35 = vadd.f32 %v6414_v25, %v6406_v19  ;;  %v6918_v19 = vld [vmem:[#allocation3 + $0x60] sm:$0xff]  ;;  %v6919_v25 = vld [vmem:[#allocation3 + $0x68] sm:$0xff] }
0x3ddf   :  { %9033 = vtanh.f32 %v10766_v35 }
0x3dec   :  { %v9034_v38 = vpop.eup %9033 }
0x3ded   :  { %6419 = vrot.lane.b32.xlu0 %v9034_v38, %s9100_s0  ;;  %v6921_v38 = vld [vmem:[#allocation3 + $0x78] sm:$0xff] }
0x3e02   :  { %v6529_v57 = vpop.permute.xlu1 %6528 }
0x3e03   :  { %8586 = vmatmul.mubr.msk.f32.vlgmr.msra.gmra.mxu1 %vm502_vm3, %v6529_v57 }
0x3e04   :  { %8600 = vmatpush3.msra.mxu1 %v10701_v4  ;;  %8607 = vmatprep.mubr.msk.f32.mxu1 %vm9099_vm1, %v9098_v0 }
0x3e05   :  { %8601 = vmatprep.subr.mxu1 %v9098_v0 }
0x3e06   :  { %8602 = vmatpush3.msra.mxu1 %v10710_v8 }
0x3e07   :  { %8603 = vmatprep.subr.mxu1 %v9098_v0 }
0x3e08   :  { %8604 = vmatpush3.msra.mxu1 %v10717_v3 }
0x3e09   :  { %8605 = vmatprep.subr.mxu1 %v9098_v0 }
0x3e0a   :  { %8606 = vmatpush3.msra.mxu1 %v10724_v36 }
0x3e0b   :  { %8621 = vmatprep.subr.mxu1 %v6933_v27 }
0x3e5f   :  { %v6420_v42 = vpop.permute.xlu0 %6419 }
0x3e60   :  { %v6422_v30 = vmul.f32 %v9032_v63, %v6420_v42  ;;  %v6913_v63 = vld [vmem:[#allocation3 + $0x38] sm:$0xff]  ;;  %v6923_v42 = vld [vmem:[#allocation3 + $0x88] sm:$0xff] }
0x3e62   :  { %6424 = vrot.lane.b32.xlu0 %v6422_v30, %s9101_s4  ;;  %v6924_v30 = vld [vmem:[#allocation3 + $0x90] sm:$0xff] }
0x3ec3   :  { %v6598_v31 = vpop.f32.mrf.mxu1 }
0x3ec4   :  { %v6776_v10 = vadd.f32 %v6598_v31, %v9347_v14  ;;  %v6925_v31 = vld [vmem:[#allocation3 + $0x98] sm:$0xff] }
0x3ec5   :  { %v8587_v34 = vpop.f32.mrf.mxu1 }
0x3ec6   :  { %9035 = vtanh.f32 %v6776_v10  ;;  %v7369_v14 = vmul.f32 -1.442695, %v6776_v10  ;;  %v6926_v10 = vld [vmem:[#allocation3 + $0xa0] sm:$0xff] }
0x3ec8   :  { %9037 = vpow2.f32 %v7369_v14 }
0x3ed3   :  { %v9036_v62 = vpop.eup %9035 }
0x3ed4   :  { %v6425_v44 = vpop.permute.xlu0 %6424  ;;  %6786 = vrot.lane.b32.xlu1 %v9036_v62, %s9100_s0 }
0x3ed5   :  { %6499 = vst.msk [vmem:[#allocation3 + $0xa8] sm:$0xff] %vm502_vm3, %v6425_v44  ;;  %8575 = vmatmul.mubr.msk.f32.vlgmr.msra.gmra.mxu0 %vm502_vm3, %v6425_v44  ;;  %v9038_v59 = vpop.eup %9037 }
0x3ed6   :  { %8589 = vmatpush3.msra.mxu0 %v10617_v18  ;;  %8596 = vmatprep.mubr.msk.f32.mxu0 %vm9099_vm1, %v9098_v0  ;;  %v6780_v12 = vadd.f32 1.0, %v9038_v59 }
0x3ed7   :  { %8590 = vmatprep.subr.mxu0 %v9098_v0 }
0x3ed8   :  { %8591 = vmatpush3.msra.mxu0 %v10626_v24  ;;  %9039 = vrcp.f32 %v6780_v12 }
0x3ed9   :  { %8592 = vmatprep.subr.mxu0 %v9098_v0 }
0x3eda   :  { %8593 = vmatpush3.msra.mxu0 %v10634_v22 }
0x3edb   :  { %8594 = vmatprep.subr.mxu0 %v9098_v0 }
0x3edc   :  { %8595 = vmatpush3.msra.mxu0 %v10641_v43  ;;  %v6927_v34 = vld [vmem:[#allocation3 + $0xa8] sm:$0xff] }
0x3edd   :  { %8597 = vmatmul.mubr.msk.f32.vlgmr.msra.gmra.mxu0 %vm502_vm3, %v6529_v57  ;;  %8610 = vmatprep.subr.mxu0 %v9098_v0  ;;  %v6922_v57 = vld [vmem:[#allocation3 + $0x80] sm:$0xff] }
0x3ede   :  { %8611 = vmatpush3.msra.mxu0 %v10617_v18  ;;  %8618 = vmatprep.mubr.msk.f32.mxu0 %vm9099_vm1, %v9098_v0 }
0x3edf   :  { %8612 = vmatprep.subr.mxu0 %v9098_v0 }
0x3ee0   :  { %8613 = vmatpush3.msra.mxu0 %v10626_v24 }
0x3ee1   :  { %8614 = vmatprep.subr.mxu0 %v9098_v0 }
0x3ee2   :  { %8615 = vmatpush3.msra.mxu0 %v10634_v22 }
0x3ee3   :  { %8616 = vmatprep.subr.mxu0 %v9098_v0 }
0x3ee4   :  { %8617 = vmatpush3.msra.mxu0 %v10641_v43 }
0x3ee5   :  { %v9040_v18 = vpop.eup %9039 }
0x3ee6   :  { %v6784_v43 = vmul.f32 %v9040_v18, %v10759_v45  ;;  %v6908_v45 = vld [vmem:[#allocation3 + $0x10] sm:$0xff] }
0x3f46   :  { %v6787_v54 = vpop.permute.xlu1 %6786 }
0x3f47   :  { %v6789_v55 = vmul.f32 %v9040_v18, %v6787_v54 }
0x3f49   :  { %6791 = vrot.lane.b32.xlu1 %v6789_v55, %s9101_s4 }
0x3f95   :  { %v6494_v61 = vpop.f32.mrf.mxu0 }
0x3f97   :  { %v8576_v24 = vpop.f32.mrf.mxu0 }
0x3f9d   :  { %v6668_v37 = vpop.f32.mrf.mxu0 }
0x3f9e   :  { %v6669_v2 = vadd.f32 %v6668_v37, %v6494_v61 }
0x3f9f   :  { %v8598_v21 = vpop.f32.mrf.mxu0 }
0x3fa0   :  { %v6672_v22 = vadd.f32 %v10681_v32, %v6669_v2 }
0x3fa2   :  { %9041 = vtanh.f32 %v6672_v22  ;;  %v7367_v36 = vmul.f32 -1.442695, %v6672_v22 }
0x3faf   :  { %v9042_v0 = vpop.eup %9041 }
0x3fb0   :  { %6682 = vrot.lane.b32.xlu0 %v9042_v0, %s9100_s0 }
0x3fbb   :  { %v6792_v4 = vpop.permute.xlu1 %6791 }
0x3fbc   :  { %v6794_v8 = vadd.f32 %v6792_v4, %v6784_v43 }
0x3fbe   :  { %9043 = vtanh.f32 %v6794_v8 }
0x3fbf   :  { %9045 = vpow2.f32 %v7367_v36 }
0x3fcb   :  { %v9044_v3 = vpop.eup %9043 }
0x3fcc   :  { %6797 = vrot.lane.b32.xlu1 %v9044_v3, %s9100_s0  ;;  %v9046_v48 = vpop.eup %9045 }
0x3fcd   :  { %v6676_v11 = vadd.f32 1.0, %v9046_v48 }
0x3fcf   :  { %9047 = vrcp.f32 %v6676_v11 }
0x3fdc   :  { %v9048_v9 = vpop.eup %9047 }
0x3fdd   :  { %v6680_v33 = vmul.f32 %v9048_v9, %v10766_v35  ;;  %v6920_v35 = vld [vmem:[#allocation3 + $0x70] sm:$0xff] }
0x4022   :  { %v6683_v13 = vpop.permute.xlu0 %6682 }
0x4023   :  { %v6685_v53 = vmul.f32 %v9048_v9, %v6683_v13 }
0x4025   :  { %6687 = vrot.lane.b32.xlu0 %v6685_v53, %s9101_s4 }
0x403e   :  { %v6798_v6 = vpop.permute.xlu1 %6797 }
0x403f   :  { %v6800_v16 = vmul.f32 %v9040_v18, %v6798_v6  ;;  %v10863_v18 = vld [vmem:[%s11003_s10] ss:$0 sm:$0xff] }
0x4041   :  { %6802 = vrot.lane.b32.xlu1 %v6800_v16, %s9101_s4 }
0x4097   :  { %v6688_v7 = vpop.permute.xlu0 %6687 }
0x4098   :  { %v10813_v41 = vadd.f32 %v6688_v7, %v6680_v33 }
0x409a   :  { %9049 = vtanh.f32 %v10813_v41 }
0x40a7   :  { %v9050_v60 = vpop.eup %9049 }
0x40a8   :  { %6693 = vrot.lane.b32.xlu0 %v9050_v60, %s9100_s0 }
0x40b3   :  { %v6803_v47 = vpop.permute.xlu1 %6802 }
0x40b4   :  { %8619 = vmatmul.mubr.msk.f32.vlgmr.msra.gmra.mxu0 %vm502_vm3, %v6803_v47 }
0x411a   :  { %v6694_v51 = vpop.permute.xlu0 %6693 }
0x411b   :  { %v6696_v49 = vmul.f32 %v9048_v9, %v6694_v51 }
0x411d   :  { %6698 = vrot.lane.b32.xlu0 %v6696_v49, %s9101_s4 }
0x4174   :  { %v6872_v58 = vpop.f32.mrf.mxu0 }
0x4176   :  { %v8620_v40 = vpop.f32.mrf.mxu0 }
0x418f   :  { %v6699_v15 = vpop.permute.xlu0 %6698 }
0x4190   :  { %6773 = vst.msk [vmem:[#allocation3 + $0xb0] sm:$0xff] %vm502_vm3, %v6699_v15  ;;  %8608 = vmatmul.mubr.msk.f32.vlgmr.msra.gmra.mxu1 %vm502_vm3, %v6699_v15 }
0x4191   :  { %8622 = vmatpush3.msra.mxu1 %v6933_v27  ;;  %8629 = vmatprep.mubr.msk.f32.mxu1 %vm502_vm3, %v6906_v1 }
0x4192   :  { %8623 = vmatprep.subr.mxu1 %v6932_v5 }
0x4193   :  { %8624 = vmatpush3.msra.mxu1 %v6932_v5 }
0x4194   :  { %8625 = vmatprep.subr.mxu1 %v6931_v50 }
0x4195   :  { %8626 = vmatpush3.msra.mxu1 %v6931_v50 }
0x4196   :  { %8627 = vmatprep.subr.mxu1 %v6930_v20 }
0x4197   :  { %8628 = vmatpush3.msra.mxu1 %v6930_v20  ;;  %v6928_v62 = vld [vmem:[#allocation3 + $0xb0] sm:$0xff] }
0x4198   :  { %8630 = vmatmul.mubr.msk.f32.vlgmr.msra.gmra.mxu1 %vm502_vm3, %v6907_v46 }
0x4199   :  { %8632 = vmatprep.mubr.msk.f32.mxu1 %vm502_vm3, %v6908_v45 }
0x419c   :  { %8633 = vmatmul.mubr.msk.f32.gmra.mxu1 %vm502_vm3, %v6909_v29 }
0x419d   :  { %8635 = vmatprep.mubr.msk.f32.mxu1 %vm502_vm3, %v6910_v17 }
0x41a0   :  { %8636 = vmatmul.mubr.msk.f32.gmra.mxu1 %vm502_vm3, %v6911_v52 }
0x41a1   :  { %8638 = vmatprep.mubr.msk.f32.mxu1 %vm502_vm3, %v6912_v26 }
0x41a4   :  { %8639 = vmatmul.mubr.msk.f32.gmra.mxu1 %vm502_vm3, %v6913_v63 }
0x41a5   :  { %8641 = vmatprep.mubr.msk.f32.mxu1 %vm502_vm3, %v6914_v28 }
0x41a8   :  { %8642 = vmatmul.mubr.msk.f32.gmra.mxu1 %vm502_vm3, %v6915_v39 }
0x41a9   :  { %8644 = vmatprep.mubr.msk.f32.mxu1 %vm502_vm3, %v6916_v56 }
0x41ac   :  { %8645 = vmatmul.mubr.msk.f32.gmra.mxu1 %vm502_vm3, %v6917_v23 }
0x41ad   :  { %8647 = vmatprep.mubr.msk.f32.mxu1 %vm502_vm3, %v6918_v19 }
0x41b0   :  { %8648 = vmatmul.mubr.msk.f32.gmra.mxu1 %vm502_vm3, %v6919_v25 }
0x41b1   :  { %8650 = vmatprep.mubr.msk.f32.mxu1 %vm502_vm3, %v6920_v35 }
0x41b4   :  { %8651 = vmatmul.mubr.msk.f32.gmra.mxu1 %vm502_vm3, %v6921_v38 }
0x41b5   :  { %8653 = vmatprep.mubr.msk.f32.mxu1 %vm502_vm3, %v6922_v57 }
0x41b8   :  { %8654 = vmatmul.mubr.msk.f32.gmra.mxu1 %vm502_vm3, %v6923_v42 }
0x41b9   :  { %8656 = vmatprep.mubr.msk.f32.mxu1 %vm502_vm3, %v6924_v30 }
0x41bc   :  { %8657 = vmatmul.mubr.msk.f32.gmra.mxu1 %vm502_vm3, %v6925_v31 }
0x41bd   :  { %8659 = vmatprep.mubr.msk.f32.mxu1 %vm502_vm3, %v6926_v10 }
0x41c0   :  { %8660 = vmatmul.mubr.msk.f32.gmra.mxu1 %vm502_vm3, %v6927_v34 }
0x41c1   :  { %8662 = vmatprep.mubr.msk.f32.mxu1 %vm502_vm3, %v6928_v62 }
0x4250   :  { %v6768_v44 = vpop.f32.mrf.mxu1 }
0x4251   :  { %v6873_v14 = vadd.f32 %v6872_v58, %v6768_v44 }
0x4252   :  { %v8609_v59 = vpop.f32.mrf.mxu1 }
0x4253   :  { %v10857_v12 = vadd.f32 %v10681_v32, %v6873_v14 }
0x4255   :  { %9051 = vtanh.f32 %v10857_v12  ;;  %v7371_v56 = vmul.f32 -1.442695, %v10857_v12 }
0x4257   :  { %9053 = vpow2.f32 %v7371_v56 }
0x4258   :  { %v8631_v54 = vpop.f32.mrf.mxu1 }
0x4259   :  { %v7085_v55 = vadd.f32 %v8631_v54, %v10863_v18 }
0x425a   :  { %v7079_v61 = vpop.f32.mrf.mxu1 }
0x425b   :  { %7200 = vst.msk [vmem:[%s11004_s11 + $0x8] sm:$0xff] %vm7198_vm4, %v7085_v55  ;;  %v7080_v32 = vadd.f32 %v10863_v18, %v7079_v61 }
0x425c   :  { %v8634_v24 = vpop.f32.mrf.mxu1 }
0x425d   :  { %7199 = vst.msk [vmem:[%s11004_s11] sm:$0xff] %vm7198_vm4, %v7080_v32  ;;  %v7095_v37 = vadd.f32 %v8634_v24, %v10863_v18 }
0x425e   :  { %v7089_v2 = vpop.f32.mrf.mxu1 }
0x425f   :  { %7202 = vst.msk [vmem:[%s11004_s11 + $0x18] sm:$0xff] %vm7198_vm4, %v7095_v37  ;;  %v7090_v21 = vadd.f32 %v10863_v18, %v7089_v2 }
0x4260   :  { %v8637_v22 = vpop.f32.mrf.mxu1 }
0x4261   :  { %7201 = vst.msk [vmem:[%s11004_s11 + $0x10] sm:$0xff] %vm7198_vm4, %v7090_v21  ;;  %v7105_v0 = vadd.f32 %v8637_v22, %v10863_v18 }
0x4262   :  { %v9052_v43 = vpop.eup %9051  ;;  %v7099_v4 = vpop.f32.mrf.mxu1 }
0x4263   :  { %7204 = vst.msk [vmem:[%s11004_s11 + $0x28] sm:$0xff] %vm7198_vm4, %v7105_v0  ;;  %v7100_v8 = vadd.f32 %v10863_v18, %v7099_v4  ;;  %6886 = vrot.lane.b32.xlu0 %v9052_v43, %s9100_s0 }
0x4264   :  { %v8640_v3 = vpop.f32.mrf.mxu1  ;;  %v9054_v23 = vpop.eup %9053 }
0x4265   :  { %7203 = vst.msk [vmem:[%s11004_s11 + $0x20] sm:$0xff] %vm7198_vm4, %v7100_v8  ;;  %v7115_v36 = vadd.f32 %v8640_v3, %v10863_v18  ;;  %v6880_v19 = vadd.f32 1.0, %v9054_v23 }
0x4266   :  { %v7109_v48 = vpop.f32.mrf.mxu1 }
0x4267   :  { %7206 = vst.msk [vmem:[%s11004_s11 + $0x38] sm:$0xff] %vm7198_vm4, %v7115_v36  ;;  %v7110_v11 = vadd.f32 %v10863_v18, %v7109_v48  ;;  %9055 = vrcp.f32 %v6880_v19 }
0x4268   :  { %v8643_v9 = vpop.f32.mrf.mxu1 }
0x4269   :  { %7205 = vst.msk [vmem:[%s11004_s11 + $0x30] sm:$0xff] %vm7198_vm4, %v7110_v11  ;;  %v7125_v13 = vadd.f32 %v8643_v9, %v10863_v18 }
0x426a   :  { %v7119_v53 = vpop.f32.mrf.mxu1 }
0x426b   :  { %7208 = vst.msk [vmem:[%s11004_s11 + $0x48] sm:$0xff] %vm7198_vm4, %v7125_v13  ;;  %v7120_v6 = vadd.f32 %v10863_v18, %v7119_v53 }
0x426c   :  { %v8646_v16 = vpop.f32.mrf.mxu1 }
0x426d   :  { %7207 = vst.msk [vmem:[%s11004_s11 + $0x40] sm:$0xff] %vm7198_vm4, %v7120_v6  ;;  %v7135_v33 = vadd.f32 %v8646_v16, %v10863_v18 }
0x426e   :  { %v7129_v7 = vpop.f32.mrf.mxu1 }
0x426f   :  { %7210 = vst.msk [vmem:[%s11004_s11 + $0x58] sm:$0xff] %vm7198_vm4, %v7135_v33  ;;  %v7130_v60 = vadd.f32 %v10863_v18, %v7129_v7 }
0x4270   :  { %v8649_v47 = vpop.f32.mrf.mxu1 }
0x4271   :  { %7209 = vst.msk [vmem:[%s11004_s11 + $0x50] sm:$0xff] %vm7198_vm4, %v7130_v60  ;;  %v7145_v27 = vadd.f32 %v8649_v47, %v10863_v18 }
0x4272   :  { %v7139_v51 = vpop.f32.mrf.mxu1 }
0x4273   :  { %7212 = vst.msk [vmem:[%s11004_s11 + $0x68] sm:$0xff] %vm7198_vm4, %v7145_v27  ;;  %v7140_v49 = vadd.f32 %v10863_v18, %v7139_v51 }
0x4274   :  { %v8652_v58 = vpop.f32.mrf.mxu1  ;;  %v9056_v25 = vpop.eup %9055 }
0x4275   :  { %7211 = vst.msk [vmem:[%s11004_s11 + $0x60] sm:$0xff] %vm7198_vm4, %v7140_v49  ;;  %v7155_v40 = vadd.f32 %v8652_v58, %v10863_v18  ;;  %v6884_v57 = vmul.f32 %v9056_v25, %v10813_v41 }
0x4276   :  { %v7149_v15 = vpop.f32.mrf.mxu1 }
0x4277   :  { %7214 = vst.msk [vmem:[%s11004_s11 + $0x78] sm:$0xff] %vm7198_vm4, %v7155_v40  ;;  %v7150_v5 = vadd.f32 %v10863_v18, %v7149_v15 }
0x4278   :  { %v8655_v1 = vpop.f32.mrf.mxu1 }
0x4279   :  { %7213 = vst.msk [vmem:[%s11004_s11 + $0x70] sm:$0xff] %vm7198_vm4, %v7150_v5  ;;  %v7165_v50 = vadd.f32 %v8655_v1, %v10863_v18 }
0x427a   :  { %v7159_v20 = vpop.f32.mrf.mxu1 }
0x427b   :  { %7216 = vst.msk [vmem:[%s11004_s11 + $0x88] sm:$0xff] %vm7198_vm4, %v7165_v50  ;;  %v7160_v46 = vadd.f32 %v10863_v18, %v7159_v20 }
0x427c   :  { %v8658_v45 = vpop.f32.mrf.mxu1 }
0x427d   :  { %7215 = vst.msk [vmem:[%s11004_s11 + $0x80] sm:$0xff] %vm7198_vm4, %v7160_v46  ;;  %v7175_v29 = vadd.f32 %v8658_v45, %v10863_v18 }
0x427e   :  { %v7169_v17 = vpop.f32.mrf.mxu1 }
0x427f   :  { %7218 = vst.msk [vmem:[%s11004_s11 + $0x98] sm:$0xff] %vm7198_vm4, %v7175_v29  ;;  %v7170_v52 = vadd.f32 %v10863_v18, %v7169_v17 }
0x4280   :  { %v8661_v26 = vpop.f32.mrf.mxu1 }
0x4281   :  { %7217 = vst.msk [vmem:[%s11004_s11 + $0x90] sm:$0xff] %vm7198_vm4, %v7170_v52  ;;  %v7185_v63 = vadd.f32 %v8661_v26, %v10863_v18 }
0x4282   :  { %v7179_v28 = vpop.f32.mrf.mxu1 }
0x4283   :  { %7220 = vst.msk [vmem:[%s11004_s11 + $0xa8] sm:$0xff] %vm7198_vm4, %v7185_v63  ;;  %v7180_v39 = vadd.f32 %v10863_v18, %v7179_v28 }
0x4285   :  { %7219 = vst.msk [vmem:[%s11004_s11 + $0xa0] sm:$0xff] %vm7198_vm4, %v7180_v39 }
0x42d5   :  { %v6887_v35 = vpop.permute.xlu0 %6886 }
0x42d6   :  { %v6889_v38 = vmul.f32 %v9056_v25, %v6887_v35 }
0x42d8   :  { %6891 = vrot.lane.b32.xlu1 %v6889_v38, %s9101_s4 }
0x434a   :  { %v6892_v42 = vpop.permute.xlu1 %6891 }
0x434b   :  { %v6894_v30 = vadd.f32 %v6892_v42, %v6884_v57 }
0x434d   :  { %9057 = vtanh.f32 %v6894_v30 }
0x435a   :  { %v9058_v31 = vpop.eup %9057 }
0x435b   :  { %6897 = vrot.lane.b32.xlu0 %v9058_v31, %s9100_s0 }
0x43cd   :  { %v6898_v10 = vpop.permute.xlu0 %6897 }
0x43ce   :  { %v6900_v34 = vmul.f32 %v9056_v25, %v6898_v10 }
0x43d0   :  { %6902 = vrot.lane.b32.xlu1 %v6900_v34, %s9101_s4 }
0x4442   :  { %v6903_v62 = vpop.permute.xlu1 %6902 }
0x4443   :  { %6905 = vst.msk [vmem:[#allocation3 + $0xb8] sm:$0xff] %vm502_vm3, %v6903_v62 }
0x444a   :  { %v6929_v44 = vld [vmem:[#allocation3 + $0xb8] sm:$0xff] }
0x444b   :  { %8663 = vmatmul.mubr.msk.f32.gmra.mxu1 %vm502_vm3, %v6929_v44 }
0x450b   :  { %v8664_v14 = vpop.f32.mrf.mxu1 }
0x450c   :  { %v7195_v59 = vadd.f32 %v8664_v14, %v10863_v18 }
0x450d   :  { %v7189_v41 = vpop.f32.mrf.mxu1 }
0x450e   :  { %7222 = vst.msk [vmem:[%s11004_s11 + $0xb8] sm:$0xff] %vm7198_vm4, %v7195_v59  ;;  %v7190_v12 = vadd.f32 %v10863_v18, %v7189_v41 }
0x4510   :  { %7221 = vst.msk [vmem:[%s11004_s11 + $0xb0] sm:$0xff] %vm7198_vm4, %v7190_v12 }

</bundles_post_ra>
